<compile_context>
chip_gen: v6e
topology: v6e:2x2x1
jax: 0.10.0
libtpu: 0.0.40
codegen_flags: <defaults>
</compile_context>

<pallas_src>
import numpy as np
import jax
import jax.numpy as jnp
from jax.experimental import pallas as pl
from jax.experimental.pallas import tpu as pltpu


# (offset-into-padded-y1, kernel-tap) pairs per output parity for
# ConvTranspose2d(k=4, s=2, p=1):  oy = 2*iy - 1 + ky, pad[ro + m] == y1[m + ro - 1].
_PARITY_TERMS = {0: ((1, 1), (0, 3)), 1: ((1, 2), (2, 0))}


def fuse_block_kernel(deep_ref, shallow_ref, w1_ref, b1_ref, wup_ref, w2_ref,
                      b2_ref, o_ref, y1pad_ref, fusep_ref):
    # blocks:  deep (1, H*W, Cin)   shallow (1, Ho, W, 2P)  [width-parity packed]
    #          w1 (Cin, P)  b1 (1, P)  wup (16, P)  w2 (9, 2P, P)  b2 (1, P)
    #          out (1, Ho, W, 2P)  [width-parity packed]
    # scratch: y1pad (H+2, W+2, P)   fusep (Ho+2, W+2, 4P)
    Hp2, Wp2, P = y1pad_ref.shape
    H, W = Hp2 - 2, Wp2 - 2
    Ho = 2 * H
    C2 = 2 * P                      # channels of the fused tensor (deep_up | shallow)

    f32 = jnp.float32

    # ---- stage 1: 1x1 conv (BN1 scale pre-folded into w1) + bias + ReLU ------
    y1 = jnp.dot(deep_ref[0], w1_ref[...], preferred_element_type=f32)
    y1 = jnp.maximum(y1 + b1_ref[...], 0.0).reshape(H, W, P)

    # Halo-only zeroing (interiors are fully overwritten every grid step; the
    # halo is re-zeroed each step so this is safe under megacore partitioning).
    y1pad_ref[0:1, :, :] = jnp.zeros((1, Wp2, P), f32)
    y1pad_ref[H + 1:H + 2, :, :] = jnp.zeros((1, Wp2, P), f32)
    y1pad_ref[:, 0:1, :] = jnp.zeros((Hp2, 1, P), f32)
    y1pad_ref[:, W + 1:W + 2, :] = jnp.zeros((Hp2, 1, P), f32)
    y1pad_ref[1:H + 1, 1:W + 1, :] = y1

    fusep_ref[0:1, :, :] = jnp.zeros((1, Wp2, 2 * C2), f32)
    fusep_ref[Ho + 1:Ho + 2, :, :] = jnp.zeros((1, Wp2, 2 * C2), f32)
    fusep_ref[:, 0:1, :] = jnp.zeros((Ho + 2, 1, 2 * C2), f32)
    fusep_ref[:, W + 1:W + 2, :] = jnp.zeros((Ho + 2, 1, 2 * C2), f32)

    # ---- stage 2: depthwise ConvTranspose2d(k=4, s=2, p=1, groups=P) ---------
    # 4 output-parity planes; height interleave via leading-dim stack+reshape
    # (layout free), width parity kept packed in the lane dim of fusep.
    wdc = wup_ref[...]                                        # (16, P)
    wtap = [wdc[k:k + 1, :].reshape(1, 1, P) for k in range(16)]   # hoisted once

    for b in (0, 1):                 # output width parity
        rows = []
        for a in (0, 1):             # output height parity
            acc = None
            for ro, ky in _PARITY_TERMS[a]:
                for co, kx in _PARITY_TERMS[b]:
                    term = y1pad_ref[ro:ro + H, co:co + W, :] * wtap[ky * 4 + kx]
                    acc = term if acc is None else acc + term
            rows.append(acc)
        # (H, 2, W, P) -> (Ho, W, P): leading-dim merge, no relayout
        u_b = jnp.stack(rows, axis=1).reshape(Ho, W, P)
        fusep_ref[1:Ho + 1, 1:W + 1, b * C2:b * C2 + P] = u_b

    # concat([deep_up, shallow], channel): shallow halves into the packed buffer
    sh = shallow_ref[0]                                       # (Ho, W, 2P)
    fusep_ref[1:Ho + 1, 1:W + 1, P:C2] = sh[:, :, 0:P]            # width parity 0
    fusep_ref[1:Ho + 1, 1:W + 1, C2 + P:2 * C2] = sh[:, :, P:C2]  # width parity 1

    # ---- stage 3: 3x3 conv (pad 1, BN2 folded) + bias + ReLU -----------------
    # Decomposed by output width parity; 18 accumulating matmuls directly off
    # fusep ref windows (no im2col scratch).  Operand x-offsets per parity d and
    # tap dx:  t = d - 1 + dx -> packed column shift s = t>>1, lane half h = t&1.
    acc0 = None
    acc1 = None
    for dy in range(3):
        a_m1 = fusep_ref[dy:dy + Ho, 0:W, C2:2 * C2].reshape(Ho * W, C2)      # x-1
        a_0 = fusep_ref[dy:dy + Ho, 1:W + 1, 0:C2].reshape(Ho * W, C2)        # x+0
        a_1 = fusep_ref[dy:dy + Ho, 1:W + 1, C2:2 * C2].reshape(Ho * W, C2)   # x+1
        a_2 = fusep_ref[dy:dy + Ho, 2:W + 2, 0:C2].reshape(Ho * W, C2)        # x+2
        w_a = w2_ref[3 * dy + 0]
        w_b = w2_ref[3 * dy + 1]
        w_c = w2_ref[3 * dy + 2]
        t0 = (jnp.dot(a_m1, w_a, preferred_element_type=f32)
              + jnp.dot(a_0, w_b, preferred_element_type=f32)
              + jnp.dot(a_1, w_c, preferred_element_type=f32))
        t1 = (jnp.dot(a_0, w_a, preferred_element_type=f32)
              + jnp.dot(a_1, w_b, preferred_element_type=f32)
              + jnp.dot(a_2, w_c, preferred_element_type=f32))
        acc0 = t0 if acc0 is None else acc0 + t0
        acc1 = t1 if acc1 is None else acc1 + t1

    b2 = b2_ref[...]
    o_ref[0, :, :, 0:P] = jnp.maximum(acc0 + b2, 0.0).reshape(Ho, W, P)
    o_ref[0, :, :, P:C2] = jnp.maximum(acc1 + b2, 0.0).reshape(Ho, W, P)


@jax.jit
def fuse_block(deep, shallow, params):
    """deep: (N, H, W, Cin) NHWC ; shallow: (N, 2H, 2W, P) NHWC -> (N, 2H, 2W, P)."""
    w1, scale1, bias1, wt, w2d, w2s, scale2, bias2 = params
    N, H, W, Cin = deep.shape
    P = w1.shape[1]
    Ho, Wo = 2 * H, 2 * W
    C2 = 2 * P

    # Fold BN scales into the conv weights (once per call, outside the kernel).
    w1f = w1 * scale1[None, :]
    w2cat = jnp.concatenate([w2d * scale2[None, None, :],
                             w2s * scale2[None, None, :]], axis=1)   # (9, 2P, P)
    b1 = bias1.reshape(1, P)
    b2 = bias2.reshape(1, P)

    # Free row-major host-side re-packings (no transpose, no copy semantics):
    deep_r = deep.reshape(N, H * W, Cin)
    shallow_p = shallow.reshape(N, Ho, W, C2)   # width-parity packed: [d0 | d1]

    out_p = pl.pallas_call(
        fuse_block_kernel,
        grid=(N,),
        in_specs=[
            pl.BlockSpec((1, H * W, Cin), lambda n: (n, 0, 0)),
            pl.BlockSpec((1, Ho, W, C2), lambda n: (n, 0, 0, 0)),
            pl.BlockSpec((Cin, P), lambda n: (0, 0)),
            pl.BlockSpec((1, P), lambda n: (0, 0)),
            pl.BlockSpec((16, P), lambda n: (0, 0)),
            pl.BlockSpec((9, C2, P), lambda n: (0, 0, 0)),
            pl.BlockSpec((1, P), lambda n: (0, 0)),
        ],
        out_specs=pl.BlockSpec((1, Ho, W, C2), lambda n: (n, 0, 0, 0)),
        out_shape=jax.ShapeDtypeStruct((N, Ho, W, C2), jnp.float32),
        scratch_shapes=[
            pltpu.VMEM((H + 2, W + 2, P), jnp.float32),        # padded y1
            pltpu.VMEM((Ho + 2, W + 2, 2 * C2), jnp.float32),  # packed padded fuse
        ],
        compiler_params=pltpu.CompilerParams(
            dimension_semantics=("parallel",)),
    )(deep_r, shallow_p, w1f, b1, wt, w2cat, b2)

    return out_p.reshape(N, Ho, Wo, P)   # free: unpack width parity back to NHWC


# ------------------------- pure-numpy NCHW reference --------------------------
def reference_numpy(deep_nhwc, shallow_nhwc, params):
    w1, scale1, bias1, wt, w2d, w2s, scale2, bias2 = [np.asarray(p) for p in params]
    deep = np.transpose(np.asarray(deep_nhwc), (0, 3, 1, 2)).astype(np.float64)
    shallow = np.transpose(np.asarray(shallow_nhwc), (0, 3, 1, 2)).astype(np.float64)
    N, Cin, H, W = deep.shape
    P = w1.shape[1]
    # conv1 (1x1) + bn1 + relu
    y1 = np.einsum('nchw,cp->nphw', deep, w1)
    y1 = np.maximum(y1 * scale1[None, :, None, None] + bias1[None, :, None, None], 0.0)
    # depthwise ConvTranspose2d(k=4, s=2, p=1, groups=P): oy = 2*iy - 1 + ky
    Ho, Wo = 2 * H, 2 * W
    wdc = wt.reshape(4, 4, P)
    up = np.zeros((N, P, Ho, Wo))
    for ky in range(4):
        for kx in range(4):
            for iy in range(H):
                oy = 2 * iy - 1 + ky
                if not (0 <= oy < Ho):
                    continue
                for ix in range(W):
                    ox = 2 * ix - 1 + kx
                    if not (0 <= ox < Wo):
                        continue
                    up[:, :, oy, ox] += y1[:, :, iy, ix] * wdc[ky, kx][None, :]
    # concat + conv2 (3x3, pad 1) + bn2 + relu
    upp = np.pad(up, ((0, 0), (0, 0), (1, 1), (1, 1)))
    shp = np.pad(shallow, ((0, 0), (0, 0), (1, 1), (1, 1)))
    z = np.zeros((N, P, Ho, Wo))
    for dy in range(3):
        for dx in range(3):
            z += np.einsum('nchw,cp->nphw', upp[:, :, dy:dy + Ho, dx:dx + Wo], w2d[3 * dy + dx])
            z += np.einsum('nchw,cp->nphw', shp[:, :, dy:dy + Ho, dx:dx + Wo], w2s[3 * dy + dx])
    z = z * scale2[None, :, None, None] + bias2[None, :, None, None]
    return np.maximum(z, 0.0)


if __name__ == "__main__":
    # Module config: inplanes=4, planes=8.  deep (NCHW) = (2,4,8,8),
    # shallow (NCHW) = (2,8,16,16).  Kernel uses NHWC.
    N, Cin, P, H, W = 2, 4, 8, 8, 8
    eps = 1e-5

    keys = jax.random.split(jax.random.PRNGKey(0), 14)
    # conv1 weight (Cin, P); dconv depthwise weight (ky*4+kx, P);
    # conv2 weight split into deep-half / shallow-half, each (3*dy+dx, P, P).
    w1 = jax.random.normal(keys[0], (Cin, P), jnp.float32) * 0.2
    wt = jax.random.normal(keys[1], (16, P), jnp.float32) * 0.2
    w2d = jax.random.normal(keys[2], (9, P, P), jnp.float32) * 0.1
    w2s = jax.random.normal(keys[3], (9, P, P), jnp.float32) * 0.1
    # BN1 / BN2 folded (inference semantics)
    g1 = jax.random.uniform(keys[4], (P,), jnp.float32, 0.5, 1.5)
    b1 = jax.random.normal(keys[5], (P,), jnp.float32) * 0.1
    m1 = jax.random.normal(keys[6], (P,), jnp.float32) * 0.1
    v1 = jax.random.uniform(keys[7], (P,), jnp.float32, 0.5, 1.5)
    scale1 = g1 / jnp.sqrt(v1 + eps)
    bias1 = b1 - m1 * scale1
    g2 = jax.random.uniform(keys[8], (P,), jnp.float32, 0.5, 1.5)
    b2 = jax.random.normal(keys[9], (P,), jnp.float32) * 0.1
    m2 = jax.random.normal(keys[10], (P,), jnp.float32) * 0.1
    v2 = jax.random.uniform(keys[11], (P,), jnp.float32, 0.5, 1.5)
    scale2 = g2 / jnp.sqrt(v2 + eps)
    bias2 = b2 - m2 * scale2

    params = (w1, scale1, bias1, wt, w2d, w2s, scale2, bias2)

    deep = jax.random.normal(keys[12], (N, H, W, Cin), jnp.float32)
    shallow = jax.random.normal(keys[13], (N, 2 * H, 2 * W, P), jnp.float32)

    out = fuse_block(deep, shallow, params)
    out = jax.block_until_ready(out)

    ref = reference_numpy(deep, shallow, params)              # NCHW
    got = np.transpose(np.asarray(out), (0, 3, 1, 2))          # NHWC -> NCHW
    np.testing.assert_allclose(got, ref, rtol=1e-4, atol=1e-4)
    print("KERNEL_OK")
</pallas_src>

<mosaic_0001>
module attributes {stable_mosaic.version = 11 : i64} {
  func.func @fuse_block_kernel(%arg0: i32, %arg1: memref<1x64x4xf32, #tpu.memory_space<vmem>>, %arg2: memref<1x16x8x16xf32, #tpu.memory_space<vmem>>, %arg3: memref<4x8xf32, #tpu.memory_space<vmem>>, %arg4: memref<1x8xf32, #tpu.memory_space<vmem>>, %arg5: memref<16x8xf32, #tpu.memory_space<vmem>>, %arg6: memref<9x16x8xf32, #tpu.memory_space<vmem>>, %arg7: memref<1x8xf32, #tpu.memory_space<vmem>>, %arg8: memref<1x16x8x16xf32, #tpu.memory_space<vmem>>, %arg9: memref<10x10x8xf32, #tpu.memory_space<vmem>>, %arg10: memref<18x10x32xf32, #tpu.memory_space<vmem>>) attributes {dimension_semantics = [#tpu.dimension_semantics<parallel>], iteration_bounds = array<i64: 2>, scalar_prefetch = 0 : i64, scratch_operands = 2 : i64, tpu.core_type = #tpu.core_type<tc>, window_params = [{transform_indices = @transform_0, window_bounds = array<i64: 1, 64, 4>}, {transform_indices = @transform_1, window_bounds = array<i64: 1, 16, 8, 16>}, {pipeline_mode = #tpu.pipeline_mode<synchronous>, transform_indices = @transform_2, window_bounds = array<i64: 4, 8>}, {pipeline_mode = #tpu.pipeline_mode<synchronous>, transform_indices = @transform_3, window_bounds = array<i64: 1, 8>}, {pipeline_mode = #tpu.pipeline_mode<synchronous>, transform_indices = @transform_4, window_bounds = array<i64: 16, 8>}, {pipeline_mode = #tpu.pipeline_mode<synchronous>, transform_indices = @transform_5, window_bounds = array<i64: 9, 16, 8>}, {pipeline_mode = #tpu.pipeline_mode<synchronous>, transform_indices = @transform_6, window_bounds = array<i64: 1, 8>}, {transform_indices = @transform_7, window_bounds = array<i64: 1, 16, 8, 16>}]} {
    %c0 = arith.constant 0 : index
    %c0_0 = arith.constant 0 : index
    %c0_1 = arith.constant 0 : index
    %0 = vector.load %arg1[%c0, %c0_0, %c0_1] : memref<1x64x4xf32, #tpu.memory_space<vmem>>, vector<1x64x4xf32>
    %1 = vector.shape_cast %0 : vector<1x64x4xf32> to vector<64x4xf32>
    %c0_2 = arith.constant 0 : index
    %c0_3 = arith.constant 0 : index
    %2 = vector.load %arg3[%c0_2, %c0_3] : memref<4x8xf32, #tpu.memory_space<vmem>>, vector<4x8xf32>
    %cst = arith.constant dense<0.000000e+00> : vector<64x8xf32>
    %3 = tpu.matmul %1, %2, %cst {dimension_numbers = #tpu.dot_dimension_numbers<[1], [0], [0], [1], [0, 0, 1, 1], [], []>} : vector<64x4xf32>, vector<4x8xf32>, vector<64x8xf32> -> vector<64x8xf32>
    %c0_4 = arith.constant 0 : index
    %c0_5 = arith.constant 0 : index
    %4 = vector.load %arg4[%c0_4, %c0_5] : memref<1x8xf32, #tpu.memory_space<vmem>>, vector<1x8xf32>
    %5 = vector.broadcast %4 : vector<1x8xf32> to vector<64x8xf32>
    %6 = arith.addf %3, %5 : vector<64x8xf32>
    %cst_6 = arith.constant 0.000000e+00 : f32
    %7 = vector.broadcast %cst_6 : f32 to vector<64x8xf32>
    %8 = arith.maximumf %6, %7 : vector<64x8xf32>
    %9 = vector.shape_cast %8 : vector<64x8xf32> to vector<8x8x8xf32>
    %cst_7 = arith.constant 0.000000e+00 : f32
    %10 = vector.broadcast %cst_7 : f32 to vector<1x10x8xf32>
    %c0_8 = arith.constant 0 : index
    %c0_9 = arith.constant 0 : index
    %c0_10 = arith.constant 0 : index
    %11 = vector.load %arg9[%c0_8, %c0_9, %c0_10] : memref<10x10x8xf32, #tpu.memory_space<vmem>>, vector<1x10x8xf32>
    tpu.vector_store %arg9[%c0_8, %c0_9, %c0_10], %10 {strides = array<i32>} : memref<10x10x8xf32, #tpu.memory_space<vmem>>, vector<1x10x8xf32>,
    %cst_11 = arith.constant 0.000000e+00 : f32
    %12 = vector.broadcast %cst_11 : f32 to vector<1x10x8xf32>
    %c9 = arith.constant 9 : index
    %c0_12 = arith.constant 0 : index
    %c0_13 = arith.constant 0 : index
    %13 = vector.load %arg9[%c9, %c0_12, %c0_13] : memref<10x10x8xf32, #tpu.memory_space<vmem>>, vector<1x10x8xf32>
    tpu.vector_store %arg9[%c9, %c0_12, %c0_13], %12 {strides = array<i32>} : memref<10x10x8xf32, #tpu.memory_space<vmem>>, vector<1x10x8xf32>,
    %cst_14 = arith.constant 0.000000e+00 : f32
    %14 = vector.broadcast %cst_14 : f32 to vector<10x1x8xf32>
    %c0_15 = arith.constant 0 : index
    %c0_16 = arith.constant 0 : index
    %c0_17 = arith.constant 0 : index
    %15 = vector.load %arg9[%c0_15, %c0_16, %c0_17] : memref<10x10x8xf32, #tpu.memory_space<vmem>>, vector<10x1x8xf32>
    tpu.vector_store %arg9[%c0_15, %c0_16, %c0_17], %14 {strides = array<i32>} : memref<10x10x8xf32, #tpu.memory_space<vmem>>, vector<10x1x8xf32>,
    %cst_18 = arith.constant 0.000000e+00 : f32
    %16 = vector.broadcast %cst_18 : f32 to vector<10x1x8xf32>
    %c0_19 = arith.constant 0 : index
    %c9_20 = arith.constant 9 : index
    %c0_21 = arith.constant 0 : index
    %17 = vector.load %arg9[%c0_19, %c9_20, %c0_21] : memref<10x10x8xf32, #tpu.memory_space<vmem>>, vector<10x1x8xf32>
    tpu.vector_store %arg9[%c0_19, %c9_20, %c0_21], %16 {strides = array<i32>} : memref<10x10x8xf32, #tpu.memory_space<vmem>>, vector<10x1x8xf32>,
    %c1 = arith.constant 1 : index
    %c1_22 = arith.constant 1 : index
    %c0_23 = arith.constant 0 : index
    %18 = vector.load %arg9[%c1, %c1_22, %c0_23] : memref<10x10x8xf32, #tpu.memory_space<vmem>>, vector<8x8x8xf32>
    tpu.vector_store %arg9[%c1, %c1_22, %c0_23], %9 {strides = array<i32>} : memref<10x10x8xf32, #tpu.memory_space<vmem>>, vector<8x8x8xf32>,
    %cst_24 = arith.constant 0.000000e+00 : f32
    %19 = vector.broadcast %cst_24 : f32 to vector<1x10x32xf32>
    %c0_25 = arith.constant 0 : index
    %c0_26 = arith.constant 0 : index
    %c0_27 = arith.constant 0 : index
    %20 = vector.load %arg10[%c0_25, %c0_26, %c0_27] : memref<18x10x32xf32, #tpu.memory_space<vmem>>, vector<1x10x32xf32>
    tpu.vector_store %arg10[%c0_25, %c0_26, %c0_27], %19 {strides = array<i32>} : memref<18x10x32xf32, #tpu.memory_space<vmem>>, vector<1x10x32xf32>,
    %cst_28 = arith.constant 0.000000e+00 : f32
    %21 = vector.broadcast %cst_28 : f32 to vector<1x10x32xf32>
    %c17 = arith.constant 17 : index
    %c0_29 = arith.constant 0 : index
    %c0_30 = arith.constant 0 : index
    %22 = vector.load %arg10[%c17, %c0_29, %c0_30] : memref<18x10x32xf32, #tpu.memory_space<vmem>>, vector<1x10x32xf32>
    tpu.vector_store %arg10[%c17, %c0_29, %c0_30], %21 {strides = array<i32>} : memref<18x10x32xf32, #tpu.memory_space<vmem>>, vector<1x10x32xf32>,
    %cst_31 = arith.constant 0.000000e+00 : f32
    %23 = vector.broadcast %cst_31 : f32 to vector<18x1x32xf32>
    %c0_32 = arith.constant 0 : index
    %c0_33 = arith.constant 0 : index
    %c0_34 = arith.constant 0 : index
    %24 = vector.load %arg10[%c0_32, %c0_33, %c0_34] : memref<18x10x32xf32, #tpu.memory_space<vmem>>, vector<18x1x32xf32>
    tpu.vector_store %arg10[%c0_32, %c0_33, %c0_34], %23 {strides = array<i32>} : memref<18x10x32xf32, #tpu.memory_space<vmem>>, vector<18x1x32xf32>,
    %cst_35 = arith.constant 0.000000e+00 : f32
    %25 = vector.broadcast %cst_35 : f32 to vector<18x1x32xf32>
    %c0_36 = arith.constant 0 : index
    %c9_37 = arith.constant 9 : index
    %c0_38 = arith.constant 0 : index
    %26 = vector.load %arg10[%c0_36, %c9_37, %c0_38] : memref<18x10x32xf32, #tpu.memory_space<vmem>>, vector<18x1x32xf32>
    tpu.vector_store %arg10[%c0_36, %c9_37, %c0_38], %25 {strides = array<i32>} : memref<18x10x32xf32, #tpu.memory_space<vmem>>, vector<18x1x32xf32>,
    %c0_39 = arith.constant 0 : index
    %c0_40 = arith.constant 0 : index
    %27 = vector.load %arg5[%c0_39, %c0_40] : memref<16x8xf32, #tpu.memory_space<vmem>>, vector<16x8xf32>
    %28 = vector.extract_strided_slice %27 {offsets = [0, 0], sizes = [1, 8], strides = [1, 1]} : vector<16x8xf32> to vector<1x8xf32>
    %29 = vector.shape_cast %28 : vector<1x8xf32> to vector<1x1x8xf32>
    %30 = vector.extract_strided_slice %27 {offsets = [1, 0], sizes = [1, 8], strides = [1, 1]} : vector<16x8xf32> to vector<1x8xf32>
    %31 = vector.shape_cast %30 : vector<1x8xf32> to vector<1x1x8xf32>
    %32 = vector.extract_strided_slice %27 {offsets = [2, 0], sizes = [1, 8], strides = [1, 1]} : vector<16x8xf32> to vector<1x8xf32>
    %33 = vector.shape_cast %32 : vector<1x8xf32> to vector<1x1x8xf32>
    %34 = vector.extract_strided_slice %27 {offsets = [3, 0], sizes = [1, 8], strides = [1, 1]} : vector<16x8xf32> to vector<1x8xf32>
    %35 = vector.shape_cast %34 : vector<1x8xf32> to vector<1x1x8xf32>
    %36 = vector.extract_strided_slice %27 {offsets = [4, 0], sizes = [1, 8], strides = [1, 1]} : vector<16x8xf32> to vector<1x8xf32>
    %37 = vector.shape_cast %36 : vector<1x8xf32> to vector<1x1x8xf32>
    %38 = vector.extract_strided_slice %27 {offsets = [5, 0], sizes = [1, 8], strides = [1, 1]} : vector<16x8xf32> to vector<1x8xf32>
    %39 = vector.shape_cast %38 : vector<1x8xf32> to vector<1x1x8xf32>
    %40 = vector.extract_strided_slice %27 {offsets = [6, 0], sizes = [1, 8], strides = [1, 1]} : vector<16x8xf32> to vector<1x8xf32>
    %41 = vector.shape_cast %40 : vector<1x8xf32> to vector<1x1x8xf32>
    %42 = vector.extract_strided_slice %27 {offsets = [7, 0], sizes = [1, 8], strides = [1, 1]} : vector<16x8xf32> to vector<1x8xf32>
    %43 = vector.shape_cast %42 : vector<1x8xf32> to vector<1x1x8xf32>
    %44 = vector.extract_strided_slice %27 {offsets = [8, 0], sizes = [1, 8], strides = [1, 1]} : vector<16x8xf32> to vector<1x8xf32>
    %45 = vector.shape_cast %44 : vector<1x8xf32> to vector<1x1x8xf32>
    %46 = vector.extract_strided_slice %27 {offsets = [9, 0], sizes = [1, 8], strides = [1, 1]} : vector<16x8xf32> to vector<1x8xf32>
    %47 = vector.shape_cast %46 : vector<1x8xf32> to vector<1x1x8xf32>
    %48 = vector.extract_strided_slice %27 {offsets = [10, 0], sizes = [1, 8], strides = [1, 1]} : vector<16x8xf32> to vector<1x8xf32>
    %49 = vector.shape_cast %48 : vector<1x8xf32> to vector<1x1x8xf32>
    %50 = vector.extract_strided_slice %27 {offsets = [11, 0], sizes = [1, 8], strides = [1, 1]} : vector<16x8xf32> to vector<1x8xf32>
    %51 = vector.shape_cast %50 : vector<1x8xf32> to vector<1x1x8xf32>
    %52 = vector.extract_strided_slice %27 {offsets = [12, 0], sizes = [1, 8], strides = [1, 1]} : vector<16x8xf32> to vector<1x8xf32>
    %53 = vector.shape_cast %52 : vector<1x8xf32> to vector<1x1x8xf32>
    %54 = vector.extract_strided_slice %27 {offsets = [13, 0], sizes = [1, 8], strides = [1, 1]} : vector<16x8xf32> to vector<1x8xf32>
    %55 = vector.shape_cast %54 : vector<1x8xf32> to vector<1x1x8xf32>
    %56 = vector.extract_strided_slice %27 {offsets = [14, 0], sizes = [1, 8], strides = [1, 1]} : vector<16x8xf32> to vector<1x8xf32>
    %57 = vector.shape_cast %56 : vector<1x8xf32> to vector<1x1x8xf32>
    %58 = vector.extract_strided_slice %27 {offsets = [15, 0], sizes = [1, 8], strides = [1, 1]} : vector<16x8xf32> to vector<1x8xf32>
    %59 = vector.shape_cast %58 : vector<1x8xf32> to vector<1x1x8xf32>
    %c1_41 = arith.constant 1 : index
    %c1_42 = arith.constant 1 : index
    %c0_43 = arith.constant 0 : index
    %60 = vector.load %arg9[%c1_41, %c1_42, %c0_43] : memref<10x10x8xf32, #tpu.memory_space<vmem>>, vector<8x8x8xf32>
    %61 = vector.broadcast %39 : vector<1x1x8xf32> to vector<8x8x8xf32>
    %62 = arith.mulf %60, %61 : vector<8x8x8xf32>
    %c1_44 = arith.constant 1 : index
    %c0_45 = arith.constant 0 : index
    %c0_46 = arith.constant 0 : index
    %63 = vector.load %arg9[%c1_44, %c0_45, %c0_46] : memref<10x10x8xf32, #tpu.memory_space<vmem>>, vector<8x8x8xf32>
    %64 = vector.broadcast %43 : vector<1x1x8xf32> to vector<8x8x8xf32>
    %65 = arith.mulf %63, %64 : vector<8x8x8xf32>
    %66 = arith.addf %62, %65 : vector<8x8x8xf32>
    %c0_47 = arith.constant 0 : index
    %c1_48 = arith.constant 1 : index
    %c0_49 = arith.constant 0 : index
    %67 = vector.load %arg9[%c0_47, %c1_48, %c0_49] : memref<10x10x8xf32, #tpu.memory_space<vmem>>, vector<8x8x8xf32>
    %68 = vector.broadcast %55 : vector<1x1x8xf32> to vector<8x8x8xf32>
    %69 = arith.mulf %67, %68 : vector<8x8x8xf32>
    %70 = arith.addf %66, %69 : vector<8x8x8xf32>
    %c0_50 = arith.constant 0 : index
    %c0_51 = arith.constant 0 : index
    %c0_52 = arith.constant 0 : index
    %71 = vector.load %arg9[%c0_50, %c0_51, %c0_52] : memref<10x10x8xf32, #tpu.memory_space<vmem>>, vector<8x8x8xf32>
    %72 = vector.broadcast %59 : vector<1x1x8xf32> to vector<8x8x8xf32>
    %73 = arith.mulf %71, %72 : vector<8x8x8xf32>
    %74 = arith.addf %70, %73 : vector<8x8x8xf32>
    %c1_53 = arith.constant 1 : index
    %c1_54 = arith.constant 1 : index
    %c0_55 = arith.constant 0 : index
    %75 = vector.load %arg9[%c1_53, %c1_54, %c0_55] : memref<10x10x8xf32, #tpu.memory_space<vmem>>, vector<8x8x8xf32>
    %76 = vector.broadcast %47 : vector<1x1x8xf32> to vector<8x8x8xf32>
    %77 = arith.mulf %75, %76 : vector<8x8x8xf32>
    %c1_56 = arith.constant 1 : index
    %c0_57 = arith.constant 0 : index
    %c0_58 = arith.constant 0 : index
    %78 = vector.load %arg9[%c1_56, %c0_57, %c0_58] : memref<10x10x8xf32, #tpu.memory_space<vmem>>, vector<8x8x8xf32>
    %79 = vector.broadcast %51 : vector<1x1x8xf32> to vector<8x8x8xf32>
    %80 = arith.mulf %78, %79 : vector<8x8x8xf32>
    %81 = arith.addf %77, %80 : vector<8x8x8xf32>
    %c2 = arith.constant 2 : index
    %c1_59 = arith.constant 1 : index
    %c0_60 = arith.constant 0 : index
    %82 = vector.load %arg9[%c2, %c1_59, %c0_60] : memref<10x10x8xf32, #tpu.memory_space<vmem>>, vector<8x8x8xf32>
    %83 = vector.broadcast %31 : vector<1x1x8xf32> to vector<8x8x8xf32>
    %84 = arith.mulf %82, %83 : vector<8x8x8xf32>
    %85 = arith.addf %81, %84 : vector<8x8x8xf32>
    %c2_61 = arith.constant 2 : index
    %c0_62 = arith.constant 0 : index
    %c0_63 = arith.constant 0 : index
    %86 = vector.load %arg9[%c2_61, %c0_62, %c0_63] : memref<10x10x8xf32, #tpu.memory_space<vmem>>, vector<8x8x8xf32>
    %87 = vector.broadcast %35 : vector<1x1x8xf32> to vector<8x8x8xf32>
    %88 = arith.mulf %86, %87 : vector<8x8x8xf32>
    %89 = arith.addf %85, %88 : vector<8x8x8xf32>
    %90 = vector.shape_cast %74 : vector<8x8x8xf32> to vector<8x1x8x8xf32>
    %91 = vector.shape_cast %89 : vector<8x8x8xf32> to vector<8x1x8x8xf32>
    %92 = tpu.concatenate %90, %91 in 1 : vector<8x1x8x8xf32>, vector<8x1x8x8xf32> -> vector<8x2x8x8xf32>
    %93 = vector.shape_cast %92 : vector<8x2x8x8xf32> to vector<16x8x8xf32>
    %c1_64 = arith.constant 1 : index
    %c1_65 = arith.constant 1 : index
    %c0_66 = arith.constant 0 : index
    %94 = vector.load %arg10[%c1_64, %c1_65, %c0_66] : memref<18x10x32xf32, #tpu.memory_space<vmem>>, vector<16x8x8xf32>
    tpu.vector_store %arg10[%c1_64, %c1_65, %c0_66], %93 {strides = array<i32>} : memref<18x10x32xf32, #tpu.memory_space<vmem>>, vector<16x8x8xf32>,
    %c1_67 = arith.constant 1 : index
    %c1_68 = arith.constant 1 : index
    %c0_69 = arith.constant 0 : index
    %95 = vector.load %arg9[%c1_67, %c1_68, %c0_69] : memref<10x10x8xf32, #tpu.memory_space<vmem>>, vector<8x8x8xf32>
    %96 = vector.broadcast %41 : vector<1x1x8xf32> to vector<8x8x8xf32>
    %97 = arith.mulf %95, %96 : vector<8x8x8xf32>
    %c1_70 = arith.constant 1 : index
    %c2_71 = arith.constant 2 : index
    %c0_72 = arith.constant 0 : index
    %98 = vector.load %arg9[%c1_70, %c2_71, %c0_72] : memref<10x10x8xf32, #tpu.memory_space<vmem>>, vector<8x8x8xf32>
    %99 = vector.broadcast %37 : vector<1x1x8xf32> to vector<8x8x8xf32>
    %100 = arith.mulf %98, %99 : vector<8x8x8xf32>
    %101 = arith.addf %97, %100 : vector<8x8x8xf32>
    %c0_73 = arith.constant 0 : index
    %c1_74 = arith.constant 1 : index
    %c0_75 = arith.constant 0 : index
    %102 = vector.load %arg9[%c0_73, %c1_74, %c0_75] : memref<10x10x8xf32, #tpu.memory_space<vmem>>, vector<8x8x8xf32>
    %103 = vector.broadcast %57 : vector<1x1x8xf32> to vector<8x8x8xf32>
    %104 = arith.mulf %102, %103 : vector<8x8x8xf32>
    %105 = arith.addf %101, %104 : vector<8x8x8xf32>
    %c0_76 = arith.constant 0 : index
    %c2_77 = arith.constant 2 : index
    %c0_78 = arith.constant 0 : index
    %106 = vector.load %arg9[%c0_76, %c2_77, %c0_78] : memref<10x10x8xf32, #tpu.memory_space<vmem>>, vector<8x8x8xf32>
    %107 = vector.broadcast %53 : vector<1x1x8xf32> to vector<8x8x8xf32>
    %108 = arith.mulf %106, %107 : vector<8x8x8xf32>
    %109 = arith.addf %105, %108 : vector<8x8x8xf32>
    %c1_79 = arith.constant 1 : index
    %c1_80 = arith.constant 1 : index
    %c0_81 = arith.constant 0 : index
    %110 = vector.load %arg9[%c1_79, %c1_80, %c0_81] : memref<10x10x8xf32, #tpu.memory_space<vmem>>, vector<8x8x8xf32>
    %111 = vector.broadcast %49 : vector<1x1x8xf32> to vector<8x8x8xf32>
    %112 = arith.mulf %110, %111 : vector<8x8x8xf32>
    %c1_82 = arith.constant 1 : index
    %c2_83 = arith.constant 2 : index
    %c0_84 = arith.constant 0 : index
    %113 = vector.load %arg9[%c1_82, %c2_83, %c0_84] : memref<10x10x8xf32, #tpu.memory_space<vmem>>, vector<8x8x8xf32>
    %114 = vector.broadcast %45 : vector<1x1x8xf32> to vector<8x8x8xf32>
    %115 = arith.mulf %113, %114 : vector<8x8x8xf32>
    %116 = arith.addf %112, %115 : vector<8x8x8xf32>
    %c2_85 = arith.constant 2 : index
    %c1_86 = arith.constant 1 : index
    %c0_87 = arith.constant 0 : index
    %117 = vector.load %arg9[%c2_85, %c1_86, %c0_87] : memref<10x10x8xf32, #tpu.memory_space<vmem>>, vector<8x8x8xf32>
    %118 = vector.broadcast %33 : vector<1x1x8xf32> to vector<8x8x8xf32>
    %119 = arith.mulf %117, %118 : vector<8x8x8xf32>
    %120 = arith.addf %116, %119 : vector<8x8x8xf32>
    %c2_88 = arith.constant 2 : index
    %c2_89 = arith.constant 2 : index
    %c0_90 = arith.constant 0 : index
    %121 = vector.load %arg9[%c2_88, %c2_89, %c0_90] : memref<10x10x8xf32, #tpu.memory_space<vmem>>, vector<8x8x8xf32>
    %122 = vector.broadcast %29 : vector<1x1x8xf32> to vector<8x8x8xf32>
    %123 = arith.mulf %121, %122 : vector<8x8x8xf32>
    %124 = arith.addf %120, %123 : vector<8x8x8xf32>
    %125 = vector.shape_cast %109 : vector<8x8x8xf32> to vector<8x1x8x8xf32>
    %126 = vector.shape_cast %124 : vector<8x8x8xf32> to vector<8x1x8x8xf32>
    %127 = tpu.concatenate %125, %126 in 1 : vector<8x1x8x8xf32>, vector<8x1x8x8xf32> -> vector<8x2x8x8xf32>
    %128 = vector.shape_cast %127 : vector<8x2x8x8xf32> to vector<16x8x8xf32>
    %c1_91 = arith.constant 1 : index
    %c1_92 = arith.constant 1 : index
    %c16 = arith.constant 16 : index
    %129 = vector.load %arg10[%c1_91, %c1_92, %c16] : memref<18x10x32xf32, #tpu.memory_space<vmem>>, vector<16x8x8xf32>
    tpu.vector_store %arg10[%c1_91, %c1_92, %c16], %128 {strides = array<i32>} : memref<18x10x32xf32, #tpu.memory_space<vmem>>, vector<16x8x8xf32>,
    %c0_93 = arith.constant 0 : index
    %c0_94 = arith.constant 0 : index
    %c0_95 = arith.constant 0 : index
    %c0_96 = arith.constant 0 : index
    %130 = vector.load %arg2[%c0_93, %c0_94, %c0_95, %c0_96] : memref<1x16x8x16xf32, #tpu.memory_space<vmem>>, vector<1x16x8x16xf32>
    %131 = vector.shape_cast %130 : vector<1x16x8x16xf32> to vector<16x8x16xf32>
    %132 = vector.extract_strided_slice %131 {offsets = [0, 0, 0], sizes = [16, 8, 8], strides = [1, 1, 1]} : vector<16x8x16xf32> to vector<16x8x8xf32>
    %c1_97 = arith.constant 1 : index
    %c1_98 = arith.constant 1 : index
    %c8 = arith.constant 8 : index
    %133 = vector.load %arg10[%c1_97, %c1_98, %c8] : memref<18x10x32xf32, #tpu.memory_space<vmem>>, vector<16x8x8xf32>
    tpu.vector_store %arg10[%c1_97, %c1_98, %c8], %132 {strides = array<i32>} : memref<18x10x32xf32, #tpu.memory_space<vmem>>, vector<16x8x8xf32>,
    %134 = vector.extract_strided_slice %131 {offsets = [0, 0, 8], sizes = [16, 8, 8], strides = [1, 1, 1]} : vector<16x8x16xf32> to vector<16x8x8xf32>
    %c1_99 = arith.constant 1 : index
    %c1_100 = arith.constant 1 : index
    %c24 = arith.constant 24 : index
    %135 = vector.load %arg10[%c1_99, %c1_100, %c24] : memref<18x10x32xf32, #tpu.memory_space<vmem>>, vector<16x8x8xf32>
    tpu.vector_store %arg10[%c1_99, %c1_100, %c24], %134 {strides = array<i32>} : memref<18x10x32xf32, #tpu.memory_space<vmem>>, vector<16x8x8xf32>,
    %c0_101 = arith.constant 0 : index
    %c0_102 = arith.constant 0 : index
    %c16_103 = arith.constant 16 : index
    %136 = vector.load %arg10[%c0_101, %c0_102, %c16_103] : memref<18x10x32xf32, #tpu.memory_space<vmem>>, vector<16x8x16xf32>
    %137 = vector.shape_cast %136 : vector<16x8x16xf32> to vector<128x16xf32>
    %c0_104 = arith.constant 0 : index
    %c1_105 = arith.constant 1 : index
    %c0_106 = arith.constant 0 : index
    %138 = vector.load %arg10[%c0_104, %c1_105, %c0_106] : memref<18x10x32xf32, #tpu.memory_space<vmem>>, vector<16x8x16xf32>
    %139 = vector.shape_cast %138 : vector<16x8x16xf32> to vector<128x16xf32>
    %c0_107 = arith.constant 0 : index
    %c1_108 = arith.constant 1 : index
    %c16_109 = arith.constant 16 : index
    %140 = vector.load %arg10[%c0_107, %c1_108, %c16_109] : memref<18x10x32xf32, #tpu.memory_space<vmem>>, vector<16x8x16xf32>
    %141 = vector.shape_cast %140 : vector<16x8x16xf32> to vector<128x16xf32>
    %c0_110 = arith.constant 0 : index
    %c2_111 = arith.constant 2 : index
    %c0_112 = arith.constant 0 : index
    %142 = vector.load %arg10[%c0_110, %c2_111, %c0_112] : memref<18x10x32xf32, #tpu.memory_space<vmem>>, vector<16x8x16xf32>
    %143 = vector.shape_cast %142 : vector<16x8x16xf32> to vector<128x16xf32>
    %c0_113 = arith.constant 0 : index
    %c0_114 = arith.constant 0 : index
    %c0_115 = arith.constant 0 : index
    %144 = vector.load %arg6[%c0_113, %c0_114, %c0_115] : memref<9x16x8xf32, #tpu.memory_space<vmem>>, vector<1x16x8xf32>
    %145 = vector.shape_cast %144 : vector<1x16x8xf32> to vector<16x8xf32>
    %c1_116 = arith.constant 1 : index
    %c0_117 = arith.constant 0 : index
    %c0_118 = arith.constant 0 : index
    %146 = vector.load %arg6[%c1_116, %c0_117, %c0_118] : memref<9x16x8xf32, #tpu.memory_space<vmem>>, vector<1x16x8xf32>
    %147 = vector.shape_cast %146 : vector<1x16x8xf32> to vector<16x8xf32>
    %c2_119 = arith.constant 2 : index
    %c0_120 = arith.constant 0 : index
    %c0_121 = arith.constant 0 : index
    %148 = vector.load %arg6[%c2_119, %c0_120, %c0_121] : memref<9x16x8xf32, #tpu.memory_space<vmem>>, vector<1x16x8xf32>
    %149 = vector.shape_cast %148 : vector<1x16x8xf32> to vector<16x8xf32>
    %cst_122 = arith.constant dense<0.000000e+00> : vector<128x8xf32>
    %150 = tpu.matmul %137, %145, %cst_122 {dimension_numbers = #tpu.dot_dimension_numbers<[1], [0], [0], [1], [0, 0, 1, 1], [], []>} : vector<128x16xf32>, vector<16x8xf32>, vector<128x8xf32> -> vector<128x8xf32>
    %cst_123 = arith.constant dense<0.000000e+00> : vector<128x8xf32>
    %151 = tpu.matmul %139, %147, %cst_123 {dimension_numbers = #tpu.dot_dimension_numbers<[1], [0], [0], [1], [0, 0, 1, 1], [], []>} : vector<128x16xf32>, vector<16x8xf32>, vector<128x8xf32> -> vector<128x8xf32>
    %152 = arith.addf %150, %151 : vector<128x8xf32>
    %cst_124 = arith.constant dense<0.000000e+00> : vector<128x8xf32>
    %153 = tpu.matmul %141, %149, %cst_124 {dimension_numbers = #tpu.dot_dimension_numbers<[1], [0], [0], [1], [0, 0, 1, 1], [], []>} : vector<128x16xf32>, vector<16x8xf32>, vector<128x8xf32> -> vector<128x8xf32>
    %154 = arith.addf %152, %153 : vector<128x8xf32>
    %cst_125 = arith.constant dense<0.000000e+00> : vector<128x8xf32>
    %155 = tpu.matmul %139, %145, %cst_125 {dimension_numbers = #tpu.dot_dimension_numbers<[1], [0], [0], [1], [0, 0, 1, 1], [], []>} : vector<128x16xf32>, vector<16x8xf32>, vector<128x8xf32> -> vector<128x8xf32>
    %cst_126 = arith.constant dense<0.000000e+00> : vector<128x8xf32>
    %156 = tpu.matmul %141, %147, %cst_126 {dimension_numbers = #tpu.dot_dimension_numbers<[1], [0], [0], [1], [0, 0, 1, 1], [], []>} : vector<128x16xf32>, vector<16x8xf32>, vector<128x8xf32> -> vector<128x8xf32>
    %157 = arith.addf %155, %156 : vector<128x8xf32>
    %cst_127 = arith.constant dense<0.000000e+00> : vector<128x8xf32>
    %158 = tpu.matmul %143, %149, %cst_127 {dimension_numbers = #tpu.dot_dimension_numbers<[1], [0], [0], [1], [0, 0, 1, 1], [], []>} : vector<128x16xf32>, vector<16x8xf32>, vector<128x8xf32> -> vector<128x8xf32>
    %159 = arith.addf %157, %158 : vector<128x8xf32>
    %c1_128 = arith.constant 1 : index
    %c0_129 = arith.constant 0 : index
    %c16_130 = arith.constant 16 : index
    %160 = vector.load %arg10[%c1_128, %c0_129, %c16_130] : memref<18x10x32xf32, #tpu.memory_space<vmem>>, vector<16x8x16xf32>
    %161 = vector.shape_cast %160 : vector<16x8x16xf32> to vector<128x16xf32>
    %c1_131 = arith.constant 1 : index
    %c1_132 = arith.constant 1 : index
    %c0_133 = arith.constant 0 : index
    %162 = vector.load %arg10[%c1_131, %c1_132, %c0_133] : memref<18x10x32xf32, #tpu.memory_space<vmem>>, vector<16x8x16xf32>
    %163 = vector.shape_cast %162 : vector<16x8x16xf32> to vector<128x16xf32>
    %c1_134 = arith.constant 1 : index
    %c1_135 = arith.constant 1 : index
    %c16_136 = arith.constant 16 : index
    %164 = vector.load %arg10[%c1_134, %c1_135, %c16_136] : memref<18x10x32xf32, #tpu.memory_space<vmem>>, vector<16x8x16xf32>
    %165 = vector.shape_cast %164 : vector<16x8x16xf32> to vector<128x16xf32>
    %c1_137 = arith.constant 1 : index
    %c2_138 = arith.constant 2 : index
    %c0_139 = arith.constant 0 : index
    %166 = vector.load %arg10[%c1_137, %c2_138, %c0_139] : memref<18x10x32xf32, #tpu.memory_space<vmem>>, vector<16x8x16xf32>
    %167 = vector.shape_cast %166 : vector<16x8x16xf32> to vector<128x16xf32>
    %c3 = arith.constant 3 : index
    %c0_140 = arith.constant 0 : index
    %c0_141 = arith.constant 0 : index
    %168 = vector.load %arg6[%c3, %c0_140, %c0_141] : memref<9x16x8xf32, #tpu.memory_space<vmem>>, vector<1x16x8xf32>
    %169 = vector.shape_cast %168 : vector<1x16x8xf32> to vector<16x8xf32>
    %c4 = arith.constant 4 : index
    %c0_142 = arith.constant 0 : index
    %c0_143 = arith.constant 0 : index
    %170 = vector.load %arg6[%c4, %c0_142, %c0_143] : memref<9x16x8xf32, #tpu.memory_space<vmem>>, vector<1x16x8xf32>
    %171 = vector.shape_cast %170 : vector<1x16x8xf32> to vector<16x8xf32>
    %c5 = arith.constant 5 : index
    %c0_144 = arith.constant 0 : index
    %c0_145 = arith.constant 0 : index
    %172 = vector.load %arg6[%c5, %c0_144, %c0_145] : memref<9x16x8xf32, #tpu.memory_space<vmem>>, vector<1x16x8xf32>
    %173 = vector.shape_cast %172 : vector<1x16x8xf32> to vector<16x8xf32>
    %cst_146 = arith.constant dense<0.000000e+00> : vector<128x8xf32>
    %174 = tpu.matmul %161, %169, %cst_146 {dimension_numbers = #tpu.dot_dimension_numbers<[1], [0], [0], [1], [0, 0, 1, 1], [], []>} : vector<128x16xf32>, vector<16x8xf32>, vector<128x8xf32> -> vector<128x8xf32>
    %cst_147 = arith.constant dense<0.000000e+00> : vector<128x8xf32>
    %175 = tpu.matmul %163, %171, %cst_147 {dimension_numbers = #tpu.dot_dimension_numbers<[1], [0], [0], [1], [0, 0, 1, 1], [], []>} : vector<128x16xf32>, vector<16x8xf32>, vector<128x8xf32> -> vector<128x8xf32>
    %176 = arith.addf %174, %175 : vector<128x8xf32>
    %cst_148 = arith.constant dense<0.000000e+00> : vector<128x8xf32>
    %177 = tpu.matmul %165, %173, %cst_148 {dimension_numbers = #tpu.dot_dimension_numbers<[1], [0], [0], [1], [0, 0, 1, 1], [], []>} : vector<128x16xf32>, vector<16x8xf32>, vector<128x8xf32> -> vector<128x8xf32>
    %178 = arith.addf %176, %177 : vector<128x8xf32>
    %cst_149 = arith.constant dense<0.000000e+00> : vector<128x8xf32>
    %179 = tpu.matmul %163, %169, %cst_149 {dimension_numbers = #tpu.dot_dimension_numbers<[1], [0], [0], [1], [0, 0, 1, 1], [], []>} : vector<128x16xf32>, vector<16x8xf32>, vector<128x8xf32> -> vector<128x8xf32>
    %cst_150 = arith.constant dense<0.000000e+00> : vector<128x8xf32>
    %180 = tpu.matmul %165, %171, %cst_150 {dimension_numbers = #tpu.dot_dimension_numbers<[1], [0], [0], [1], [0, 0, 1, 1], [], []>} : vector<128x16xf32>, vector<16x8xf32>, vector<128x8xf32> -> vector<128x8xf32>
    %181 = arith.addf %179, %180 : vector<128x8xf32>
    %cst_151 = arith.constant dense<0.000000e+00> : vector<128x8xf32>
    %182 = tpu.matmul %167, %173, %cst_151 {dimension_numbers = #tpu.dot_dimension_numbers<[1], [0], [0], [1], [0, 0, 1, 1], [], []>} : vector<128x16xf32>, vector<16x8xf32>, vector<128x8xf32> -> vector<128x8xf32>
    %183 = arith.addf %181, %182 : vector<128x8xf32>
    %184 = arith.addf %154, %178 : vector<128x8xf32>
    %185 = arith.addf %159, %183 : vector<128x8xf32>
    %c2_152 = arith.constant 2 : index
    %c0_153 = arith.constant 0 : index
    %c16_154 = arith.constant 16 : index
    %186 = vector.load %arg10[%c2_152, %c0_153, %c16_154] : memref<18x10x32xf32, #tpu.memory_space<vmem>>, vector<16x8x16xf32>
    %187 = vector.shape_cast %186 : vector<16x8x16xf32> to vector<128x16xf32>
    %c2_155 = arith.constant 2 : index
    %c1_156 = arith.constant 1 : index
    %c0_157 = arith.constant 0 : index
    %188 = vector.load %arg10[%c2_155, %c1_156, %c0_157] : memref<18x10x32xf32, #tpu.memory_space<vmem>>, vector<16x8x16xf32>
    %189 = vector.shape_cast %188 : vector<16x8x16xf32> to vector<128x16xf32>
    %c2_158 = arith.constant 2 : index
    %c1_159 = arith.constant 1 : index
    %c16_160 = arith.constant 16 : index
    %190 = vector.load %arg10[%c2_158, %c1_159, %c16_160] : memref<18x10x32xf32, #tpu.memory_space<vmem>>, vector<16x8x16xf32>
    %191 = vector.shape_cast %190 : vector<16x8x16xf32> to vector<128x16xf32>
    %c2_161 = arith.constant 2 : index
    %c2_162 = arith.constant 2 : index
    %c0_163 = arith.constant 0 : index
    %192 = vector.load %arg10[%c2_161, %c2_162, %c0_163] : memref<18x10x32xf32, #tpu.memory_space<vmem>>, vector<16x8x16xf32>
    %193 = vector.shape_cast %192 : vector<16x8x16xf32> to vector<128x16xf32>
    %c6 = arith.constant 6 : index
    %c0_164 = arith.constant 0 : index
    %c0_165 = arith.constant 0 : index
    %194 = vector.load %arg6[%c6, %c0_164, %c0_165] : memref<9x16x8xf32, #tpu.memory_space<vmem>>, vector<1x16x8xf32>
    %195 = vector.shape_cast %194 : vector<1x16x8xf32> to vector<16x8xf32>
    %c7 = arith.constant 7 : index
    %c0_166 = arith.constant 0 : index
    %c0_167 = arith.constant 0 : index
    %196 = vector.load %arg6[%c7, %c0_166, %c0_167] : memref<9x16x8xf32, #tpu.memory_space<vmem>>, vector<1x16x8xf32>
    %197 = vector.shape_cast %196 : vector<1x16x8xf32> to vector<16x8xf32>
    %c8_168 = arith.constant 8 : index
    %c0_169 = arith.constant 0 : index
    %c0_170 = arith.constant 0 : index
    %198 = vector.load %arg6[%c8_168, %c0_169, %c0_170] : memref<9x16x8xf32, #tpu.memory_space<vmem>>, vector<1x16x8xf32>
    %199 = vector.shape_cast %198 : vector<1x16x8xf32> to vector<16x8xf32>
    %cst_171 = arith.constant dense<0.000000e+00> : vector<128x8xf32>
    %200 = tpu.matmul %187, %195, %cst_171 {dimension_numbers = #tpu.dot_dimension_numbers<[1], [0], [0], [1], [0, 0, 1, 1], [], []>} : vector<128x16xf32>, vector<16x8xf32>, vector<128x8xf32> -> vector<128x8xf32>
    %cst_172 = arith.constant dense<0.000000e+00> : vector<128x8xf32>
    %201 = tpu.matmul %189, %197, %cst_172 {dimension_numbers = #tpu.dot_dimension_numbers<[1], [0], [0], [1], [0, 0, 1, 1], [], []>} : vector<128x16xf32>, vector<16x8xf32>, vector<128x8xf32> -> vector<128x8xf32>
    %202 = arith.addf %200, %201 : vector<128x8xf32>
    %cst_173 = arith.constant dense<0.000000e+00> : vector<128x8xf32>
    %203 = tpu.matmul %191, %199, %cst_173 {dimension_numbers = #tpu.dot_dimension_numbers<[1], [0], [0], [1], [0, 0, 1, 1], [], []>} : vector<128x16xf32>, vector<16x8xf32>, vector<128x8xf32> -> vector<128x8xf32>
    %204 = arith.addf %202, %203 : vector<128x8xf32>
    %cst_174 = arith.constant dense<0.000000e+00> : vector<128x8xf32>
    %205 = tpu.matmul %189, %195, %cst_174 {dimension_numbers = #tpu.dot_dimension_numbers<[1], [0], [0], [1], [0, 0, 1, 1], [], []>} : vector<128x16xf32>, vector<16x8xf32>, vector<128x8xf32> -> vector<128x8xf32>
    %cst_175 = arith.constant dense<0.000000e+00> : vector<128x8xf32>
    %206 = tpu.matmul %191, %197, %cst_175 {dimension_numbers = #tpu.dot_dimension_numbers<[1], [0], [0], [1], [0, 0, 1, 1], [], []>} : vector<128x16xf32>, vector<16x8xf32>, vector<128x8xf32> -> vector<128x8xf32>
    %207 = arith.addf %205, %206 : vector<128x8xf32>
    %cst_176 = arith.constant dense<0.000000e+00> : vector<128x8xf32>
    %208 = tpu.matmul %193, %199, %cst_176 {dimension_numbers = #tpu.dot_dimension_numbers<[1], [0], [0], [1], [0, 0, 1, 1], [], []>} : vector<128x16xf32>, vector<16x8xf32>, vector<128x8xf32> -> vector<128x8xf32>
    %209 = arith.addf %207, %208 : vector<128x8xf32>
    %210 = arith.addf %184, %204 : vector<128x8xf32>
    %211 = arith.addf %185, %209 : vector<128x8xf32>
    %c0_177 = arith.constant 0 : index
    %c0_178 = arith.constant 0 : index
    %212 = vector.load %arg7[%c0_177, %c0_178] : memref<1x8xf32, #tpu.memory_space<vmem>>, vector<1x8xf32>
    %213 = vector.broadcast %212 : vector<1x8xf32> to vector<128x8xf32>
    %214 = arith.addf %210, %213 : vector<128x8xf32>
    %cst_179 = arith.constant 0.000000e+00 : f32
    %215 = vector.broadcast %cst_179 : f32 to vector<128x8xf32>
    %216 = arith.maximumf %214, %215 : vector<128x8xf32>
    %217 = vector.shape_cast %216 : vector<128x8xf32> to vector<16x8x8xf32>
    %c0_180 = arith.constant 0 : index
    %c0_181 = arith.constant 0 : index
    %c0_182 = arith.constant 0 : index
    %c0_183 = arith.constant 0 : index
    %218 = vector.load %arg8[%c0_180, %c0_181, %c0_182, %c0_183] : memref<1x16x8x16xf32, #tpu.memory_space<vmem>>, vector<1x16x8x8xf32>
    %219 = vector.shape_cast %218 : vector<1x16x8x8xf32> to vector<16x8x8xf32>
    %220 = vector.shape_cast %217 : vector<16x8x8xf32> to vector<1x16x8x8xf32>
    tpu.vector_store %arg8[%c0_180, %c0_181, %c0_182, %c0_183], %220 {strides = array<i32>} : memref<1x16x8x16xf32, #tpu.memory_space<vmem>>, vector<1x16x8x8xf32>,
    %221 = vector.broadcast %212 : vector<1x8xf32> to vector<128x8xf32>
    %222 = arith.addf %211, %221 : vector<128x8xf32>
    %cst_184 = arith.constant 0.000000e+00 : f32
    %223 = vector.broadcast %cst_184 : f32 to vector<128x8xf32>
    %224 = arith.maximumf %222, %223 : vector<128x8xf32>
    %225 = vector.shape_cast %224 : vector<128x8xf32> to vector<16x8x8xf32>
    %c0_185 = arith.constant 0 : index
    %c0_186 = arith.constant 0 : index
    %c0_187 = arith.constant 0 : index
    %c8_188 = arith.constant 8 : index
    %226 = vector.load %arg8[%c0_185, %c0_186, %c0_187, %c8_188] : memref<1x16x8x16xf32, #tpu.memory_space<vmem>>, vector<1x16x8x8xf32>
    %227 = vector.shape_cast %226 : vector<1x16x8x8xf32> to vector<16x8x8xf32>
    %228 = vector.shape_cast %225 : vector<16x8x8xf32> to vector<1x16x8x8xf32>
    tpu.vector_store %arg8[%c0_185, %c0_186, %c0_187, %c8_188], %228 {strides = array<i32>} : memref<1x16x8x16xf32, #tpu.memory_space<vmem>>, vector<1x16x8x8xf32>,
    return
  }
  func.func @transform_0(%arg0: i32) -> (i32, i32, i32) {
    %c0_i32 = arith.constant 0 : i32
    %c0_i32_0 = arith.constant 0 : i32
    %c0_i32_1 = arith.constant 0 : i32
    return %arg0, %c0_i32, %c0_i32_0 : i32, i32, i32
  }
  func.func @transform_1(%arg0: i32) -> (i32, i32, i32, i32) {
    %c0_i32 = arith.constant 0 : i32
    %c0_i32_0 = arith.constant 0 : i32
    %c0_i32_1 = arith.constant 0 : i32
    %c0_i32_2 = arith.constant 0 : i32
    return %arg0, %c0_i32, %c0_i32_0, %c0_i32_1 : i32, i32, i32, i32
  }
  func.func @transform_2(%arg0: i32) -> (i32, i32) {
    %c0_i32 = arith.constant 0 : i32
    %c0_i32_0 = arith.constant 0 : i32
    %c0_i32_1 = arith.constant 0 : i32
    return %c0_i32, %c0_i32_0 : i32, i32
  }
  func.func @transform_3(%arg0: i32) -> (i32, i32) {
    %c0_i32 = arith.constant 0 : i32
    %c0_i32_0 = arith.constant 0 : i32
    %c0_i32_1 = arith.constant 0 : i32
    return %c0_i32, %c0_i32_0 : i32, i32
  }
  func.func @transform_4(%arg0: i32) -> (i32, i32) {
    %c0_i32 = arith.constant 0 : i32
    %c0_i32_0 = arith.constant 0 : i32
    %c0_i32_1 = arith.constant 0 : i32
    return %c0_i32, %c0_i32_0 : i32, i32
  }
  func.func @transform_5(%arg0: i32) -> (i32, i32, i32) {
    %c0_i32 = arith.constant 0 : i32
    %c0_i32_0 = arith.constant 0 : i32
    %c0_i32_1 = arith.constant 0 : i32
    %c0_i32_2 = arith.constant 0 : i32
    return %c0_i32, %c0_i32_0, %c0_i32_1 : i32, i32, i32
  }
  func.func @transform_6(%arg0: i32) -> (i32, i32) {
    %c0_i32 = arith.constant 0 : i32
    %c0_i32_0 = arith.constant 0 : i32
    %c0_i32_1 = arith.constant 0 : i32
    return %c0_i32, %c0_i32_0 : i32, i32
  }
  func.func @transform_7(%arg0: i32) -> (i32, i32, i32, i32) {
    %c0_i32 = arith.constant 0 : i32
    %c0_i32_0 = arith.constant 0 : i32
    %c0_i32_1 = arith.constant 0 : i32
    %c0_i32_2 = arith.constant 0 : i32
    return %arg0, %c0_i32, %c0_i32_0, %c0_i32_1 : i32, i32, i32, i32
  }
}

</mosaic_0001>

<bundles_post_ra>
// kernel: fuse_block.1
= control target key start
LH: loop header
LB: loop body
LE: loop exit
PB: predicated region body
PF: predicated region fallthrough
CT: control target
= control target key end

     0   :  { %s6343_s24 = smov 0   ;;  %s8577_s0 = inlined_call_operand.vmem [shape: f32[2,64,4], index: 0, kind: input, shape index: {}]   ;;  %s8578_s1 = inlined_call_operand.vmem [shape: f32[2,16,8,16], index: 1, kind: input, shape index: {}]   ;;  %s8579_s2 = inlined_call_operand.vmem [shape: f32[4,8], index: 2, kind: input, shape index: {}]   ;;  %s8580_s3 = inlined_call_operand.vmem [shape: f32[1,8], index: 3, kind: input, shape index: {}]   ;;  %s8581_s4 = inlined_call_operand.vmem [shape: f32[16,8], index: 4, kind: input, shape index: {}]   ;;  %s8582_s5 = inlined_call_operand.vmem [shape: f32[9,16,8], index: 5, kind: input, shape index: {}]   ;;  %s8583_s6 = inlined_call_operand.vmem [shape: f32[1,8], index: 6, kind: input, shape index: {}]   ;;  %s8584_s7 = inlined_call_operand.vmem [shape: f32[2,16,8,16], index: 7, kind: output, shape index: {}]  }
   0x1 LB: > { %s5081_s25 = sadd.s32 4294967295, %s6297_s24   ;;  %p5085_p0 = scmp.ge.s32.totalorder %s6297_s24, 1  ;;  %s6297_s24 = sphi %s6343_s24, %s17_s24  }
   0x2   : > { %p247_p1 = scmp.lt.s32.totalorder %s6297_s24, 3 }
   0x4   : > { %p248_p2 = pnand %p5085_p0, %p247_p1 }
   0x6   : > { %251 = sbr.rel (%p248_p2) target bundleno = 1161 (0x489), region = 48 }
   0xb   : > { %v307_v0 = vld [vmem:[%s8579_s2] sm:$0xf]  ;;  %vm340_vm0 = vcmask 1043456   ;;  %p284_p3 = scmp.lt.s32.totalorder %s5081_s25, 1  ;;  %vm315_vm1 = vcmask 31744   ;;  %s6299_s13 = smov 8   ;;  %v548_v21 = vlaneseq }
   0xc   : > { %5745 = vmatprep.subr.msk.mxu0 %vm340_vm0, %v307_v0  ;;  %6263 = vmatprep.subr.msk.mxu1 %vm340_vm0, %v307_v0  ;;  %s6300_s14 = smov 16   ;;  %vm457_vm2 = vcmask 64512   ;;  %vm464_vm3 = vcmask 57344   ;;  %v6301_v17 = vmov 0.0   ;;  %vm459_vm4 = vcmask 58368   ;;  %v538_v30 = vld [vmem:[%s8581_s4] sm:$0xff] }
   0xd   : > { %5746 = vmatpush3.msk.msra.mxu0 %vm340_vm0, %v307_v0  ;;  %6264 = vmatpush3.msk.msra.mxu1 %vm340_vm0, %v307_v0  ;;  %s8664_s25 = smov (!%p284_p3, %s5081_s25), 1  ;;  %476 = vst.msk [vmem:[#allocation2 + $0x19] sm:$0x1] %vm464_vm3, %v6301_v17  ;;  %477 = vst.msk [vmem:[#allocation2 + $0x29] sm:$0x1] %vm464_vm3, %v6301_v17  ;;  %v6455_v22 = vshrl.u32 %v548_v21, 7 }
   0xe   : > { %s5409_s28 = sshll.u32 %s8664_s25, 6  ;;  %s5410_s29 = sshll.u32 %s8664_s25, 7  ;;  %458 = vst.msk [vmem:[#allocation2] sm:$0xff] %vm457_vm2, %v6301_v17  ;;  %462 = vst.msk [vmem:[#allocation2 + $0x90] sm:$0xff] %vm457_vm2, %v6301_v17  ;;  %v5092_v23 = vld [vmem:[%s8580_s3] ss:$0 sm:$0xff] }
   0xf   : > { %s288_s9 = scalar_lea.vmem %s8577_s0, %s5409_s28  ;;  %s6366_s12 = scalar_lea.vmem %s8578_s1, %s5410_s29  ;;  %466 = vst.msk [vmem:[#allocation2 + $0x10] sm:$0x1] %vm464_vm3, %v6301_v17  ;;  %467 = vst.msk [vmem:[#allocation2 + $0x20] sm:$0x1] %vm464_vm3, %v6301_v17  ;;  %v760_v26 = vsub.s32 6, %v6455_v22  ;;  %v780_v27 = vsub.s32 4, %v6455_v22 }
  0x10   : > { %v299_v1 = vld [vmem:[%s288_s9] sm:$0xff]  ;;  %v300_v3 = vld [vmem:[%s288_s9 + $0x8] sm:$0xff]  ;;  %v301_v5 = vld [vmem:[%s288_s9 + $0x10] sm:$0xff]  ;;  %468 = vst.msk [vmem:[#allocation2 + $0x30] sm:$0x1] %vm464_vm3, %v6301_v17  ;;  %v856_v34 = vsub.s32 2, %v6455_v22  ;;  %s8352_s26 = scalar_lea.vmem %s8584_s7, %s5410_s29 }
  0x11   : > { %v303_v2 = vld [vmem:[%s288_s9 + $0x20] sm:$0xff]  ;;  %5747 = vmatprep.mubr.msk.f32.mxu0 %vm315_vm1, %v299_v1  ;;  %v304_v4 = vld [vmem:[%s288_s9 + $0x28] sm:$0xff]  ;;  %v305_v6 = vld [vmem:[%s288_s9 + $0x30] sm:$0xff]  ;;  %469 = vst.msk [vmem:[#allocation2 + $0x40] sm:$0x1] %vm464_vm3, %v6301_v17  ;;  %v6469_v41 = vrot.slane %v538_v30, %v760_v26  ;;  %v6471_v42 = vrot.slane %v538_v30, %v780_v27  ;;  %v868_v44 = vsub.s32 0, %v6455_v22 }
  0x12   : > { %5753 = vmatprep.mubr.msk.f32.mxu1 %vm315_vm1, %v303_v2  ;;  %5748 = vmatmul.mubr.msk.f32.vlgmr.msra.gmra.mxu0 %vm315_vm1, %v300_v3  ;;  %v1023_v7 = vld [vmem:[%s6366_s12] sm:$0xff]  ;;  %v302_v8 = vld [vmem:[%s288_s9 + $0x18] sm:$0xff]  ;;  %v1025_v10 = vld [vmem:[%s6366_s12 + $0x10] sm:$0xff]  ;;  %470 = vst.msk [vmem:[#allocation2 + $0x50] sm:$0x1] %vm464_vm3, %v6301_v17  ;;  %v550_v52 = vsub.s32 5, %v6455_v22  ;;  %v6490_v0 = vrot.slane %v538_v30, %v856_v34 }
  0x13   : > { %5754 = vmatmul.mubr.msk.f32.vlgmr.msra.gmra.mxu1 %vm315_vm1, %v304_v4  ;;  %5750 = vmatprep.mubr.msk.f32.mxu0 %vm315_vm1, %v301_v5  ;;  %v306_v9 = vld [vmem:[%s288_s9 + $0x38] sm:$0xff]  ;;  %v1024_v11 = vld [vmem:[%s6366_s12 + $0x8] sm:$0xff]  ;;  %v1027_v12 = vld [vmem:[%s6366_s12 + $0x20] sm:$0xff]  ;;  %471 = vst.msk [vmem:[#allocation2 + $0x60] sm:$0x1] %vm464_vm3, %v6301_v17  ;;  %v570_v53 = vsub.s32 7, %v6455_v22  ;;  %v6494_v3 = vrot.slane %v538_v30, %v868_v44 }
  0x14   : > { %5756 = vmatprep.mubr.msk.f32.mxu1 %vm315_vm1, %v305_v6  ;;  %1055 = vrot.lane.b32.xlu0 %v1023_v7, %s6299_s13  ;;  %v1026_v13 = vld [vmem:[%s6366_s12 + $0x18] sm:$0xff]  ;;  %v1029_v14 = vld [vmem:[%s6366_s12 + $0x30] sm:$0xff]  ;;  %v1028_v15 = vld [vmem:[%s6366_s12 + $0x28] sm:$0xff]  ;;  %472 = vst.msk [vmem:[#allocation2 + $0x70] sm:$0x1] %vm464_vm3, %v6301_v17  ;;  %v646_v54 = vsub.s32 1, %v6455_v22 }
  0x15   : > { %1120 = vrot.lane.b32.xlu1 %v1023_v7, %s6300_s14  ;;  %v1031_v16 = vld [vmem:[%s6366_s12 + $0x40] sm:$0xff]  ;;  %473 = vst.msk [vmem:[#allocation2 + $0x80] sm:$0x1] %vm464_vm3, %v6301_v17  ;;  %478 = vst.msk [vmem:[#allocation2 + $0x39] sm:$0x1] %vm464_vm3, %v6301_v17  ;;  %v1030_v18 = vld [vmem:[%s6366_s12 + $0x38] sm:$0xff] }
  0x16   : > { %5751 = vmatmul.mubr.msk.f32.gmra.mxu0 %vm315_vm1, %v302_v8  ;;  %479 = vst.msk [vmem:[#allocation2 + $0x49] sm:$0x1] %vm464_vm3, %v6301_v17  ;;  %480 = vst.msk [vmem:[#allocation2 + $0x59] sm:$0x1] %vm464_vm3, %v6301_v17  ;;  %v1033_v19 = vld [vmem:[%s6366_s12 + $0x50] sm:$0xff]  ;;  %v1032_v20 = vld [vmem:[%s6366_s12 + $0x48] sm:$0xff]  ;;  %v6504_v8 = vrot.slane %v538_v30, %v550_v52 }
  0x17   : > { %5757 = vmatmul.mubr.msk.f32.gmra.mxu1 %vm315_vm1, %v306_v9  ;;  %481 = vst.msk [vmem:[#allocation2 + $0x69] sm:$0x1] %vm464_vm3, %v6301_v17  ;;  %482 = vst.msk [vmem:[#allocation2 + $0x79] sm:$0x1] %vm464_vm3, %v6301_v17  ;;  %v539_v31 = vld [vmem:[%s8581_s4 + $0x8] sm:$0xff]  ;;  %v658_v55 = vsub.s32 3, %v6455_v22 }
  0x18   : > { %1059 = vrot.lane.b32.xlu0 %v1025_v10, %s6299_s13  ;;  %483 = vst.msk [vmem:[#allocation2 + $0x89] sm:$0x1] %vm464_vm3, %v6301_v17  ;;  %465 = vst.msk [vmem:[#allocation2] sm:$0x1] %vm464_vm3, %v6301_v17  ;;  %v6473_v43 = vrot.slane %v539_v31, %v760_v26  ;;  %v6484_v61 = vrot.slane %v539_v31, %v780_v27  ;;  %v6486_v62 = vrot.slane %v539_v31, %v856_v34  ;;  %vm494_vm5 = vcmask 261120   ;;  %s6302_s27 = smov 112  }
  0x19   : > { %1057 = vrot.lane.b32.xlu1 %v1024_v11, %s6299_s13  ;;  %474 = vst.msk [vmem:[#allocation2 + $0x90] sm:$0x1] %vm464_vm3, %v6301_v17  ;;  %v6488_v63 = vrot.slane %v539_v31, %v868_v44  ;;  %v6506_v9 = vrot.slane %v539_v31, %v550_v52  ;;  %vm501_vm6 = vcmask 253952   ;;  %vm496_vm7 = vcmask 254976  }
  0x1a   : > { %460 = vst.msk [vmem:[#allocation2 + $0x8] sm:$0x3] %vm459_vm4, %v6301_v17  ;;  %463 = vst.msk [vmem:[#allocation2 + $0x98] sm:$0x3] %vm459_vm4, %v6301_v17  ;;  %vm1241_vm8 = vcmask 130048   ;;  %vm1006_vm9 = vcmask 195712  }
  0x1b   : > { %475 = vst.msk [vmem:[#allocation2 + $0x9] sm:$0x1] %vm464_vm3, %v6301_v17  ;;  %484 = vst.msk [vmem:[#allocation2 + $0x99] sm:$0x1] %vm464_vm3, %v6301_v17  ;;  %vm1103_vm10 = vcmask 130112   ;;  %vm1168_vm11 = vcmask 261312  }
  0x1c   : > { %1124 = vrot.lane.b32.xlu0 %v1025_v10, %s6300_s14  ;;  %v6508_v10 = vrot.slane %v539_v31, %v570_v53  ;;  %495 = vst.msk [vmem:[#allocation3] sm:$0xff] %vm494_vm5, %v6301_v17  ;;  %499 = vst.msk [vmem:[#allocation3 + $0x110] sm:$0xff] %vm494_vm5, %v6301_v17 }
  0x1d   : > { %1122 = vrot.lane.b32.xlu1 %v1024_v11, %s6300_s14  ;;  %v6512_v11 = vrot.slane %v538_v30, %v570_v53  ;;  %503 = vst.msk [vmem:[#allocation3 + $0x10] sm:$0x1] %vm501_vm6, %v6301_v17  ;;  %504 = vst.msk [vmem:[#allocation3 + $0x20] sm:$0x1] %vm501_vm6, %v6301_v17 }
  0x1e   : > { %505 = vst.msk [vmem:[#allocation3 + $0x30] sm:$0x1] %vm501_vm6, %v6301_v17  ;;  %506 = vst.msk [vmem:[#allocation3 + $0x40] sm:$0x1] %vm501_vm6, %v6301_v17 }
  0x1f   : > { %v616_v5 = vld [vmem:[#allocation2] sm:$0xff]  ;;  %507 = vst.msk [vmem:[#allocation3 + $0x50] sm:$0x1] %vm501_vm6, %v6301_v17  ;;  %508 = vst.msk [vmem:[#allocation3 + $0x60] sm:$0x1] %vm501_vm6, %v6301_v17 }
  0x20   : > { %1063 = vrot.lane.b32.xlu0 %v1027_v12, %s6299_s13  ;;  %v6532_v21 = vmul.f32 %v6508_v10, %v616_v5  ;;  %509 = vst.msk [vmem:[#allocation3 + $0x70] sm:$0x1] %vm501_vm6, %v6301_v17  ;;  %510 = vst.msk [vmem:[#allocation3 + $0x80] sm:$0x1] %vm501_vm6, %v6301_v17 }
  0x21   : > { %1061 = vrot.lane.b32.xlu1 %v1026_v13, %s6299_s13  ;;  %v798_v51 = vld [vmem:[#allocation2 + $0x1] sm:$0xff]  ;;  %v6499_v6 = vld [vmem:[#allocation2 + $0x91] sm:$0xff]  ;;  %511 = vst.msk [vmem:[#allocation3 + $0x90] sm:$0x1] %vm501_vm6, %v6301_v17  ;;  %512 = vst.msk [vmem:[#allocation3 + $0xa0] sm:$0x1] %vm501_vm6, %v6301_v17 }
  0x22   : > { %v826_v60 = vld [vmem:[#allocation2 + $0x2] sm:$0xff]  ;;  %v6497_v4 = vmul.f32 %v6473_v43, %v798_v51  ;;  %v6536_v22 = vmul.f32 %v6490_v0, %v6499_v6  ;;  %513 = vst.msk [vmem:[#allocation3 + $0xb0] sm:$0x1] %vm501_vm6, %v6301_v17  ;;  %514 = vst.msk [vmem:[#allocation3 + $0xc0] sm:$0x1] %vm501_vm6, %v6301_v17 }
  0x23   : > { %v6502_v7 = vmul.f32 %v6484_v61, %v826_v60  ;;  %515 = vst.msk [vmem:[#allocation3 + $0xd0] sm:$0x1] %vm501_vm6, %v6301_v17  ;;  %516 = vst.msk [vmem:[#allocation3 + $0xe0] sm:$0x1] %vm501_vm6, %v6301_v17 }
  0x24   : > { %1128 = vrot.lane.b32.xlu0 %v1027_v12, %s6300_s14  ;;  %v6514_v12 = vrot.slane %v539_v31, %v646_v54  ;;  %517 = vst.msk [vmem:[#allocation3 + $0xf0] sm:$0x1] %vm501_vm6, %v6301_v17  ;;  %518 = vst.msk [vmem:[#allocation3 + $0x100] sm:$0x1] %vm501_vm6, %v6301_v17 }
  0x25   : > { %1126 = vrot.lane.b32.xlu1 %v1026_v13, %s6300_s14  ;;  %v6516_v13 = vrot.slane %v539_v31, %v658_v55  ;;  %521 = vst.msk [vmem:[#allocation3 + $0x19] sm:$0x1] %vm501_vm6, %v6301_v17  ;;  %522 = vst.msk [vmem:[#allocation3 + $0x29] sm:$0x1] %vm501_vm6, %v6301_v17 }
  0x26   : > { %523 = vst.msk [vmem:[#allocation3 + $0x39] sm:$0x1] %vm501_vm6, %v6301_v17  ;;  %524 = vst.msk [vmem:[#allocation3 + $0x49] sm:$0x1] %vm501_vm6, %v6301_v17 }
  0x27   : > { %525 = vst.msk [vmem:[#allocation3 + $0x59] sm:$0x1] %vm501_vm6, %v6301_v17  ;;  %526 = vst.msk [vmem:[#allocation3 + $0x69] sm:$0x1] %vm501_vm6, %v6301_v17 }
  0x28   : > { %1067 = vrot.lane.b32.xlu0 %v1029_v14, %s6299_s13  ;;  %527 = vst.msk [vmem:[#allocation3 + $0x79] sm:$0x1] %vm501_vm6, %v6301_v17  ;;  %528 = vst.msk [vmem:[#allocation3 + $0x89] sm:$0x1] %vm501_vm6, %v6301_v17 }
  0x29   : > { %1065 = vrot.lane.b32.xlu1 %v1028_v15, %s6299_s13  ;;  %529 = vst.msk [vmem:[#allocation3 + $0x99] sm:$0x1] %vm501_vm6, %v6301_v17  ;;  %530 = vst.msk [vmem:[#allocation3 + $0xa9] sm:$0x1] %vm501_vm6, %v6301_v17 }
  0x2a   : > { %531 = vst.msk [vmem:[#allocation3 + $0xb9] sm:$0x1] %vm501_vm6, %v6301_v17  ;;  %532 = vst.msk [vmem:[#allocation3 + $0xc9] sm:$0x1] %vm501_vm6, %v6301_v17 }
  0x2b   : > { %533 = vst.msk [vmem:[#allocation3 + $0xd9] sm:$0x1] %vm501_vm6, %v6301_v17  ;;  %534 = vst.msk [vmem:[#allocation3 + $0xe9] sm:$0x1] %vm501_vm6, %v6301_v17 }
  0x2c   : > { %1132 = vrot.lane.b32.xlu0 %v1029_v14, %s6300_s14  ;;  %v6518_v14 = vrot.slane %v538_v30, %v646_v54  ;;  %535 = vst.msk [vmem:[#allocation3 + $0xf9] sm:$0x1] %vm501_vm6, %v6301_v17  ;;  %536 = vst.msk [vmem:[#allocation3 + $0x109] sm:$0x1] %vm501_vm6, %v6301_v17 }
  0x2d   : > { %1130 = vrot.lane.b32.xlu1 %v1028_v15, %s6300_s14  ;;  %502 = vst.msk [vmem:[#allocation3] sm:$0x1] %vm501_vm6, %v6301_v17  ;;  %519 = vst.msk [vmem:[#allocation3 + $0x110] sm:$0x1] %vm501_vm6, %v6301_v17 }
  0x2e   : > { %497 = vst.msk [vmem:[#allocation3 + $0x8] sm:$0x3] %vm496_vm7, %v6301_v17  ;;  %500 = vst.msk [vmem:[#allocation3 + $0x118] sm:$0x3] %vm496_vm7, %v6301_v17 }
  0x2f   : > { %520 = vst.msk [vmem:[#allocation3 + $0x9] sm:$0x1] %vm501_vm6, %v6301_v17  ;;  %537 = vst.msk [vmem:[#allocation3 + $0x119] sm:$0x1] %vm501_vm6, %v6301_v17 }
  0x30   : > { %1071 = vrot.lane.b32.xlu0 %v1031_v16, %s6299_s13 }
  0x31   : > { %1069 = vrot.lane.b32.xlu1 %v1030_v18, %s6299_s13 }
  0x34   : > { %1136 = vrot.lane.b32.xlu0 %v1031_v16, %s6300_s14 }
  0x35   : > { %1134 = vrot.lane.b32.xlu1 %v1030_v18, %s6300_s14 }
  0x38   : > { %1075 = vrot.lane.b32.xlu0 %v1033_v19, %s6299_s13 }
  0x39   : > { %1073 = vrot.lane.b32.xlu1 %v1032_v20, %s6299_s13 }
  0x3c   : > { %1140 = vrot.lane.b32.xlu0 %v1033_v19, %s6300_s14  ;;  %v6526_v19 = vrot.slane %v538_v30, %v658_v55 }
  0x3d   : > { %1138 = vrot.lane.b32.xlu1 %v1032_v20, %s6300_s14  ;;  %v6529_v20 = vmul.f32 %v798_v51, %v6506_v9 }
  0xd2   : > { %v5749_v24 = vpop.f32.mrf.mxu0 }
  0xd3   : > { %v5755_v25 = vpop.f32.mrf.mxu1  ;;  %v416_v28 = vadd.f32 %v5749_v24, %v5092_v23 }
  0xd4   : > { %v436_v29 = vadd.f32 %v5755_v25, %v5092_v23  ;;  %v410_v32 = vpop.f32.mrf.mxu0 }
  0xd5   : > { %v430_v33 = vpop.f32.mrf.mxu1  ;;  %v450_v35 = vmax.f32 %v416_v28, 0.0  ;;  %v411_v37 = vadd.f32 %v5092_v23, %v410_v32 }
  0xd6   : > { %v454_v36 = vmax.f32 %v436_v29, 0.0  ;;  %v431_v38 = vadd.f32 %v5092_v23, %v430_v33  ;;  %v5752_v39 = vpop.f32.mrf.mxu0 }
  0xd7   : > { %v5758_v40 = vpop.f32.mrf.mxu1  ;;  %487 = vst.msk [vmem:[#allocation2 + $0x21] sm:$0xff] %vm457_vm2, %v450_v35  ;;  %v449_v45 = vmax.f32 %v411_v37, 0.0  ;;  %v426_v47 = vadd.f32 %v5752_v39, %v5092_v23 }
  0xd8   : > { %491 = vst.msk [vmem:[#allocation2 + $0x61] sm:$0xff] %vm457_vm2, %v454_v36  ;;  %v453_v46 = vmax.f32 %v431_v38, 0.0  ;;  %v446_v48 = vadd.f32 %v5758_v40, %v5092_v23  ;;  %v420_v49 = vpop.f32.mrf.mxu0 }
  0xd9   : > { %v440_v50 = vpop.f32.mrf.mxu1  ;;  %486 = vst.msk [vmem:[#allocation2 + $0x11] sm:$0xff] %vm457_vm2, %v449_v45  ;;  %v452_v56 = vmax.f32 %v426_v47, 0.0  ;;  %v421_v58 = vadd.f32 %v5092_v23, %v420_v49 }
  0xda   : > { %490 = vst.msk [vmem:[#allocation2 + $0x51] sm:$0xff] %vm457_vm2, %v453_v46  ;;  %v456_v57 = vmax.f32 %v446_v48, 0.0  ;;  %v441_v59 = vadd.f32 %v5092_v23, %v440_v50 }
  0xdb   : > { %489 = vst.msk [vmem:[#allocation2 + $0x41] sm:$0xff] %vm457_vm2, %v452_v56  ;;  %v451_v1 = vmax.f32 %v421_v58, 0.0 }
  0xdc   : > { %493 = vst.msk [vmem:[#allocation2 + $0x81] sm:$0xff] %vm457_vm2, %v456_v57  ;;  %v455_v2 = vmax.f32 %v441_v59, 0.0 }
  0xdd   : > { %488 = vst.msk [vmem:[#allocation2 + $0x31] sm:$0xff] %vm457_vm2, %v451_v1 }
  0xde   : > { %492 = vst.msk [vmem:[#allocation2 + $0x71] sm:$0xff] %vm457_vm2, %v455_v2  ;;  %v6520_v15 = vld [vmem:[#allocation2 + $0x21] sm:$0xff] }
  0xdf   : > { %v6522_v16 = vld [vmem:[#allocation2 + $0x22] sm:$0xff]  ;;  %v763_v23 = vmul.f32 %v6469_v41, %v6520_v15  ;;  %v898_v25 = vmul.f32 %v6490_v0, %v6520_v15  ;;  %v859_v54 = vmul.f32 %v6486_v62, %v6520_v15 }
  0xe0   : > { %v6524_v18 = vld [vmem:[#allocation2 + $0x61] sm:$0xff]  ;;  %v783_v24 = vmul.f32 %v6471_v42, %v6522_v16  ;;  %v926_v26 = vmul.f32 %v6494_v3, %v6522_v16  ;;  %v6548_v28 = vld [vmem:[#allocation2 + $0x11] sm:$0xff]  ;;  %v871_v58 = vmul.f32 %v6488_v63, %v6522_v16 }
  0xe1   : > { %v6546_v27 = vld [vmem:[#allocation2 + $0x62] sm:$0xff]  ;;  %v827_v29 = vld [vmem:[#allocation2 + $0x12] sm:$0xff]  ;;  %v767_v30 = vmul.f32 %v6469_v41, %v6524_v18  ;;  %v902_v33 = vmul.f32 %v6490_v0, %v6524_v18  ;;  %v811_v36 = vmul.f32 %v6473_v43, %v6548_v28  ;;  %v858_v38 = vmul.f32 %v6486_v62, %v6548_v28 }
  0xe2   : > { %v787_v31 = vmul.f32 %v6471_v42, %v6546_v27  ;;  %v6554_v32 = vld [vmem:[#allocation2 + $0x51] sm:$0xff]  ;;  %v930_v34 = vmul.f32 %v6494_v3, %v6546_v27  ;;  %v791_v35 = vadd.f32 %v783_v24, %v763_v23  ;;  %v839_v37 = vmul.f32 %v6484_v61, %v827_v29  ;;  %v6584_v24 = vld [vmem:[#allocation2 + $0x41] sm:$0xff] }
  0xe3   : > { %v831_v39 = vld [vmem:[#allocation2 + $0x52] sm:$0xff]  ;;  %v870_v40 = vmul.f32 %v6488_v63, %v827_v29  ;;  %v815_v45 = vmul.f32 %v6473_v43, %v6554_v32  ;;  %v862_v48 = vmul.f32 %v6486_v62, %v6554_v32  ;;  %v762_v50 = vmul.f32 %v6548_v28, %v6469_v41 }
  0xe4   : > { %v795_v44 = vadd.f32 %v787_v31, %v767_v30  ;;  %v843_v46 = vmul.f32 %v6484_v61, %v831_v39  ;;  %v819_v47 = vadd.f32 %v811_v36, %v791_v35  ;;  %v874_v49 = vmul.f32 %v6488_v63, %v831_v39  ;;  %v6577_v55 = vld [vmem:[#allocation2 + $0x31] sm:$0xff]  ;;  %v830_v36 = vld [vmem:[#allocation2 + $0x42] sm:$0xff] }
  0xe5   : > { %v878_v51 = vadd.f32 %v870_v40, %v858_v38  ;;  %v782_v53 = vmul.f32 %v827_v29, %v6471_v42  ;;  %v899_v59 = vmul.f32 %v6490_v0, %v6577_v55  ;;  %v915_v60 = vld [vmem:[#allocation2 + $0x32] sm:$0xff]  ;;  %v879_v30 = vadd.f32 %v871_v58, %v859_v54 }
  0xe6   : > { %v823_v52 = vadd.f32 %v815_v45, %v795_v44  ;;  %v847_v56 = vadd.f32 %v839_v37, %v819_v47  ;;  %v882_v57 = vadd.f32 %v874_v49, %v862_v48  ;;  %v927_v23 = vmul.f32 %v6494_v3, %v915_v60  ;;  %v6602_v49 = vld [vmem:[#allocation2 + $0x71] sm:$0xff] }
  0xe7   : > { %v906_v1 = vadd.f32 %v898_v25, %v878_v51  ;;  %v790_v5 = vadd.f32 %v782_v53, %v762_v50  ;;  %v766_v31 = vmul.f32 %v6554_v32, %v6469_v41  ;;  %v786_v35 = vmul.f32 %v831_v39, %v6471_v42 }
  0xe8   : > { %v851_v2 = vadd.f32 %v843_v46, %v823_v52  ;;  %962 = vrot.lane.b32.xlu0 %v847_v56, %s6300_s14  ;;  %v910_v29 = vadd.f32 %v902_v33, %v882_v57  ;;  %v814_v25 = vmul.f32 %v6473_v43, %v6584_v24  ;;  %v842_v40 = vmul.f32 %v6484_v61, %v830_v36 }
  0xe9   : > { %v934_v37 = vadd.f32 %v926_v26, %v906_v1  ;;  %v818_v38 = vadd.f32 %v6497_v4, %v790_v5  ;;  %v907_v45 = vadd.f32 %v899_v59, %v879_v30  ;;  %v794_v46 = vadd.f32 %v786_v35, %v766_v31  ;;  %v6627_v5 = vld [vmem:[%s8582_s5 + $0x10] sm:$0xff] }
  0xea   : > { %v938_v44 = vadd.f32 %v930_v34, %v910_v29  ;;  %v861_v33 = vmul.f32 %v6486_v62, %v6584_v24  ;;  %v873_v48 = vmul.f32 %v6488_v63, %v830_v36  ;;  %v901_v4 = vmul.f32 %v6490_v0, %v6554_v32 }
  0xeb   : > { %960 = vrot.lane.b32.xlu1 %v934_v37, %s6300_s14  ;;  %v846_v47 = vadd.f32 %v6502_v7, %v818_v38  ;;  %v929_v26 = vmul.f32 %v6494_v3, %v831_v39  ;;  %v935_v34 = vadd.f32 %v927_v23, %v907_v45  ;;  %v822_v50 = vadd.f32 %v814_v25, %v794_v46  ;;  %v6611_v7 = vld [vmem:[%s8582_s5 + $0x18] sm:$0xff] }
  0xec   : > { %978 = vrot.lane.b32.xlu0 %v851_v2, %s6300_s14  ;;  %v765_v51 = vmul.f32 %v6584_v24, %v6469_v41  ;;  %v785_v52 = vmul.f32 %v830_v36, %v6471_v42  ;;  %v881_v53 = vadd.f32 %v873_v48, %v861_v33  ;;  %v813_v39 = vmul.f32 %v6577_v55, %v6473_v43  ;;  %v919_v2 = vld [vmem:[#allocation2 + $0x72] sm:$0xff] }
  0xed   : > { %v841_v54 = vmul.f32 %v915_v60, %v6484_v61  ;;  %v863_v56 = vmul.f32 %v6486_v62, %v6524_v18  ;;  %5759 = vmatprep.subr.mxu1 %v6611_v7  ;;  %v850_v57 = vadd.f32 %v842_v40, %v822_v50  ;;  %v875_v59 = vmul.f32 %v6488_v63, %v6546_v27  ;;  %v6639_v40 = vld [vmem:[#allocation2 + $0x81] sm:$0xff] }
  0xee   : > { %v793_v58 = vadd.f32 %v785_v52, %v765_v51  ;;  %v903_v1 = vmul.f32 %v6490_v0, %v6602_v49  ;;  %5760 = vmatpush3.msra.mxu1 %v6611_v7  ;;  %v909_v23 = vadd.f32 %v901_v4, %v881_v53  ;;  %v931_v29 = vmul.f32 %v6494_v3, %v919_v2 }
  0xef   : > { %976 = vrot.lane.b32.xlu1 %v938_v44, %s6300_s14  ;;  %v764_v30 = vmul.f32 %v6577_v55, %v6469_v41  ;;  %v784_v31 = vmul.f32 %v915_v60, %v6471_v42  ;;  %v883_v37 = vadd.f32 %v875_v59, %v863_v56  ;;  %v812_v38 = vmul.f32 %v6473_v43, %v6520_v15  ;;  %v6641_v44 = vld [vmem:[#allocation2 + $0x82] sm:$0xff] }
  0xf0   : > { %958 = vrot.lane.b32.xlu0 %v846_v47, %s6300_s14  ;;  %v821_v35 = vadd.f32 %v813_v39, %v793_v58  ;;  %v840_v25 = vmul.f32 %v6484_v61, %v6522_v16  ;;  %v937_v45 = vadd.f32 %v929_v26, %v909_v23  ;;  %v860_v33 = vmul.f32 %v6577_v55, %v6486_v62 }
  0xf1   : > { %v792_v46 = vadd.f32 %v784_v31, %v764_v30  ;;  %v872_v48 = vmul.f32 %v915_v60, %v6488_v63  ;;  %5761 = vmatprep.subr.mxu1 %v6627_v5  ;;  %v911_v4 = vadd.f32 %v903_v1, %v883_v37  ;;  %v900_v50 = vmul.f32 %v6490_v0, %v6584_v24  ;;  %v6663_v1 = vld [vmem:[#allocation2 + $0x20] sm:$0xff]  ;;  %v617_v31 = vld [vmem:[#allocation2 + $0x10] sm:$0xff] }
  0xf2   : > { %v849_v47 = vadd.f32 %v841_v54, %v821_v35  ;;  %v928_v16 = vmul.f32 %v6494_v3, %v830_v36  ;;  %5762 = vmatpush3.msra.mxu1 %v6627_v5  ;;  %v769_v52 = vmul.f32 %v6469_v41, %v6639_v40  ;;  %v789_v60 = vmul.f32 %v6471_v42, %v6641_v44 }
  0xf3   : > { %964 = vrot.lane.b32.xlu1 %v935_v34, %s6300_s14  ;;  %v820_v26 = vadd.f32 %v812_v38, %v792_v46  ;;  %v880_v51 = vadd.f32 %v872_v48, %v860_v33  ;;  %v939_v53 = vadd.f32 %v931_v29, %v911_v4  ;;  %v817_v39 = vmul.f32 %v6602_v49, %v6473_v43  ;;  %v6687_v46 = vld [vmem:[#allocation2 + $0x60] sm:$0xff] }
  0xf4   : > { %974 = vrot.lane.b32.xlu0 %v850_v57, %s6300_s14  ;;  %v845_v36 = vmul.f32 %v919_v2, %v6484_v61  ;;  %v768_v54 = vmul.f32 %v6602_v49, %v6469_v41  ;;  %v797_v58 = vadd.f32 %v789_v60, %v769_v52  ;;  %v788_v59 = vmul.f32 %v919_v2, %v6471_v42 }
  0xf5   : > { %v848_v34 = vadd.f32 %v840_v25, %v820_v26  ;;  %v908_v56 = vadd.f32 %v900_v50, %v880_v51  ;;  %v816_v23 = vmul.f32 %v6473_v43, %v6524_v18  ;;  %v844_v57 = vmul.f32 %v6484_v61, %v6546_v27  ;;  %v6693_v50 = vld [vmem:[#allocation2 + $0x50] sm:$0xff] }
  0xf6   : > { %v864_v29 = vmul.f32 %v6602_v49, %v6486_v62  ;;  %v876_v30 = vmul.f32 %v919_v2, %v6488_v63  ;;  %v825_v35 = vadd.f32 %v817_v39, %v797_v58  ;;  %v796_v37 = vadd.f32 %v788_v59, %v768_v54  ;;  %v6711_v54 = vld [vmem:[%s6366_s12 + $0x60] sm:$0xff] }
  0xf7   : > { %972 = vrot.lane.b32.xlu1 %v937_v45, %s6300_s14  ;;  %v936_v41 = vadd.f32 %v928_v16, %v908_v56  ;;  %v904_v42 = vmul.f32 %v6490_v0, %v6639_v40  ;;  %v932_v61 = vmul.f32 %v6494_v3, %v6641_v44  ;;  %v553_v27 = vmul.f32 %v6520_v15, %v6504_v8 }
  0xf8   : > { %970 = vrot.lane.b32.xlu0 %v849_v47, %s6300_s14  ;;  %v884_v43 = vadd.f32 %v876_v30, %v864_v29  ;;  %v573_v2 = vmul.f32 %v6512_v11, %v6663_v1  ;;  %v6682_v38 = vadd.f32 %v845_v36, %v825_v35  ;;  %v824_v25 = vadd.f32 %v816_v23, %v796_v37 }
  0xf9   : > { %v601_v45 = vmul.f32 %v6548_v28, %v6506_v9  ;;  %v629_v0 = vmul.f32 %v6508_v10, %v617_v31  ;;  %v689_v47 = vmul.f32 %v6520_v15, %v6518_v14  ;;  %v717_v4 = vmul.f32 %v6526_v19, %v6663_v1 }
  0xfa   : > { %v912_v33 = vadd.f32 %v904_v42, %v884_v43  ;;  %v581_v48 = vadd.f32 %v573_v2, %v553_v27  ;;  %v6696_v16 = vadd.f32 %v844_v57, %v824_v25  ;;  %v648_v26 = vmul.f32 %v6548_v28, %v6514_v12 }
  0xfb   : > { %980 = vrot.lane.b32.xlu1 %v939_v53, %s6300_s14  ;;  %v660_v51 = vmul.f32 %v6516_v13, %v617_v31  ;;  %v557_v52 = vmul.f32 %v6524_v18, %v6504_v8  ;;  %v577_v36 = vmul.f32 %v6512_v11, %v6687_v46  ;;  %v605_v53 = vmul.f32 %v6554_v32, %v6506_v9 }
  0xfc   : > { %966 = vrot.lane.b32.xlu0 %v848_v34, %s6300_s14  ;;  %v6704_v60 = vadd.f32 %v932_v61, %v912_v33  ;;  %v609_v39 = vadd.f32 %v601_v45, %v581_v48  ;;  %v633_v58 = vmul.f32 %v6508_v10, %v6693_v50  ;;  %v652_v59 = vmul.f32 %v6554_v32, %v6514_v12  ;;  %v6730_v61 = vld [vmem:[%s6366_s12 + $0x58] sm:$0xff] }
  0xfd   : > { %v668_v56 = vadd.f32 %v660_v51, %v648_v26  ;;  %v664_v34 = vmul.f32 %v6516_v13, %v6693_v50  ;;  %v585_v57 = vadd.f32 %v577_v36, %v557_v52  ;;  %v693_v29 = vmul.f32 %v6524_v18, %v6518_v14 }
  0xfe   : > { %v637_v23 = vadd.f32 %v629_v0, %v609_v39  ;;  %v721_v30 = vmul.f32 %v6526_v19, %v6687_v46  ;;  %v552_v42 = vmul.f32 %v6548_v28, %v6504_v8  ;;  %v572_v43 = vmul.f32 %v617_v31, %v6512_v11  ;;  %v6803_v31 = vld [vmem:[#allocation2 + $0x30] sm:$0xff]  ;;  %v6805_v0 = vld [vmem:[#allocation2 + $0x40] sm:$0xff] }
  0xff   : > { %968 = vrot.lane.b32.xlu1 %v936_v41, %s6300_s14  ;;  %v697_v35 = vadd.f32 %v689_v47, %v668_v56  ;;  %v672_v37 = vadd.f32 %v664_v34, %v652_v59  ;;  %v613_v27 = vadd.f32 %v605_v53, %v585_v57  ;;  %v649_v41 = vmul.f32 %v6520_v15, %v6514_v12 }
 0x100   : > { %1079 = vrot.lane.b32.xlu0 %v6711_v54, %s6299_s13  ;;  %736 = vst.msk [vmem:[#allocation3 + $0x31] sm:$0xff] %vm457_vm2, %v637_v23  ;;  %v580_v45 = vadd.f32 %v572_v43, %v552_v42  ;;  %v661_v28 = vmul.f32 %v6516_v13, %v6663_v1  ;;  %v690_v48 = vmul.f32 %v6577_v55, %v6518_v14 }
 0x101   : > { %v725_v2 = vadd.f32 %v717_v4, %v697_v35  ;;  %v701_v25 = vadd.f32 %v693_v29, %v672_v37  ;;  %v641_v33 = vadd.f32 %v633_v58, %v613_v27  ;;  %v718_v47 = vmul.f32 %v6526_v19, %v6803_v31 }
 0x102   : > { %v556_v4 = vmul.f32 %v6554_v32, %v6504_v8  ;;  %v608_v51 = vadd.f32 %v6529_v20, %v580_v45  ;;  %v669_v52 = vadd.f32 %v661_v28, %v649_v41  ;;  %v576_v39 = vmul.f32 %v6693_v50, %v6512_v11 }
 0x103   : > { %1077 = vrot.lane.b32.xlu1 %v6730_v61, %s6299_s13  ;;  %735 = vst.msk [vmem:[#allocation3 + $0x21] sm:$0xff] %vm457_vm2, %v725_v2  ;;  %v729_v26 = vadd.f32 %v721_v30, %v701_v25  ;;  %744 = vst.msk [vmem:[#allocation3 + $0xb1] sm:$0xff] %vm457_vm2, %v641_v33  ;;  %v604_v36 = vmul.f32 %v6584_v24, %v6506_v9  ;;  %v632_v53 = vmul.f32 %v6508_v10, %v6805_v0  ;;  %v710_v2 = vld [vmem:[#allocation2 + $0x70] sm:$0xff] }
 0x104   : > { %1144 = vrot.lane.b32.xlu0 %v6711_v54, %s6300_s14  ;;  %v651_v56 = vmul.f32 %v6584_v24, %v6514_v12  ;;  %v663_v20 = vmul.f32 %v6516_v13, %v6805_v0  ;;  %v636_v58 = vadd.f32 %v6532_v21, %v608_v51  ;;  %v698_v54 = vadd.f32 %v690_v48, %v669_v52  ;;  %v567_v51 = vld [vmem:[#allocation2 + $0x80] sm:$0xff] }
 0x105   : > { %743 = vst.msk [vmem:[#allocation3 + $0xa1] sm:$0xff] %vm457_vm2, %v729_v26  ;;  %v584_v59 = vadd.f32 %v576_v39, %v556_v4  ;;  %v692_v34 = vmul.f32 %v6554_v32, %v6518_v14  ;;  %v720_v57 = vmul.f32 %v6526_v19, %v6693_v50  ;;  %v555_v29 = vmul.f32 %v6584_v24, %v6504_v8  ;;  %v6854_v50 = vld [vmem:[%s6366_s12 + $0x68] sm:$0xff] }
 0x106   : > { %v671_v23 = vadd.f32 %v663_v20, %v651_v56  ;;  %v575_v30 = vmul.f32 %v6805_v0, %v6512_v11  ;;  %734 = vst.msk [vmem:[#allocation3 + $0x11] sm:$0xff] %vm457_vm2, %v636_v58  ;;  %v726_v21 = vadd.f32 %v718_v47, %v698_v54  ;;  %v603_v32 = vmul.f32 %v6577_v55, %v6506_v9 }
 0x107   : > { %1142 = vrot.lane.b32.xlu1 %v6730_v61, %s6300_s14  ;;  %v612_v35 = vadd.f32 %v604_v36, %v584_v59  ;;  %v631_v37 = vmul.f32 %v6803_v31, %v6508_v10  ;;  %v653_v27 = vmul.f32 %v6524_v18, %v6514_v12  ;;  %v665_v41 = vmul.f32 %v6516_v13, %v6687_v46 }
 0x108   : > { %986 = vrot.lane.b32.xlu0 %v6682_v38, %s6300_s14  ;;  %v700_v42 = vadd.f32 %v692_v34, %v671_v23  ;;  %v583_v43 = vadd.f32 %v575_v30, %v555_v29  ;;  %737 = vst.msk [vmem:[#allocation3 + $0x41] sm:$0xff] %vm457_vm2, %v726_v21  ;;  %v694_v38 = vmul.f32 %v6602_v49, %v6518_v14  ;;  %v6906_v34 = vld [vmem:[#allocation3 + $0x1] sm:$0xff] }
 0x109   : > { %v640_v61 = vadd.f32 %v632_v53, %v612_v35  ;;  %v722_v28 = vmul.f32 %v6526_v19, %v710_v2  ;;  %v554_v33 = vmul.f32 %v6577_v55, %v6504_v8  ;;  %v673_v48 = vadd.f32 %v665_v41, %v653_v27  ;;  %5763 = vmatprep.mubr.msk.f32.mxu1 %vm1241_vm8, %v6906_v34 }
 0x10a   : > { %v728_v25 = vadd.f32 %v720_v57, %v700_v42  ;;  %v611_v45 = vadd.f32 %v603_v32, %v583_v43  ;;  %v574_v47 = vmul.f32 %v6803_v31, %v6512_v11  ;;  %v602_v4 = vmul.f32 %v6520_v15, %v6506_v9  ;;  %v1037_v15 = vld [vmem:[%s6366_s12 + $0x70] sm:$0xff]  ;;  %v1185_v43 = vld [vmem:[#allocation3] sm:$0xff] }
 0x10b   : > { %1081 = vrot.lane.b32.xlu1 %v6854_v50, %s6299_s13  ;;  %742 = vst.msk [vmem:[#allocation3 + $0x91] sm:$0xff] %vm457_vm2, %v640_v61  ;;  %v630_v26 = vmul.f32 %v6508_v10, %v6663_v1  ;;  %v650_v52 = vmul.f32 %v6577_v55, %v6514_v12  ;;  %v662_v39 = vmul.f32 %v6803_v31, %v6516_v13  ;;  %v712_v42 = vld [vmem:[#allocation2 + $0x90] sm:$0xff] }
 0x10c   : > { %982 = vrot.lane.b32.xlu0 %v6696_v16, %s6300_s14  ;;  %741 = vst.msk [vmem:[#allocation3 + $0x81] sm:$0xff] %vm457_vm2, %v728_v25  ;;  %v639_v17 = vadd.f32 %v631_v37, %v611_v45  ;;  %v691_v36 = vmul.f32 %v6584_v24, %v6518_v14  ;;  %v702_v53 = vadd.f32 %v694_v38, %v673_v48 }
 0x10d   : > { %v582_v56 = vadd.f32 %v574_v47, %v554_v33  ;;  %v719_v1 = vmul.f32 %v6526_v19, %v6805_v0  ;;  %v559_v16 = vmul.f32 %v6639_v40, %v6504_v8  ;;  %v670_v20 = vadd.f32 %v662_v39, %v650_v52 }
 0x10e   : > { %740 = vst.msk [vmem:[#allocation3 + $0x71] sm:$0xff] %vm457_vm2, %v639_v17  ;;  %v579_v55 = vmul.f32 %v6512_v11, %v567_v51  ;;  %v607_v31 = vmul.f32 %v6602_v49, %v6506_v9  ;;  %v635_v58 = vmul.f32 %v710_v2, %v6508_v10  ;;  %v730_v24 = vadd.f32 %v722_v28, %v702_v53 }
 0x10f   : > { %984 = vrot.lane.b32.xlu1 %v6704_v60, %s6300_s14  ;;  %v610_v54 = vadd.f32 %v602_v4, %v582_v56  ;;  %v558_v0 = vmul.f32 %v6602_v49, %v6504_v8  ;;  %v578_v59 = vmul.f32 %v710_v2, %v6512_v11  ;;  %v699_v23 = vadd.f32 %v691_v36, %v670_v20 }
 0x110   : > { %1083 = vrot.lane.b32.xlu0 %v1037_v15, %s6299_s13  ;;  %v587_v57 = vadd.f32 %v579_v55, %v559_v16  ;;  %v606_v29 = vmul.f32 %v6524_v18, %v6506_v9  ;;  %v634_v30 = vmul.f32 %v6508_v10, %v6687_v46  ;;  %745 = vst.msk [vmem:[#allocation3 + $0xc1] sm:$0xff] %vm457_vm2, %v730_v24 }
 0x111   : > { %v638_v8 = vadd.f32 %v630_v26, %v610_v54  ;;  %v586_v60 = vadd.f32 %v578_v59, %v558_v0  ;;  %v654_v11 = vmul.f32 %v6602_v49, %v6514_v12  ;;  %v666_v21 = vmul.f32 %v710_v2, %v6516_v13 }
 0x112   : > { %v727_v35 = vadd.f32 %v719_v1, %v699_v23  ;;  %v615_v32 = vadd.f32 %v607_v31, %v587_v57  ;;  %v695_v9 = vmul.f32 %v6639_v40, %v6518_v14  ;;  %v723_v18 = vmul.f32 %v6526_v19, %v567_v51  ;;  %v6956_v31 = vld [vmem:[%s8582_s5 + $0x8] sm:$0xff] }
 0x113   : > { %1146 = vrot.lane.b32.xlu1 %v6854_v50, %s6300_s14  ;;  %738 = vst.msk [vmem:[#allocation3 + $0x51] sm:$0xff] %vm457_vm2, %v638_v8  ;;  %v614_v10 = vadd.f32 %v606_v29, %v586_v60  ;;  %v674_v46 = vadd.f32 %v666_v21, %v654_v11  ;;  %v865_v37 = vmul.f32 %v6486_v62, %v6639_v40 }
 0x114   : > { %v877_v49 = vmul.f32 %v6488_v63, %v6641_v44  ;;  %1148 = vrot.lane.b32.xlu0 %v1037_v15, %s6300_s14  ;;  %739 = vst.msk [vmem:[#allocation3 + $0x61] sm:$0xff] %vm457_vm2, %v727_v35  ;;  %v643_v61 = vadd.f32 %v635_v58, %v615_v32  ;;  %v655_v50 = vmul.f32 %v6639_v40, %v6514_v12  ;;  %v6961_v58 = vld [vmem:[%s8582_s5] sm:$0xff] }
 0x115   : > { %v667_v27 = vmul.f32 %v6516_v13, %v567_v51  ;;  %v696_v41 = vmul.f32 %v6499_v6, %v6518_v14  ;;  %v642_v38 = vadd.f32 %v634_v30, %v614_v10  ;;  %v703_v62 = vadd.f32 %v695_v9, %v674_v46  ;;  %v1056_v13 = vpop.permute.xlu0 %1055  ;;  %v1121_v14 = vpop.permute.xlu1 %1120  ;;  %5787 = vmatprep.subr.mxu0 %v6956_v31 }
 0x116   : > { %v885_v2 = vadd.f32 %v877_v49, %v865_v37  ;;  %748 = vst.msk [vmem:[#allocation3 + $0xf1] sm:$0xff] %vm457_vm2, %v643_v61  ;;  %v724_v44 = vmul.f32 %v6526_v19, %v712_v42  ;;  %5788 = vmatpush3.msra.mxu0 %v6956_v31 }
 0x117   : > { %v675_v63 = vadd.f32 %v667_v27, %v655_v50  ;;  %1451 = vrot.lane.b32.xlu1 %v1185_v43, %s6302_s27  ;;  %746 = vst.msk [vmem:[#allocation3 + $0xd1] sm:$0xff] %vm457_vm2, %v642_v38  ;;  %v731_v25 = vadd.f32 %v723_v18, %v703_v62  ;;  %5789 = vmatprep.subr.mxu0 %v6961_v58 }
 0x118   : > { %v6940_v12 = vadd.f32 %v6536_v22, %v885_v2  ;;  %5790 = vmatpush3.msra.mxu0 %v6961_v58 }
 0x119   : > { %v704_v40 = vadd.f32 %v696_v41, %v675_v63  ;;  %747 = vst.msk [vmem:[#allocation3 + $0xe1] sm:$0xff] %vm457_vm2, %v731_v25  ;;  %v1060_v45 = vpop.permute.xlu0 %1059  ;;  %v1058_v28 = vpop.permute.xlu1 %1057  ;;  %5843 = vmatprep.subr.mxu0 %v6611_v7 }
 0x11b   : > { %v732_v6 = vadd.f32 %v724_v44, %v704_v40 }
 0x11d   : > { %749 = vst.msk [vmem:[#allocation3 + $0x101] sm:$0xff] %vm457_vm2, %v732_v6  ;;  %v1125_v19 = vpop.permute.xlu0 %1124  ;;  %v1123_v33 = vpop.permute.xlu1 %1122 }
 0x121   : > { %v6944_v48 = vpop.permute.xlu0 %1063  ;;  %v1062_v47 = vpop.permute.xlu1 %1061 }
 0x125   : > { %v6946_v4 = vpop.permute.xlu0 %1128  ;;  %v1127_v26 = vpop.permute.xlu1 %1126 }
 0x129   : > { %v1068_v22 = vpop.permute.xlu0 %1067  ;;  %v6948_v51 = vpop.permute.xlu1 %1065 }
 0x12d   : > { %v1133_v17 = vpop.permute.xlu0 %1132  ;;  %v6950_v52 = vpop.permute.xlu1 %1130 }
 0x131   : > { %v1072_v39 = vpop.permute.xlu0 %1071  ;;  %v1070_v36 = vpop.permute.xlu1 %1069 }
 0x135   : > { %v1137_v15 = vpop.permute.xlu0 %1136  ;;  %v1135_v53 = vpop.permute.xlu1 %1134 }
 0x139   : > { %v1076_v56 = vpop.permute.xlu0 %1075  ;;  %v1074_v1 = vpop.permute.xlu1 %1073 }
 0x13d   : > { %v1141_v16 = vpop.permute.xlu0 %1140  ;;  %v1139_v20 = vpop.permute.xlu1 %1138 }
 0x15a   : > { %v963_v55 = vpop.permute.xlu0 %962 }
 0x15b   : > { %1009 = vst.msk [vmem:[#allocation3 + $0x31] sm:$0xff] %vm1006_vm9, %v963_v55 }
 0x15c   : > { %1106 = vst.msk [vmem:[#allocation3 + $0x31] sm:$0xff] %vm1103_vm10, %v1060_v45 }
 0x15d   : > { %1171 = vst.msk [vmem:[#allocation3 + $0x31] sm:$0xff] %vm1168_vm11, %v1125_v19  ;;  %v961_v24 = vpop.permute.xlu1 %960 }
 0x15e   : > { %1008 = vst.msk [vmem:[#allocation3 + $0x21] sm:$0xff] %vm1006_vm9, %v961_v24  ;;  %v979_v54 = vpop.permute.xlu0 %978 }
 0x15f   : > { %1105 = vst.msk [vmem:[#allocation3 + $0x21] sm:$0xff] %vm1103_vm10, %v1058_v28 }
 0x160   : > { %1017 = vst.msk [vmem:[#allocation3 + $0xb1] sm:$0xff] %vm1006_vm9, %v979_v54 }
 0x161   : > { %1170 = vst.msk [vmem:[#allocation3 + $0x21] sm:$0xff] %vm1168_vm11, %v1123_v33  ;;  %v977_v0 = vpop.permute.xlu1 %976 }
 0x162   : > { %1114 = vst.msk [vmem:[#allocation3 + $0xb1] sm:$0xff] %vm1103_vm10, %v1076_v56  ;;  %v959_v59 = vpop.permute.xlu0 %958 }
 0x163   : > { %1179 = vst.msk [vmem:[#allocation3 + $0xb1] sm:$0xff] %vm1168_vm11, %v1141_v16 }
 0x164   : > { %1016 = vst.msk [vmem:[#allocation3 + $0xa1] sm:$0xff] %vm1006_vm9, %v977_v0  ;;  %1007 = vst.msk [vmem:[#allocation3 + $0x11] sm:$0xff] %vm1006_vm9, %v959_v59  ;;  %v6981_v23 = vld [vmem:[#allocation3 + $0x30] sm:$0xff] }
 0x165   : > { %1113 = vst.msk [vmem:[#allocation3 + $0xa1] sm:$0xff] %vm1103_vm10, %v1074_v1  ;;  %1104 = vst.msk [vmem:[#allocation3 + $0x11] sm:$0xff] %vm1103_vm10, %v1056_v13  ;;  %v965_v57 = vpop.permute.xlu1 %964  ;;  %1457 = vrot.lane.b32.xlu0 %v6981_v23, %s6302_s27  ;;  %v7022_v10 = vld [vmem:[#allocation3 + $0x31] sm:$0xff] }
 0x166   : > { %1178 = vst.msk [vmem:[#allocation3 + $0xa1] sm:$0xff] %vm1168_vm11, %v1139_v20  ;;  %1169 = vst.msk [vmem:[#allocation3 + $0x11] sm:$0xff] %vm1168_vm11, %v1121_v14  ;;  %v975_v29 = vpop.permute.xlu0 %974  ;;  %v921_v20 = vld [vmem:[#allocation2 + $0x92] sm:$0xff] }
 0x167   : > { %1010 = vst.msk [vmem:[#allocation3 + $0x41] sm:$0xff] %vm1006_vm9, %v965_v57  ;;  %1015 = vst.msk [vmem:[#allocation3 + $0x91] sm:$0xff] %vm1006_vm9, %v975_v29  ;;  %v933_v55 = vmul.f32 %v6494_v3, %v921_v20  ;;  %v1038_v3 = vld [vmem:[%s6366_s12 + $0x78] sm:$0xff] }
 0x168   : > { %1107 = vst.msk [vmem:[#allocation3 + $0x41] sm:$0xff] %vm1103_vm10, %v1062_v47  ;;  %v6989_v30 = vld [vmem:[#allocation3 + $0x20] sm:$0xff]  ;;  %1112 = vst.msk [vmem:[#allocation3 + $0x91] sm:$0xff] %vm1103_vm10, %v1072_v39 }
 0x169   : > { %1172 = vst.msk [vmem:[#allocation3 + $0x41] sm:$0xff] %vm1168_vm11, %v1127_v26  ;;  %1455 = vrot.lane.b32.xlu1 %v6989_v30, %s6302_s27  ;;  %1177 = vst.msk [vmem:[#allocation3 + $0x91] sm:$0xff] %vm1168_vm11, %v1137_v15  ;;  %v973_v8 = vpop.permute.xlu1 %972  ;;  %v7010_v32 = vld [vmem:[#allocation3 + $0x21] sm:$0xff]  ;;  %v941_v24 = vadd.f32 %v933_v55, %v6940_v12 }
 0x16a   : > { %1014 = vst.msk [vmem:[#allocation3 + $0x81] sm:$0xff] %vm1006_vm9, %v973_v8  ;;  %v971_v60 = vpop.permute.xlu0 %970  ;;  %v7084_v28 = vld [vmem:[#allocation3 + $0xb0] sm:$0xff]  ;;  %v7126_v39 = vld [vmem:[%s8582_s5 + $0x20] sm:$0xff] }
 0x16b   : > { %1111 = vst.msk [vmem:[#allocation3 + $0x81] sm:$0xff] %vm1103_vm10, %v1070_v36  ;;  %v7104_v26 = vld [vmem:[#allocation3 + $0xb1] sm:$0xff]  ;;  %v7331_v20 = vld [vmem:[#allocation3 + $0x22] sm:$0xff] }
 0x16c   : > { %1013 = vst.msk [vmem:[#allocation3 + $0x71] sm:$0xff] %vm1006_vm9, %v971_v60  ;;  %v7336_v55 = vld [vmem:[%s8582_s5 + $0x40] sm:$0xff] }
 0x16d   : > { %1176 = vst.msk [vmem:[#allocation3 + $0x81] sm:$0xff] %vm1168_vm11, %v1135_v53  ;;  %v7001_v11 = vld [vmem:[#allocation3 + $0x11] sm:$0xff]  ;;  %v981_v35 = vpop.permute.xlu1 %980  ;;  %v7046_v27 = vld [vmem:[#allocation3 + $0xa0] sm:$0xff] }
 0x16e   : > { %1110 = vst.msk [vmem:[#allocation3 + $0x71] sm:$0xff] %vm1103_vm10, %v1068_v22  ;;  %v7003_v21 = vld [vmem:[#allocation3 + $0x10] sm:$0xff]  ;;  %5764 = vmatmul.mubr.msk.f32.vlgmr.msra.gmra.mxu1 %vm1241_vm8, %v7001_v11  ;;  %v967_v9 = vpop.permute.xlu0 %966 }
 0x16f   : > { %1175 = vst.msk [vmem:[#allocation3 + $0x71] sm:$0xff] %vm1168_vm11, %v1133_v17  ;;  %1453 = vrot.lane.b32.xlu0 %v7003_v21, %s6302_s27  ;;  %5766 = vmatprep.mubr.msk.f32.mxu1 %vm1241_vm8, %v7010_v32  ;;  %v7116_v17 = vld [vmem:[%s8582_s5 + $0x28] sm:$0xff] }
 0x170   : > { %1018 = vst.msk [vmem:[#allocation3 + $0xc1] sm:$0xff] %vm1006_vm9, %v981_v35  ;;  %1011 = vst.msk [vmem:[#allocation3 + $0x51] sm:$0xff] %vm1006_vm9, %v967_v9  ;;  %v7016_v18 = vld [vmem:[#allocation3 + $0x40] sm:$0xff]  ;;  %v7070_v13 = vld [vmem:[#allocation3 + $0x90] sm:$0xff]  ;;  %5815 = vmatprep.subr.mxu1 %v7116_v17 }
 0x171   : > { %1108 = vst.msk [vmem:[#allocation3 + $0x51] sm:$0xff] %vm1103_vm10, %v6944_v48  ;;  %1459 = vrot.lane.b32.xlu1 %v7016_v18, %s6302_s27  ;;  %v969_v46 = vpop.permute.xlu1 %968  ;;  %v7028_v37 = vld [vmem:[#allocation3 + $0x41] sm:$0xff]  ;;  %v7082_v45 = vld [vmem:[#allocation3 + $0x91] sm:$0xff]  ;;  %5816 = vmatpush3.msra.mxu1 %v7116_v17 }
 0x172   : > { %1173 = vst.msk [vmem:[#allocation3 + $0x51] sm:$0xff] %vm1168_vm11, %v6946_v4  ;;  %5767 = vmatmul.mubr.msk.f32.gmra.mxu1 %vm1241_vm8, %v7022_v10  ;;  %v1080_v49 = vpop.permute.xlu0 %1079  ;;  %v7093_v48 = vld [vmem:[#allocation3 + $0xa1] sm:$0xff]  ;;  %5817 = vmatprep.subr.mxu1 %v7126_v39 }
 0x173   : > { %1012 = vst.msk [vmem:[#allocation3 + $0x61] sm:$0xff] %vm1006_vm9, %v969_v46  ;;  %5769 = vmatprep.mubr.msk.f32.mxu1 %vm1241_vm8, %v7028_v37  ;;  %5818 = vmatpush3.msra.mxu1 %v7126_v39 }
 0x174   : > { %1109 = vst.msk [vmem:[#allocation3 + $0x61] sm:$0xff] %vm1103_vm10, %v6948_v51  ;;  %v7035_v42 = vld [vmem:[#allocation3 + $0x80] sm:$0xff]  ;;  %5871 = vmatprep.subr.mxu1 %v6956_v31 }
 0x175   : > { %1174 = vst.msk [vmem:[#allocation3 + $0x61] sm:$0xff] %vm1168_vm11, %v6950_v52  ;;  %1467 = vrot.lane.b32.xlu1 %v7035_v42, %s6302_s27  ;;  %v1078_v61 = vpop.permute.xlu1 %1077  ;;  %v7076_v6 = vld [vmem:[#allocation3 + $0x81] sm:$0xff] }
 0x176   : > { %v7041_v43 = vld [vmem:[#allocation3 + $0x70] sm:$0xff]  ;;  %1115 = vst.msk [vmem:[#allocation3 + $0xc1] sm:$0xff] %vm1103_vm10, %v1078_v61  ;;  %v1145_v50 = vpop.permute.xlu0 %1144 }
 0x177   : > { %1465 = vrot.lane.b32.xlu0 %v7041_v43, %s6302_s27  ;;  %v7068_v25 = vld [vmem:[#allocation3 + $0x71] sm:$0xff] }
 0x179   : > { %1471 = vrot.lane.b32.xlu1 %v7046_v27, %s6302_s27  ;;  %v7050_v41 = vld [vmem:[#allocation3 + $0x51] sm:$0xff]  ;;  %v1143_v62 = vpop.permute.xlu1 %1142 }
 0x17a   : > { %v7052_v38 = vld [vmem:[#allocation3 + $0x50] sm:$0xff]  ;;  %5770 = vmatmul.mubr.msk.f32.gmra.mxu1 %vm1241_vm8, %v7050_v41  ;;  %1180 = vst.msk [vmem:[#allocation3 + $0xc1] sm:$0xff] %vm1168_vm11, %v1143_v62  ;;  %v987_v2 = vpop.permute.xlu0 %986 }
 0x17b   : > { %1461 = vrot.lane.b32.xlu0 %v7052_v38, %s6302_s27  ;;  %1021 = vst.msk [vmem:[#allocation3 + $0xf1] sm:$0xff] %vm1006_vm9, %v987_v2 }
 0x17c   : > { %v7060_v63 = vld [vmem:[#allocation3 + $0x60] sm:$0xff] }
 0x17d   : > { %v7062_v44 = vld [vmem:[#allocation3 + $0x61] sm:$0xff]  ;;  %1463 = vrot.lane.b32.xlu1 %v7060_v63, %s6302_s27  ;;  %v1082_v40 = vpop.permute.xlu1 %1081 }
 0x17e   : > { %5772 = vmatprep.mubr.msk.f32.mxu1 %vm1241_vm8, %v7062_v44  ;;  %v983_v14 = vpop.permute.xlu0 %982 }
 0x17f   : > { %5773 = vmatmul.mubr.msk.f32.gmra.mxu1 %vm1241_vm8, %v7068_v25  ;;  %1469 = vrot.lane.b32.xlu0 %v7070_v13, %s6302_s27  ;;  %1019 = vst.msk [vmem:[#allocation3 + $0xd1] sm:$0xff] %vm1006_vm9, %v983_v14 }
 0x180   : > { %5775 = vmatprep.mubr.msk.f32.mxu1 %vm1241_vm8, %v7076_v6  ;;  %1116 = vst.msk [vmem:[#allocation3 + $0xd1] sm:$0xff] %vm1103_vm10, %v1080_v49 }
 0x181   : > { %1181 = vst.msk [vmem:[#allocation3 + $0xd1] sm:$0xff] %vm1168_vm11, %v1145_v50  ;;  %v985_v19 = vpop.permute.xlu1 %984  ;;  %v7087_v33 = vld [vmem:[#allocation3 + $0xc0] sm:$0xff] }
 0x182   : > { %1020 = vst.msk [vmem:[#allocation3 + $0xe1] sm:$0xff] %vm1006_vm9, %v985_v19  ;;  %1475 = vrot.lane.b32.xlu1 %v7087_v33, %s6302_s27  ;;  %v1084_v47 = vpop.permute.xlu0 %1083  ;;  %v7102_v4 = vld [vmem:[#allocation3 + $0xc1] sm:$0xff] }
 0x183   : > { %5776 = vmatmul.mubr.msk.f32.gmra.mxu1 %vm1241_vm8, %v7082_v45  ;;  %1473 = vrot.lane.b32.xlu0 %v7084_v28, %s6302_s27  ;;  %1117 = vst.msk [vmem:[#allocation3 + $0xe1] sm:$0xff] %vm1103_vm10, %v1082_v40  ;;  %1118 = vst.msk [vmem:[#allocation3 + $0xf1] sm:$0xff] %vm1103_vm10, %v1084_v47 }
 0x184   : > { %5778 = vmatprep.mubr.msk.f32.mxu1 %vm1241_vm8, %v7093_v48 }
 0x185   : > { %v1147_v22 = vpop.permute.xlu1 %1146 }
 0x186   : > { %1182 = vst.msk [vmem:[#allocation3 + $0xe1] sm:$0xff] %vm1168_vm11, %v1147_v22  ;;  %1660 = vrot.lane.b32.xlu1 %v6906_v34, %s6302_s27  ;;  %v1149_v51 = vpop.permute.xlu0 %1148 }
 0x187   : > { %5779 = vmatmul.mubr.msk.f32.gmra.mxu1 %vm1241_vm8, %v7104_v26  ;;  %1183 = vst.msk [vmem:[#allocation3 + $0xf1] sm:$0xff] %vm1168_vm11, %v1149_v51 }
 0x188   : > { %5781 = vmatprep.mubr.msk.f32.mxu1 %vm1241_vm8, %v7102_v4  ;;  %v7120_v52 = vld [vmem:[#allocation3 + $0xd1] sm:$0xff] }
 0x189   : > { %v1452_v36 = vpop.permute.xlu1 %1451  ;;  %v7154_v16 = vld [vmem:[#allocation3 + $0xd0] sm:$0xff] }
 0x18a   : > { %1664 = vrot.lane.b32.xlu1 %v7010_v32, %s6302_s27  ;;  %5791 = vmatprep.mubr.msk.f32.mxu0 %vm1241_vm8, %v1452_v36 }
 0x18b   : > { %5782 = vmatmul.mubr.msk.f32.gmra.mxu1 %vm1241_vm8, %v7120_v52 }
 0x18d   : > { %v7136_v15 = vld [vmem:[#allocation3 + $0xe0] sm:$0xff] }
 0x18e   : > { %v7138_v53 = vld [vmem:[#allocation3 + $0xe1] sm:$0xff]  ;;  %1479 = vrot.lane.b32.xlu1 %v7136_v15, %s6302_s27  ;;  %v7144_v56 = vld [vmem:[#allocation3 + $0xf1] sm:$0xff] }
 0x18f   : > { %5784 = vmatprep.mubr.msk.f32.mxu1 %vm1241_vm8, %v7138_v53  ;;  %v7146_v1 = vld [vmem:[#allocation3 + $0xf0] sm:$0xff] }
 0x190   : > { %5785 = vmatmul.mubr.msk.f32.gmra.mxu1 %vm1241_vm8, %v7144_v56  ;;  %1481 = vrot.lane.b32.xlu0 %v7146_v1, %s6302_s27 }
 0x192   : > { %1668 = vrot.lane.b32.xlu1 %v7028_v37, %s6302_s27 }
 0x194   : > { %1477 = vrot.lane.b32.xlu0 %v7154_v16, %s6302_s27 }
 0x196   : > { %1676 = vrot.lane.b32.xlu1 %v7076_v6, %s6302_s27 }
 0x198   : > { %1662 = vrot.lane.b32.xlu0 %v7001_v11, %s6302_s27 }
 0x19a   : > { %1672 = vrot.lane.b32.xlu1 %v7062_v44, %s6302_s27 }
 0x19c   : > { %1666 = vrot.lane.b32.xlu0 %v7022_v10, %s6302_s27 }
 0x19e   : > { %1680 = vrot.lane.b32.xlu1 %v7093_v48, %s6302_s27 }
 0x1a0   : > { %1674 = vrot.lane.b32.xlu0 %v7068_v25, %s6302_s27 }
 0x1a2   : > { %1684 = vrot.lane.b32.xlu1 %v7102_v4, %s6302_s27 }
 0x1a4   : > { %1670 = vrot.lane.b32.xlu0 %v7050_v41, %s6302_s27 }
 0x1a6   : > { %988 = vrot.lane.b32.xlu1 %v941_v24, %s6300_s14  ;;  %v7349_v24 = vld [vmem:[#allocation3 + $0x32] sm:$0xff] }
 0x1a8   : > { %1678 = vrot.lane.b32.xlu0 %v7082_v45, %s6302_s27 }
 0x1aa   : > { %1688 = vrot.lane.b32.xlu1 %v7138_v53, %s6302_s27 }
 0x1ac   : > { %1682 = vrot.lane.b32.xlu0 %v7104_v26, %s6302_s27 }
 0x1ae   : > { %1690 = vrot.lane.b32.xlu1 %v7144_v56, %s6302_s27 }
 0x1b0   : > { %1085 = vrot.lane.b32.xlu0 %v1038_v3, %s6299_s13 }
 0x1b2   : > { %2652 = vrot.lane.b32.xlu1 %v6989_v30, %s6302_s27 }
 0x1b4   : > { %1686 = vrot.lane.b32.xlu0 %v7120_v52, %s6302_s27 }
 0x1b6   : > { %2656 = vrot.lane.b32.xlu1 %v7016_v18, %s6302_s27 }
 0x1b8   : > { %1150 = vrot.lane.b32.xlu0 %v1038_v3, %s6300_s14 }
 0x1ba   : > { %2660 = vrot.lane.b32.xlu1 %v7060_v63, %s6302_s27 }
 0x1bc   : > { %2650 = vrot.lane.b32.xlu0 %v7003_v21, %s6302_s27 }
 0x1be   : > { %2664 = vrot.lane.b32.xlu1 %v7035_v42, %s6302_s27 }
 0x1c0   : > { %2654 = vrot.lane.b32.xlu0 %v6981_v23, %s6302_s27 }
 0x1c2   : > { %2668 = vrot.lane.b32.xlu1 %v7046_v27, %s6302_s27 }
 0x1c4   : > { %2658 = vrot.lane.b32.xlu0 %v7052_v38, %s6302_s27 }
 0x1c6   : > { %2672 = vrot.lane.b32.xlu1 %v7087_v33, %s6302_s27 }
 0x1c8   : > { %2662 = vrot.lane.b32.xlu0 %v7041_v43, %s6302_s27 }
 0x1ca   : > { %2676 = vrot.lane.b32.xlu1 %v7136_v15, %s6302_s27 }
 0x1cc   : > { %2666 = vrot.lane.b32.xlu0 %v7070_v13, %s6302_s27 }
 0x1d0   : > { %2670 = vrot.lane.b32.xlu0 %v7084_v28, %s6302_s27 }
 0x1d4   : > { %2674 = vrot.lane.b32.xlu0 %v7154_v16, %s6302_s27 }
 0x1d7   : > { %v1458_v12 = vpop.permute.xlu0 %1457 }
 0x1d8   : > { %2678 = vrot.lane.b32.xlu0 %v7146_v1, %s6302_s27 }
 0x1db   : > { %v1456_v54 = vpop.permute.xlu1 %1455 }
 0x1dc   : > { %2859 = vrot.lane.b32.xlu0 %v7001_v11, %s6302_s27 }
 0x1e0   : > { %2863 = vrot.lane.b32.xlu0 %v7022_v10, %s6302_s27 }
 0x1e1   : > { %v1454_v0 = vpop.permute.xlu0 %1453 }
 0x1e2   : > { %5792 = vmatmul.mubr.msk.f32.vlgmr.msra.gmra.mxu0 %vm1241_vm8, %v1454_v0  ;;  %v7376_v0 = vld [vmem:[%s8582_s5 + $0x58] sm:$0xff] }
 0x1e3   : > { %5794 = vmatprep.mubr.msk.f32.mxu0 %vm1241_vm8, %v1456_v54  ;;  %5844 = vmatpush3.msra.mxu0 %v6611_v7  ;;  %v1460_v59 = vpop.permute.xlu1 %1459  ;;  %v7365_v54 = vld [vmem:[#allocation3 + $0x52] sm:$0xff] }
 0x1e4   : > { %5845 = vmatprep.subr.mxu0 %v6627_v5  ;;  %2867 = vrot.lane.b32.xlu0 %v7050_v41, %s6302_s27 }
 0x1e5   : > { %5846 = vmatpush3.msra.mxu0 %v6627_v5 }
 0x1e6   : > { %5795 = vmatmul.mubr.msk.f32.gmra.mxu0 %vm1241_vm8, %v1458_v12  ;;  %5899 = vmatprep.subr.mxu0 %v7116_v17  ;;  %v7359_v12 = vld [vmem:[#allocation3 + $0x42] sm:$0xff] }
 0x1e7   : > { %5797 = vmatprep.mubr.msk.f32.mxu0 %vm1241_vm8, %v1460_v59  ;;  %v1468_v23 = vpop.permute.xlu1 %1467  ;;  %v7382_v59 = vld [vmem:[#allocation3 + $0x62] sm:$0xff] }
 0x1e8   : > { %2871 = vrot.lane.b32.xlu0 %v7068_v25, %s6302_s27 }
 0x1e9   : > { %v1466_v57 = vpop.permute.xlu0 %1465 }
 0x1eb   : > { %v1472_v7 = vpop.permute.xlu1 %1471 }
 0x1ec   : > { %2875 = vrot.lane.b32.xlu0 %v7082_v45, %s6302_s27 }
 0x1ed   : > { %v1462_v29 = vpop.permute.xlu0 %1461 }
 0x1ee   : > { %5798 = vmatmul.mubr.msk.f32.gmra.mxu0 %vm1241_vm8, %v1462_v29  ;;  %v7406_v29 = vld [vmem:[#allocation3 + $0x92] sm:$0xff] }
 0x1ef   : > { %v1464_v8 = vpop.permute.xlu1 %1463 }
 0x1f0   : > { %5800 = vmatprep.mubr.msk.f32.mxu0 %vm1241_vm8, %v1464_v8  ;;  %2879 = vrot.lane.b32.xlu0 %v7104_v26, %s6302_s27  ;;  %v7416_v8 = vld [vmem:[#allocation3 + $0xa2] sm:$0xff] }
 0x1f1   : > { %v1470_v5 = vpop.permute.xlu0 %1469 }
 0x1f2   : > { %5801 = vmatmul.mubr.msk.f32.gmra.mxu0 %vm1241_vm8, %v1466_v57 }
 0x1f3   : > { %5803 = vmatprep.mubr.msk.f32.mxu0 %vm1241_vm8, %v1468_v23  ;;  %v7388_v23 = vld [vmem:[#allocation3 + $0x72] sm:$0xff] }
 0x1f4   : > { %2883 = vrot.lane.b32.xlu0 %v7120_v52, %s6302_s27  ;;  %v1476_v60 = vpop.permute.xlu1 %1475 }
 0x1f5   : > { %v1474_v21 = vpop.permute.xlu0 %1473 }
 0x1f6   : > { %5804 = vmatmul.mubr.msk.f32.gmra.mxu0 %vm1241_vm8, %v1470_v5 }
 0x1f7   : > { %5806 = vmatprep.mubr.msk.f32.mxu0 %vm1241_vm8, %v1472_v7  ;;  %v7400_v7 = vld [vmem:[#allocation3 + $0x82] sm:$0xff] }
 0x1f8   : > { %2887 = vrot.lane.b32.xlu0 %v7144_v56, %s6302_s27  ;;  %v1661_v35 = vpop.permute.xlu1 %1660 }
 0x1f9   : > { %5819 = vmatprep.mubr.msk.f32.mxu1 %vm1241_vm8, %v1661_v35 }
 0x1fa   : > { %5807 = vmatmul.mubr.msk.f32.gmra.mxu0 %vm1241_vm8, %v1474_v21  ;;  %v7422_v21 = vld [vmem:[#allocation3 + $0xb2] sm:$0xff] }
 0x1fb   : > { %5809 = vmatprep.mubr.msk.f32.mxu0 %vm1241_vm8, %v1476_v60 }
 0x1fc   : > { %3882 = vrot.lane.b32.xlu0 %v6989_v30, %s6302_s27  ;;  %v1665_v9 = vpop.permute.xlu1 %1664 }
 0x200   : > { %3886 = vrot.lane.b32.xlu0 %v7016_v18, %s6302_s27  ;;  %v1480_v46 = vpop.permute.xlu1 %1479 }
 0x202   : > { %v1482_v49 = vpop.permute.xlu0 %1481 }
 0x204   : > { %3890 = vrot.lane.b32.xlu0 %v7060_v63, %s6302_s27  ;;  %v1669_v61 = vpop.permute.xlu1 %1668  ;;  %v7290_v63 = vld [vmem:[%s8582_s5 + $0x38] sm:$0xff] }
 0x206   : > { %v1478_v50 = vpop.permute.xlu0 %1477 }
 0x207   : > { %5810 = vmatmul.mubr.msk.f32.gmra.mxu0 %vm1241_vm8, %v1478_v50  ;;  %v7454_v50 = vld [vmem:[#allocation3 + $0xf2] sm:$0xff] }
 0x208   : > { %3894 = vrot.lane.b32.xlu0 %v7035_v42, %s6302_s27  ;;  %5812 = vmatprep.mubr.msk.f32.mxu0 %vm1241_vm8, %v1480_v46  ;;  %v1677_v62 = vpop.permute.xlu1 %1676  ;;  %v7279_v42 = vld [vmem:[%s8582_s5 + $0x48] sm:$0xff] }
 0x20a   : > { %v1663_v30 = vpop.permute.xlu0 %1662 }
 0x20b   : > { %5813 = vmatmul.mubr.msk.f32.gmra.mxu0 %vm1241_vm8, %v1482_v49  ;;  %5820 = vmatmul.mubr.msk.f32.vlgmr.msra.gmra.mxu1 %vm1241_vm8, %v1663_v30 }
 0x20c   : > { %3898 = vrot.lane.b32.xlu0 %v7046_v27, %s6302_s27  ;;  %5822 = vmatprep.mubr.msk.f32.mxu1 %vm1241_vm8, %v1665_v9  ;;  %v1673_v18 = vpop.permute.xlu1 %1672 }
 0x20d   : > { %5847 = vmatprep.mubr.msk.f32.mxu0 %vm1241_vm8, %v1661_v35  ;;  %5872 = vmatpush3.msra.mxu1 %v6956_v31  ;;  %v7432_v35 = vld [vmem:[#allocation3 + $0xc2] sm:$0xff] }
 0x20e   : > { %v1667_v2 = vpop.permute.xlu0 %1666  ;;  %5873 = vmatprep.subr.mxu1 %v6961_v58 }
 0x20f   : > { %5823 = vmatmul.mubr.msk.f32.gmra.mxu1 %vm1241_vm8, %v1667_v2  ;;  %5848 = vmatmul.mubr.msk.f32.vlgmr.msra.gmra.mxu0 %vm1241_vm8, %v1663_v30 }
 0x210   : > { %3902 = vrot.lane.b32.xlu0 %v7087_v33, %s6302_s27  ;;  %5825 = vmatprep.mubr.msk.f32.mxu1 %vm1241_vm8, %v1669_v61  ;;  %v1681_v27 = vpop.permute.xlu1 %1680 }
 0x211   : > { %5850 = vmatprep.mubr.msk.f32.mxu0 %vm1241_vm8, %v1665_v9  ;;  %5900 = vmatpush3.msra.mxu0 %v7116_v17  ;;  %v1217_v17 = vld [vmem:[#allocation3 + $0x2] sm:$0xff]  ;;  %v7438_v9 = vld [vmem:[#allocation3 + $0xd2] sm:$0xff] }
 0x212   : > { %v1675_v31 = vpop.permute.xlu0 %1674  ;;  %5901 = vmatprep.subr.mxu0 %v7126_v39  ;;  %5874 = vmatpush3.msra.mxu1 %v6961_v58 }
 0x213   : > { %5851 = vmatmul.mubr.msk.f32.gmra.mxu0 %vm1241_vm8, %v1667_v2  ;;  %5927 = vmatprep.subr.mxu1 %v7279_v42 }
 0x214   : > { %3906 = vrot.lane.b32.xlu0 %v7136_v15, %s6302_s27  ;;  %5853 = vmatprep.mubr.msk.f32.mxu0 %vm1241_vm8, %v1669_v61  ;;  %v1685_v40 = vpop.permute.xlu1 %1684  ;;  %v7325_v15 = vld [vmem:[#allocation3 + $0x12] sm:$0xff]  ;;  %v7448_v61 = vld [vmem:[#allocation3 + $0xe2] sm:$0xff] }
 0x215   : > { %5902 = vmatpush3.msra.mxu0 %v7126_v39 }
 0x216   : > { %v1671_v14 = vpop.permute.xlu0 %1670  ;;  %5955 = vmatprep.subr.mxu0 %v7290_v63 }
 0x217   : > { %5826 = vmatmul.mubr.msk.f32.gmra.mxu1 %vm1241_vm8, %v1671_v14  ;;  %5854 = vmatmul.mubr.msk.f32.gmra.mxu0 %vm1241_vm8, %v1671_v14 }
 0x218   : > { %5828 = vmatprep.mubr.msk.f32.mxu1 %vm1241_vm8, %v1673_v18  ;;  %5856 = vmatprep.mubr.msk.f32.mxu0 %vm1241_vm8, %v1673_v18  ;;  %v989_v58 = vpop.permute.xlu1 %988 }
 0x219   : > { %1022 = vst.msk [vmem:[#allocation3 + $0x101] sm:$0xff] %vm1006_vm9, %v989_v58 }
 0x21a   : > { %v1679_v19 = vpop.permute.xlu0 %1678 }
 0x21b   : > { %5829 = vmatmul.mubr.msk.f32.gmra.mxu1 %vm1241_vm8, %v1675_v31  ;;  %5857 = vmatmul.mubr.msk.f32.gmra.mxu0 %vm1241_vm8, %v1675_v31 }
 0x21c   : > { %5831 = vmatprep.mubr.msk.f32.mxu1 %vm1241_vm8, %v1677_v62  ;;  %5859 = vmatprep.mubr.msk.f32.mxu0 %vm1241_vm8, %v1677_v62  ;;  %v1689_v22 = vpop.permute.xlu1 %1688 }
 0x21e   : > { %v1683_v33 = vpop.permute.xlu0 %1682 }
 0x21f   : > { %5832 = vmatmul.mubr.msk.f32.gmra.mxu1 %vm1241_vm8, %v1679_v19  ;;  %5860 = vmatmul.mubr.msk.f32.gmra.mxu0 %vm1241_vm8, %v1679_v19 }
 0x220   : > { %5834 = vmatprep.mubr.msk.f32.mxu1 %vm1241_vm8, %v1681_v27  ;;  %5862 = vmatprep.mubr.msk.f32.mxu0 %vm1241_vm8, %v1681_v27  ;;  %v1691_v39 = vpop.permute.xlu1 %1690  ;;  %v7487_v27 = vld [vmem:[%s8582_s5 + $0x50] sm:$0xff] }
 0x222   : > { %v1086_v47 = vpop.permute.xlu0 %1085 }
 0x223   : > { %1119 = vst.msk [vmem:[#allocation3 + $0x101] sm:$0xff] %vm1103_vm10, %v1086_v47  ;;  %5835 = vmatmul.mubr.msk.f32.gmra.mxu1 %vm1241_vm8, %v1683_v33  ;;  %5863 = vmatmul.mubr.msk.f32.gmra.mxu0 %vm1241_vm8, %v1683_v33  ;;  %v3631_v33 = vld [vmem:[#allocation3 + $0x110] sm:$0xff] }
 0x224   : > { %5837 = vmatprep.mubr.msk.f32.mxu1 %vm1241_vm8, %v1685_v40  ;;  %5865 = vmatprep.mubr.msk.f32.mxu0 %vm1241_vm8, %v1685_v40  ;;  %v2653_v60 = vpop.permute.xlu1 %2652 }
 0x226   : > { %v1687_v51 = vpop.permute.xlu0 %1686 }
 0x227   : > { %5838 = vmatmul.mubr.msk.f32.gmra.mxu1 %vm1241_vm8, %v1687_v51  ;;  %5866 = vmatmul.mubr.msk.f32.gmra.mxu0 %vm1241_vm8, %v1687_v51 }
 0x228   : > { %5840 = vmatprep.mubr.msk.f32.mxu1 %vm1241_vm8, %v1689_v22  ;;  %5868 = vmatprep.mubr.msk.f32.mxu0 %vm1241_vm8, %v1689_v22  ;;  %v2657_v49 = vpop.permute.xlu1 %2656 }
 0x22a   : > { %v1151_v36 = vpop.permute.xlu0 %1150 }
 0x22b   : > { %1184 = vst.msk [vmem:[#allocation3 + $0x101] sm:$0xff] %vm1168_vm11, %v1151_v36  ;;  %5841 = vmatmul.mubr.msk.f32.gmra.mxu1 %vm1241_vm8, %v1691_v39  ;;  %5869 = vmatmul.mubr.msk.f32.gmra.mxu0 %vm1241_vm8, %v1691_v39 }
 0x22c   : > { %5875 = vmatprep.mubr.msk.f32.mxu1 %vm1241_vm8, %v6906_v34  ;;  %5903 = vmatprep.mubr.msk.f32.mxu0 %vm1241_vm8, %v1217_v17  ;;  %v7341_v34 = vld [vmem:[%s8582_s5 + $0x30] sm:$0xff]  ;;  %v2661_v30 = vpop.permute.xlu1 %2660 }
 0x22e   : > { %v2651_v57 = vpop.permute.xlu0 %2650 }
 0x22f   : > { %5876 = vmatmul.mubr.msk.f32.vlgmr.msra.gmra.mxu1 %vm1241_vm8, %v7001_v11  ;;  %5904 = vmatmul.mubr.msk.f32.vlgmr.msra.gmra.mxu0 %vm1241_vm8, %v7325_v15 }
 0x230   : > { %5878 = vmatprep.mubr.msk.f32.mxu1 %vm1241_vm8, %v7010_v32  ;;  %5906 = vmatprep.mubr.msk.f32.mxu0 %vm1241_vm8, %v7331_v20  ;;  %v2665_v31 = vpop.permute.xlu1 %2664 }
 0x231   : > { %5928 = vmatpush3.msra.mxu1 %v7279_v42  ;;  %5956 = vmatpush3.msra.mxu0 %v7290_v63 }
 0x232   : > { %v3630_v3 = vld [vmem:[#allocation3 + $0x100] sm:$0xff]  ;;  %5929 = vmatprep.subr.mxu1 %v7336_v55  ;;  %5957 = vmatprep.subr.mxu0 %v7341_v34  ;;  %v2655_v5 = vpop.permute.xlu0 %2654 }
 0x233   : > { %5879 = vmatmul.mubr.msk.f32.gmra.mxu1 %vm1241_vm8, %v7022_v10  ;;  %5907 = vmatmul.mubr.msk.f32.gmra.mxu0 %vm1241_vm8, %v7349_v24  ;;  %v7481_v2 = vld [vmem:[#allocation3 + $0x101] sm:$0xff] }
 0x234   : > { %3910 = vrot.lane.b32.xlu0 %v3630_v3, %s6302_s27  ;;  %2680 = vrot.lane.b32.xlu1 %v3630_v3, %s6302_s27  ;;  %v2669_v14 = vpop.permute.xlu1 %2668 }
 0x235   : > { %5881 = vmatprep.mubr.msk.f32.mxu1 %vm1241_vm8, %v7028_v37  ;;  %5909 = vmatprep.mubr.msk.f32.mxu0 %vm1241_vm8, %v7359_v12 }
 0x236   : > { %5930 = vmatpush3.msra.mxu1 %v7336_v55  ;;  %5958 = vmatpush3.msra.mxu0 %v7341_v34  ;;  %v2659_v46 = vpop.permute.xlu0 %2658 }
 0x237   : > { %5882 = vmatmul.mubr.msk.f32.gmra.mxu1 %vm1241_vm8, %v7050_v41  ;;  %5910 = vmatmul.mubr.msk.f32.gmra.mxu0 %vm1241_vm8, %v7365_v54 }
 0x238   : > { %4091 = vrot.lane.b32.xlu0 %v7010_v32, %s6302_s27  ;;  %2861 = vrot.lane.b32.xlu1 %v7010_v32, %s6302_s27  ;;  %v2673_v19 = vpop.permute.xlu1 %2672 }
 0x239   : > { %5884 = vmatprep.mubr.msk.f32.mxu1 %vm1241_vm8, %v7062_v44  ;;  %5912 = vmatprep.mubr.msk.f32.mxu0 %vm1241_vm8, %v7382_v59 }
 0x23a   : > { %5983 = vmatprep.subr.mxu1 %v7376_v0  ;;  %6011 = vmatprep.subr.mxu0 %v7279_v42  ;;  %v2663_v62 = vpop.permute.xlu0 %2662 }
 0x23b   : > { %5885 = vmatmul.mubr.msk.f32.gmra.mxu1 %vm1241_vm8, %v7068_v25  ;;  %5913 = vmatmul.mubr.msk.f32.gmra.mxu0 %vm1241_vm8, %v7388_v23 }
 0x23c   : > { %4095 = vrot.lane.b32.xlu0 %v7028_v37, %s6302_s27  ;;  %2865 = vrot.lane.b32.xlu1 %v7028_v37, %s6302_s27 }
 0x23d   : > { %5887 = vmatprep.mubr.msk.f32.mxu1 %vm1241_vm8, %v7076_v6  ;;  %5915 = vmatprep.mubr.msk.f32.mxu0 %vm1241_vm8, %v7400_v7 }
 0x23e   : > { %v2667_v18 = vpop.permute.xlu0 %2666 }
 0x23f   : > { %5888 = vmatmul.mubr.msk.f32.gmra.mxu1 %vm1241_vm8, %v7082_v45  ;;  %5916 = vmatmul.mubr.msk.f32.gmra.mxu0 %vm1241_vm8, %v7406_v29 }
 0x240   : > { %4099 = vrot.lane.b32.xlu0 %v7062_v44, %s6302_s27  ;;  %2869 = vrot.lane.b32.xlu1 %v7062_v44, %s6302_s27 }
 0x241   : > { %5890 = vmatprep.mubr.msk.f32.mxu1 %vm1241_vm8, %v7093_v48  ;;  %5918 = vmatprep.mubr.msk.f32.mxu0 %vm1241_vm8, %v7416_v8 }
 0x242   : > { %v2671_v40 = vpop.permute.xlu0 %2670 }
 0x243   : > { %5891 = vmatmul.mubr.msk.f32.gmra.mxu1 %vm1241_vm8, %v7104_v26  ;;  %5919 = vmatmul.mubr.msk.f32.gmra.mxu0 %vm1241_vm8, %v7422_v21 }
 0x244   : > { %4103 = vrot.lane.b32.xlu0 %v7076_v6, %s6302_s27  ;;  %2873 = vrot.lane.b32.xlu1 %v7076_v6, %s6302_s27 }
 0x245   : > { %5893 = vmatprep.mubr.msk.f32.mxu1 %vm1241_vm8, %v7102_v4  ;;  %5921 = vmatprep.mubr.msk.f32.mxu0 %vm1241_vm8, %v7432_v35 }
 0x246   : > { %v2675_v58 = vpop.permute.xlu0 %2674 }
 0x247   : > { %5894 = vmatmul.mubr.msk.f32.gmra.mxu1 %vm1241_vm8, %v7120_v52  ;;  %5922 = vmatmul.mubr.msk.f32.gmra.mxu0 %vm1241_vm8, %v7438_v9 }
 0x248   : > { %4107 = vrot.lane.b32.xlu0 %v7093_v48, %s6302_s27  ;;  %2877 = vrot.lane.b32.xlu1 %v7093_v48, %s6302_s27 }
 0x249   : > { %5896 = vmatprep.mubr.msk.f32.mxu1 %vm1241_vm8, %v7138_v53  ;;  %5924 = vmatprep.mubr.msk.f32.mxu0 %vm1241_vm8, %v7448_v61 }
 0x24b   : > { %5897 = vmatmul.mubr.msk.f32.gmra.mxu1 %vm1241_vm8, %v7144_v56  ;;  %5925 = vmatmul.mubr.msk.f32.gmra.mxu0 %vm1241_vm8, %v7454_v50 }
 0x24c   : > { %4111 = vrot.lane.b32.xlu0 %v7102_v4, %s6302_s27  ;;  %2881 = vrot.lane.b32.xlu1 %v7102_v4, %s6302_s27 }
 0x24d   : > { %5931 = vmatprep.mubr.msk.f32.mxu1 %vm1241_vm8, %v7001_v11  ;;  %5959 = vmatprep.mubr.msk.f32.mxu0 %vm1241_vm8, %v2651_v57 }
 0x24f   : > { %5932 = vmatmul.mubr.msk.f32.vlgmr.msra.gmra.mxu1 %vm1241_vm8, %v7010_v32  ;;  %5960 = vmatmul.mubr.msk.f32.vlgmr.msra.gmra.mxu0 %vm1241_vm8, %v2653_v60 }
 0x250   : > { %4115 = vrot.lane.b32.xlu0 %v7138_v53, %s6302_s27  ;;  %2885 = vrot.lane.b32.xlu1 %v7138_v53, %s6302_s27 }
 0x251   : > { %5934 = vmatprep.mubr.msk.f32.mxu1 %vm1241_vm8, %v7022_v10  ;;  %5962 = vmatprep.mubr.msk.f32.mxu0 %vm1241_vm8, %v2655_v5 }
 0x252   : > { %5984 = vmatpush3.msra.mxu1 %v7376_v0  ;;  %6012 = vmatpush3.msra.mxu0 %v7279_v42  ;;  %v3617_v42 = vld [vmem:[#allocation3 + $0x30] sm:$0xff] }
 0x253   : > { %5935 = vmatmul.mubr.msk.f32.gmra.mxu1 %vm1241_vm8, %v7028_v37  ;;  %5963 = vmatmul.mubr.msk.f32.gmra.mxu0 %vm1241_vm8, %v2657_v49 }
 0x254   : > { %4119 = vrot.lane.b32.xlu0 %v7481_v2, %s6302_s27  ;;  %2889 = vrot.lane.b32.xlu1 %v7481_v2, %s6302_s27 }
 0x255   : > { %5937 = vmatprep.mubr.msk.f32.mxu1 %vm1241_vm8, %v7050_v41  ;;  %5965 = vmatprep.mubr.msk.f32.mxu0 %vm1241_vm8, %v2659_v46 }
 0x256   : > { %5985 = vmatprep.subr.mxu1 %v7487_v27  ;;  %6013 = vmatprep.subr.mxu0 %v7336_v55 }
 0x257   : > { %5938 = vmatmul.mubr.msk.f32.gmra.mxu1 %vm1241_vm8, %v7062_v44  ;;  %5966 = vmatmul.mubr.msk.f32.gmra.mxu0 %vm1241_vm8, %v2661_v30 }
 0x258   : > { %3884 = vrot.lane.b32.xlu1 %v3617_v42, %s6302_s27  ;;  %5940 = vmatprep.mubr.msk.f32.mxu1 %vm1241_vm8, %v7068_v25 }
 0x259   : > { %5968 = vmatprep.mubr.msk.f32.mxu0 %vm1241_vm8, %v2663_v62  ;;  %5986 = vmatpush3.msra.mxu1 %v7487_v27 }
 0x25a   : > { %6014 = vmatpush3.msra.mxu0 %v7336_v55  ;;  %6039 = vmatprep.subr.mxu1 %v7290_v63 }
 0x25b   : > { %5941 = vmatmul.mubr.msk.f32.gmra.mxu1 %vm1241_vm8, %v7076_v6  ;;  %5969 = vmatmul.mubr.msk.f32.gmra.mxu0 %vm1241_vm8, %v2665_v31 }
 0x25c   : > { %3888 = vrot.lane.b32.xlu1 %v7052_v38, %s6302_s27  ;;  %5943 = vmatprep.mubr.msk.f32.mxu1 %vm1241_vm8, %v7082_v45  ;;  %v2679_v38 = vpop.permute.xlu0 %2678 }
 0x25d   : > { %5971 = vmatprep.mubr.msk.f32.mxu0 %vm1241_vm8, %v2667_v18  ;;  %6067 = vmatprep.subr.mxu0 %v7376_v0 }
 0x25f   : > { %5944 = vmatmul.mubr.msk.f32.gmra.mxu1 %vm1241_vm8, %v7093_v48  ;;  %5972 = vmatmul.mubr.msk.f32.gmra.mxu0 %vm1241_vm8, %v2669_v14 }
 0x260   : > { %3892 = vrot.lane.b32.xlu1 %v7041_v43, %s6302_s27  ;;  %5946 = vmatprep.mubr.msk.f32.mxu1 %vm1241_vm8, %v7104_v26  ;;  %v2677_v43 = vpop.permute.xlu1 %2676 }
 0x261   : > { %5974 = vmatprep.mubr.msk.f32.mxu0 %vm1241_vm8, %v2671_v40  ;;  %v7612_v40 = vld [vmem:[%s8582_s5 + $0x78] sm:$0xff] }
 0x263   : > { %5947 = vmatmul.mubr.msk.f32.gmra.mxu1 %vm1241_vm8, %v7102_v4  ;;  %5975 = vmatmul.mubr.msk.f32.gmra.mxu0 %vm1241_vm8, %v2673_v19 }
 0x264   : > { %3896 = vrot.lane.b32.xlu1 %v7070_v13, %s6302_s27  ;;  %5949 = vmatprep.mubr.msk.f32.mxu1 %vm1241_vm8, %v7120_v52  ;;  %v2860_v13 = vpop.permute.xlu0 %2859 }
 0x265   : > { %5977 = vmatprep.mubr.msk.f32.mxu0 %vm1241_vm8, %v2675_v58 }
 0x267   : > { %5950 = vmatmul.mubr.msk.f32.gmra.mxu1 %vm1241_vm8, %v7138_v53  ;;  %5978 = vmatmul.mubr.msk.f32.gmra.mxu0 %vm1241_vm8, %v2677_v43 }
 0x268   : > { %3900 = vrot.lane.b32.xlu1 %v7084_v28, %s6302_s27  ;;  %5952 = vmatprep.mubr.msk.f32.mxu1 %vm1241_vm8, %v7144_v56  ;;  %v7561_v28 = vpop.f32.mrf.mxu1  ;;  %v2864_v17 = vpop.permute.xlu0 %2863 }
 0x269   : > { %5980 = vmatprep.mubr.msk.f32.mxu0 %vm1241_vm8, %v2679_v38 }
 0x26b   : > { %5953 = vmatmul.mubr.msk.f32.gmra.mxu1 %vm1241_vm8, %v7481_v2 }
 0x26c   : > { %3904 = vrot.lane.b32.xlu1 %v7154_v16, %s6302_s27  ;;  %5987 = vmatprep.mubr.msk.f32.mxu1 %vm1241_vm8, %v2860_v13  ;;  %v7567_v16 = vpop.f32.mrf.mxu1  ;;  %v2868_v3 = vpop.permute.xlu0 %2867 }
 0x26e   : > { %v7571_v47 = vpop.f32.mrf.mxu1 }
 0x270   : > { %3908 = vrot.lane.b32.xlu1 %v7146_v1, %s6302_s27  ;;  %v7565_v1 = vld [vmem:[#allocation3 + $0x111] sm:$0xff]  ;;  %v7573_v22 = vpop.f32.mrf.mxu1  ;;  %v2872_v62 = vpop.permute.xlu0 %2871 }
 0x271   : > { %8585 = vst [vmem:[#allocation4_spill] sm:$0xff] %v7573_v22  ;;  %v7985_v22 = vld [vmem:[#allocation3 + $0xd1] sm:$0xff] }
 0x272   : > { %v7575_v51 = vpop.f32.mrf.mxu1 }
 0x274   : > { %3912 = vrot.lane.b32.xlu1 %v3631_v33, %s6302_s27  ;;  %v7579_v36 = vpop.f32.mrf.mxu1  ;;  %v2876_v14 = vpop.permute.xlu0 %2875 }
 0x275   : > { %8586 = vst [vmem:[#allocation5_spill] sm:$0xff] %v7579_v36 }
 0x276   : > { %v7583_v57 = vpop.f32.mrf.mxu1 }
 0x278   : > { %4093 = vrot.lane.b32.xlu1 %v7022_v10, %s6302_s27  ;;  %v7589_v46 = vpop.f32.mrf.mxu1 }
 0x279   : > { %8588 = vst [vmem:[#allocation7_spill] sm:$0xff] %v7589_v46 }
 0x27a   : > { %v7603_v42 = vpop.f32.mrf.mxu1 }
 0x27c   : > { %4097 = vrot.lane.b32.xlu1 %v7050_v41, %s6302_s27  ;;  %v7627_v38 = vpop.f32.mrf.mxu1 }
 0x27d   : > { %8591 = vst [vmem:[#allocation10_spill] sm:$0xff] %v7627_v38 }
 0x280   : > { %4101 = vrot.lane.b32.xlu1 %v7068_v25, %s6302_s27 }
 0x284   : > { %4105 = vrot.lane.b32.xlu1 %v7082_v45, %s6302_s27 }
 0x288   : > { %4109 = vrot.lane.b32.xlu1 %v7104_v26, %s6302_s27 }
 0x28c   : > { %4113 = vrot.lane.b32.xlu1 %v7120_v52, %s6302_s27 }
 0x290   : > { %4117 = vrot.lane.b32.xlu1 %v7144_v56, %s6302_s27 }
 0x294   : > { %4121 = vrot.lane.b32.xlu1 %v7565_v1, %s6302_s27 }
 0x2a2   : > { %v7577_v39 = vpop.f32.mrf.mxu0 }
 0x2a4   : > { %v7581_v55 = vpop.f32.mrf.mxu0 }
 0x2a5   : > { %8587 = vst [vmem:[#allocation6_spill] sm:$0xff] %v7581_v55 }
 0x2a6   : > { %v2681_v5 = vpop.permute.xlu1 %2680  ;;  %v7585_v60 = vpop.f32.mrf.mxu0 }
 0x2a7   : > { %5981 = vmatmul.mubr.msk.f32.gmra.mxu0 %vm1241_vm8, %v2681_v5 }
 0x2a8   : > { %6015 = vmatprep.mubr.msk.f32.mxu0 %vm1241_vm8, %v2860_v13  ;;  %v7591_v30 = vpop.f32.mrf.mxu0  ;;  %v7635_v13 = vpop.f32.mrf.mxu1 }
 0x2a9   : > { %8589 = vst [vmem:[#allocation8_spill] sm:$0xff] %v7591_v30  ;;  %v7976_v30 = vld [vmem:[#allocation3 + $0xc1] sm:$0xff] }
 0x2aa   : > { %v2862_v49 = vpop.permute.xlu1 %2861 }
 0x2ab   : > { %5988 = vmatmul.mubr.msk.f32.vlgmr.msra.gmra.mxu1 %vm1241_vm8, %v2862_v49  ;;  %6016 = vmatmul.mubr.msk.f32.vlgmr.msra.gmra.mxu0 %vm1241_vm8, %v2862_v49 }
 0x2ac   : > { %6040 = vmatpush3.msra.mxu1 %v7290_v63  ;;  %5990 = vmatprep.mubr.msk.f32.mxu1 %vm1241_vm8, %v2864_v17 }
 0x2ad   : > { %6018 = vmatprep.mubr.msk.f32.mxu0 %vm1241_vm8, %v2864_v17  ;;  %6068 = vmatpush3.msra.mxu0 %v7376_v0  ;;  %v7617_v0 = vld [vmem:[%s8582_s5 + $0x68] sm:$0xff] }
 0x2ae   : > { %v7599_v18 = vpop.f32.mrf.mxu0  ;;  %v2866_v31 = vpop.permute.xlu1 %2865  ;;  %6041 = vmatprep.subr.mxu1 %v7341_v34  ;;  %6069 = vmatprep.subr.mxu0 %v7487_v27 }
 0x2af   : > { %5991 = vmatmul.mubr.msk.f32.gmra.mxu1 %vm1241_vm8, %v2866_v31  ;;  %6019 = vmatmul.mubr.msk.f32.gmra.mxu0 %vm1241_vm8, %v2866_v31 }
 0x2b0   : > { %v7607_v63 = vpop.f32.mrf.mxu0  ;;  %5993 = vmatprep.mubr.msk.f32.mxu1 %vm1241_vm8, %v2868_v3  ;;  %6021 = vmatprep.mubr.msk.f32.mxu0 %vm1241_vm8, %v2868_v3  ;;  %v7643_v3 = vpop.f32.mrf.mxu1 }
 0x2b1   : > { %8590 = vst [vmem:[#allocation9_spill] sm:$0xff] %v7607_v63  ;;  %6042 = vmatpush3.msra.mxu1 %v7341_v34  ;;  %6070 = vmatpush3.msra.mxu0 %v7487_v27  ;;  %v2880_v27 = vpop.permute.xlu0 %2879  ;;  %8593 = vst [vmem:[#allocation12_spill] sm:$0xff] %v7643_v3 }
 0x2b2   : > { %v7621_v58 = vpop.f32.mrf.mxu0  ;;  %v2870_v19 = vpop.permute.xlu1 %2869  ;;  %6095 = vmatprep.subr.mxu1 %v7612_v40  ;;  %6123 = vmatprep.subr.mxu0 %v7617_v0 }
 0x2b3   : > { %5994 = vmatmul.mubr.msk.f32.gmra.mxu1 %vm1241_vm8, %v2870_v19  ;;  %6022 = vmatmul.mubr.msk.f32.gmra.mxu0 %vm1241_vm8, %v2870_v19  ;;  %v7651_v31 = vpop.f32.mrf.mxu1 }
 0x2b4   : > { %5996 = vmatprep.mubr.msk.f32.mxu1 %vm1241_vm8, %v2872_v62  ;;  %6024 = vmatprep.mubr.msk.f32.mxu0 %vm1241_vm8, %v2872_v62  ;;  %v7633_v43 = vpop.f32.mrf.mxu0 }
 0x2b5   : > { %8592 = vst [vmem:[#allocation11_spill] sm:$0xff] %v7633_v43  ;;  %v2884_v5 = vpop.permute.xlu0 %2883 }
 0x2b6   : > { %v2874_v34 = vpop.permute.xlu1 %2873  ;;  %v7641_v33 = vpop.f32.mrf.mxu0 }
 0x2b7   : > { %5997 = vmatmul.mubr.msk.f32.gmra.mxu1 %vm1241_vm8, %v2874_v34  ;;  %6025 = vmatmul.mubr.msk.f32.gmra.mxu0 %vm1241_vm8, %v2874_v34  ;;  %v7659_v34 = vpop.f32.mrf.mxu1 }
 0x2b8   : > { %5999 = vmatprep.mubr.msk.f32.mxu1 %vm1241_vm8, %v2876_v14  ;;  %6027 = vmatprep.mubr.msk.f32.mxu0 %vm1241_vm8, %v2876_v14  ;;  %v7649_v49 = vpop.f32.mrf.mxu0  ;;  %8595 = vst [vmem:[#allocation14_spill] sm:$0xff] %v7659_v34 }
 0x2b9   : > { %8594 = vst [vmem:[#allocation13_spill] sm:$0xff] %v7649_v49  ;;  %v7912_v49 = vld [vmem:[#allocation3 + $0x61] sm:$0xff] }
 0x2ba   : > { %v2878_v17 = vpop.permute.xlu1 %2877  ;;  %v7657_v14 = vpop.f32.mrf.mxu0 }
 0x2bb   : > { %6000 = vmatmul.mubr.msk.f32.gmra.mxu1 %vm1241_vm8, %v2878_v17  ;;  %6028 = vmatmul.mubr.msk.f32.gmra.mxu0 %vm1241_vm8, %v2878_v17  ;;  %v7665_v17 = vpop.f32.mrf.mxu1 }
 0x2bc   : > { %6002 = vmatprep.mubr.msk.f32.mxu1 %vm1241_vm8, %v2880_v27  ;;  %6030 = vmatprep.mubr.msk.f32.mxu0 %vm1241_vm8, %v2880_v27  ;;  %v2888_v27 = vpop.permute.xlu0 %2887 }
 0x2be   : > { %v2882_v62 = vpop.permute.xlu1 %2881 }
 0x2bf   : > { %6003 = vmatmul.mubr.msk.f32.gmra.mxu1 %vm1241_vm8, %v2882_v62  ;;  %6031 = vmatmul.mubr.msk.f32.gmra.mxu0 %vm1241_vm8, %v2882_v62  ;;  %v7667_v62 = vpop.f32.mrf.mxu0 }
 0x2c0   : > { %6005 = vmatprep.mubr.msk.f32.mxu1 %vm1241_vm8, %v2884_v5  ;;  %6033 = vmatprep.mubr.msk.f32.mxu0 %vm1241_vm8, %v2884_v5  ;;  %8596 = vst [vmem:[#allocation15_spill] sm:$0xff] %v7667_v62  ;;  %v7681_v34 = vpop.permute.xlu0 %3882  ;;  %v1587_v62 = vadd.f32 %v7577_v39, %v7561_v28 }
 0x2c2   : > { %v2886_v19 = vpop.permute.xlu1 %2885 }
 0x2c3   : > { %6006 = vmatmul.mubr.msk.f32.gmra.mxu1 %vm1241_vm8, %v2886_v19  ;;  %6034 = vmatmul.mubr.msk.f32.gmra.mxu0 %vm1241_vm8, %v2886_v19  ;;  %v7677_v19 = vpop.f32.mrf.mxu1 }
 0x2c4   : > { %6008 = vmatprep.mubr.msk.f32.mxu1 %vm1241_vm8, %v2888_v27  ;;  %6036 = vmatprep.mubr.msk.f32.mxu0 %vm1241_vm8, %v2888_v27  ;;  %8597 = vst [vmem:[#allocation16_spill] sm:$0xff] %v7677_v19  ;;  %v7699_v19 = vld [vmem:[%s8582_s5 + $0x60] sm:$0xff] }
 0x2c6   : > { %v2890_v3 = vpop.permute.xlu1 %2889 }
 0x2c7   : > { %6009 = vmatmul.mubr.msk.f32.gmra.mxu1 %vm1241_vm8, %v2890_v3  ;;  %6037 = vmatmul.mubr.msk.f32.gmra.mxu0 %vm1241_vm8, %v2890_v3  ;;  %v7671_v5 = vpop.f32.mrf.mxu0 }
 0x2c8   : > { %6043 = vmatprep.mubr.msk.f32.mxu1 %vm1241_vm8, %v7001_v11  ;;  %6071 = vmatprep.mubr.msk.f32.mxu0 %vm1241_vm8, %v7325_v15  ;;  %v7694_v15 = vld [vmem:[%s8582_s5 + $0x70] sm:$0xff] }
 0x2c9   : > { %v7679_v27 = vpop.f32.mrf.mxu0 }
 0x2ca   : > { %8598 = vst [vmem:[#allocation17_spill] sm:$0xff] %v7679_v27  ;;  %v7701_v28 = vpop.permute.xlu1 %3884  ;;  %v1597_v27 = vadd.f32 %v7585_v60, %v7571_v47 }
 0x2cb   : > { %6044 = vmatmul.mubr.msk.f32.vlgmr.msra.gmra.mxu1 %vm1241_vm8, %v7010_v32  ;;  %6072 = vmatmul.mubr.msk.f32.vlgmr.msra.gmra.mxu0 %vm1241_vm8, %v7331_v20  ;;  %v7689_v3 = vpop.f32.mrf.mxu0  ;;  %v5821_v11 = vpop.f32.mrf.mxu1 }
 0x2cc   : > { %6096 = vmatpush3.msra.mxu1 %v7612_v40  ;;  %v7704_v32 = vadd.f32 %v5821_v11, %v1587_v62  ;;  %6046 = vmatprep.mubr.msk.f32.mxu1 %vm1241_vm8, %v7022_v10  ;;  %v7728_v62 = vld [vmem:[%s8582_s5 + $0x88] sm:$0xff]  ;;  %v7730_v11 = vpop.permute.xlu0 %3886 }
 0x2cd   : > { %6074 = vmatprep.mubr.msk.f32.mxu0 %vm1241_vm8, %v7349_v24  ;;  %6124 = vmatpush3.msra.mxu0 %v7617_v0  ;;  %v7711_v20 = vpop.f32.mrf.mxu0  ;;  %v7713_v39 = vpop.f32.mrf.mxu1 }
 0x2ce   : > { %8599 = vst [vmem:[#allocation18_spill] sm:$0xff] %v7711_v20  ;;  %8600 = vst [vmem:[#allocation19_spill] sm:$0xff] %v7713_v39  ;;  %6097 = vmatprep.subr.mxu1 %v7694_v15  ;;  %6125 = vmatprep.subr.mxu0 %v7699_v19  ;;  %v8003_v39 = vld [vmem:[#allocation3 + $0xf1] sm:$0xff] }
 0x2cf   : > { %6047 = vmatmul.mubr.msk.f32.gmra.mxu1 %vm1241_vm8, %v7028_v37  ;;  %6075 = vmatmul.mubr.msk.f32.gmra.mxu0 %vm1241_vm8, %v7359_v12  ;;  %v5824_v10 = vpop.f32.mrf.mxu1  ;;  %v7723_v24 = vpop.f32.mrf.mxu0 }
 0x2d0   : > { %v7732_v47 = vadd.f32 %v5824_v10, %v1597_v27  ;;  %6049 = vmatprep.mubr.msk.f32.mxu1 %vm1241_vm8, %v7050_v41  ;;  %6077 = vmatprep.mubr.msk.f32.mxu0 %vm1241_vm8, %v7365_v54  ;;  %v7742_v12 = vpop.permute.xlu1 %3888  ;;  %v7760_v27 = vpop.permute.xlu0 %3890 }
 0x2d1   : > { %v7738_v37 = vpop.f32.mrf.mxu0  ;;  %6098 = vmatpush3.msra.mxu1 %v7694_v15  ;;  %6126 = vmatpush3.msra.mxu0 %v7699_v19  ;;  %v7756_v54 = vpop.f32.mrf.mxu1 }
 0x2d2   : > { %6151 = vmatprep.subr.mxu1 %v7728_v62  ;;  %6179 = vmatprep.subr.mxu0 %v7612_v40  ;;  %8601 = vst [vmem:[#allocation20_spill] sm:$0xff] %v7756_v54  ;;  %v7967_v54 = vld [vmem:[#allocation3 + $0xb1] sm:$0xff] }
 0x2d3   : > { %6050 = vmatmul.mubr.msk.f32.gmra.mxu1 %vm1241_vm8, %v7062_v44  ;;  %6078 = vmatmul.mubr.msk.f32.gmra.mxu0 %vm1241_vm8, %v7382_v59  ;;  %v7750_v41 = vpop.f32.mrf.mxu0  ;;  %v1607_v44 = vadd.f32 %v7599_v18, %v7575_v51 }
 0x2d4   : > { %6052 = vmatprep.mubr.msk.f32.mxu1 %vm1241_vm8, %v7068_v25  ;;  %6080 = vmatprep.mubr.msk.f32.mxu0 %vm1241_vm8, %v7388_v23  ;;  %v7770_v10 = vpop.permute.xlu1 %3892 }
 0x2d5   : > { %v7758_v60 = vpop.f32.mrf.mxu0 }
 0x2d7   : > { %6053 = vmatmul.mubr.msk.f32.gmra.mxu1 %vm1241_vm8, %v7076_v6  ;;  %6081 = vmatmul.mubr.msk.f32.gmra.mxu0 %vm1241_vm8, %v7400_v7  ;;  %v5827_v59 = vpop.f32.mrf.mxu1  ;;  %v7768_v25 = vpop.f32.mrf.mxu0  ;;  %v1617_v6 = vadd.f32 %v7621_v58, %v7583_v57 }
 0x2d8   : > { %v7772_v23 = vadd.f32 %v5827_v59, %v1607_v44  ;;  %6055 = vmatprep.mubr.msk.f32.mxu1 %vm1241_vm8, %v7082_v45  ;;  %6083 = vmatprep.mubr.msk.f32.mxu0 %vm1241_vm8, %v7406_v29  ;;  %v7790_v45 = vpop.permute.xlu0 %3894 }
 0x2d9   : > { %v7778_v51 = vpop.f32.mrf.mxu1  ;;  %v7780_v18 = vpop.f32.mrf.mxu0 }
 0x2da   : > { %8602 = vst [vmem:[#allocation21_spill] sm:$0xff] %v7778_v51 }
 0x2db   : > { %6056 = vmatmul.mubr.msk.f32.gmra.mxu1 %vm1241_vm8, %v7093_v48  ;;  %6084 = vmatmul.mubr.msk.f32.gmra.mxu0 %vm1241_vm8, %v7416_v8  ;;  %v5830_v7 = vpop.f32.mrf.mxu1  ;;  %v7788_v44 = vpop.f32.mrf.mxu0  ;;  %v1627_v48 = vadd.f32 %v7641_v33, %v7603_v42 }
 0x2dc   : > { %v7792_v59 = vadd.f32 %v5830_v7, %v1617_v6  ;;  %6058 = vmatprep.mubr.msk.f32.mxu1 %vm1241_vm8, %v7104_v26  ;;  %6086 = vmatprep.mubr.msk.f32.mxu0 %vm1241_vm8, %v7422_v21  ;;  %v7804_v8 = vpop.permute.xlu1 %3896  ;;  %v7822_v33 = vpop.permute.xlu0 %3898 }
 0x2dd   : > { %v7798_v29 = vpop.f32.mrf.mxu1  ;;  %v7800_v57 = vpop.f32.mrf.mxu0 }
 0x2de   : > { %8603 = vst [vmem:[#allocation22_spill] sm:$0xff] %v7798_v29 }
 0x2df   : > { %6059 = vmatmul.mubr.msk.f32.gmra.mxu1 %vm1241_vm8, %v7102_v4  ;;  %6087 = vmatmul.mubr.msk.f32.gmra.mxu0 %vm1241_vm8, %v7432_v35  ;;  %v5833_v58 = vpop.f32.mrf.mxu1  ;;  %v7810_v26 = vpop.f32.mrf.mxu0  ;;  %v1637_v4 = vadd.f32 %v7657_v14, %v7635_v13 }
 0x2e0   : > { %v7812_v6 = vadd.f32 %v5833_v58, %v1627_v48  ;;  %6061 = vmatprep.mubr.msk.f32.mxu1 %vm1241_vm8, %v7120_v52  ;;  %6089 = vmatprep.mubr.msk.f32.mxu0 %vm1241_vm8, %v7438_v9  ;;  %v7832_v7 = vpop.permute.xlu1 %3900  ;;  %v7854_v58 = vpop.permute.xlu0 %3902 }
 0x2e1   : > { %v7818_v21 = vpop.f32.mrf.mxu1  ;;  %v7820_v42 = vpop.f32.mrf.mxu0 }
 0x2e2   : > { %8604 = vst [vmem:[#allocation23_spill] sm:$0xff] %v7818_v21 }
 0x2e3   : > { %6062 = vmatmul.mubr.msk.f32.gmra.mxu1 %vm1241_vm8, %v7138_v53  ;;  %6090 = vmatmul.mubr.msk.f32.gmra.mxu0 %vm1241_vm8, %v7448_v61  ;;  %v5836_v35 = vpop.f32.mrf.mxu1  ;;  %v7830_v52 = vpop.f32.mrf.mxu0  ;;  %v1647_v53 = vadd.f32 %v7671_v5, %v7651_v31  ;;  %v7846_v61 = vld [vmem:[#allocation3 + $0x102] sm:$0xff] }
 0x2e4   : > { %v7834_v9 = vadd.f32 %v5836_v35, %v1637_v4  ;;  %6064 = vmatprep.mubr.msk.f32.mxu1 %vm1241_vm8, %v7144_v56  ;;  %6092 = vmatprep.mubr.msk.f32.mxu0 %vm1241_vm8, %v7454_v50  ;;  %v7858_v4 = vld [vmem:[#allocation3 + $0x21] sm:$0xff]  ;;  %v1657_v35 = vadd.f32 %v7689_v3, %v7665_v17  ;;  %v7870_v20 = vpop.permute.xlu1 %3904  ;;  %v7899_v21 = vpop.permute.xlu0 %3906 }
 0x2e5   : > { %v7840_v13 = vpop.f32.mrf.mxu1  ;;  %v7842_v14 = vpop.f32.mrf.mxu0  ;;  %v7888_v3 = vld [vmem:[#allocation3 + $0x41] sm:$0xff] }
 0x2e6   : > { %8605 = vst [vmem:[#allocation24_spill] sm:$0xff] %v7840_v13  ;;  %v7872_v13 = vld [vmem:[#allocation3 + $0x31] sm:$0xff] }
 0x2e7   : > { %6065 = vmatmul.mubr.msk.f32.gmra.mxu1 %vm1241_vm8, %v7481_v2  ;;  %6093 = vmatmul.mubr.msk.f32.gmra.mxu0 %vm1241_vm8, %v7846_v61  ;;  %v5839_v48 = vpop.f32.mrf.mxu1  ;;  %v7852_v56 = vpop.f32.mrf.mxu0 }
 0x2e8   : > { %v7856_v50 = vadd.f32 %v5839_v48, %v1647_v53  ;;  %6099 = vmatprep.mubr.msk.f32.mxu1 %vm1241_vm8, %v7858_v4  ;;  %6127 = vmatprep.mubr.msk.f32.mxu0 %vm1241_vm8, %v7681_v34  ;;  %v7883_v34 = vld [vmem:[%s8582_s5 + $0x80] sm:$0xff] }
 0x2e9   : > { %v7864_v31 = vpop.f32.mrf.mxu1  ;;  %v7866_v5 = vpop.f32.mrf.mxu0 }
 0x2ea   : > { %8606 = vst [vmem:[#allocation25_spill] sm:$0xff] %v7864_v31 }
 0x2eb   : > { %6100 = vmatmul.mubr.msk.f32.vlgmr.msra.gmra.mxu1 %vm1241_vm8, %v7872_v13  ;;  %6128 = vmatmul.mubr.msk.f32.vlgmr.msra.gmra.mxu0 %vm1241_vm8, %v7701_v28  ;;  %v5842_v53 = vpop.f32.mrf.mxu1  ;;  %v7878_v48 = vpop.f32.mrf.mxu0 }
 0x2ec   : > { %6152 = vmatpush3.msra.mxu1 %v7728_v62  ;;  %v7886_v17 = vadd.f32 %v5842_v53, %v1657_v35  ;;  %6102 = vmatprep.mubr.msk.f32.mxu1 %vm1241_vm8, %v7888_v3  ;;  %v7903_v35 = vld [vmem:[#allocation3 + $0x51] sm:$0xff]  ;;  %v7909_v53 = vpop.permute.xlu1 %3908 }
 0x2ed   : > { %6130 = vmatprep.mubr.msk.f32.mxu0 %vm1241_vm8, %v7730_v11  ;;  %6180 = vmatpush3.msra.mxu0 %v7612_v40  ;;  %v7895_v28 = vpop.f32.mrf.mxu1  ;;  %v7897_v31 = vpop.f32.mrf.mxu0 }
 0x2ee   : > { %8607 = vst [vmem:[#allocation26_spill] sm:$0xff] %v7895_v28  ;;  %6153 = vmatprep.subr.mxu1 %v7883_v34  ;;  %6181 = vmatprep.subr.mxu0 %v7694_v15 }
 0x2ef   : > { %6103 = vmatmul.mubr.msk.f32.gmra.mxu1 %vm1241_vm8, %v7903_v35  ;;  %6131 = vmatmul.mubr.msk.f32.gmra.mxu0 %vm1241_vm8, %v7742_v12  ;;  %v5877_v11 = vpop.f32.mrf.mxu1  ;;  %v5905_v40 = vpop.f32.mrf.mxu0 }
 0x2f0   : > { %v2102_v28 = vadd.f32 %v5877_v11, %v7723_v24  ;;  %6105 = vmatprep.mubr.msk.f32.mxu1 %vm1241_vm8, %v7912_v49  ;;  %6133 = vmatprep.mubr.msk.f32.mxu0 %vm1241_vm8, %v7760_v27  ;;  %v7920_v12 = vpop.permute.xlu0 %3910  ;;  %v7927_v11 = vld [vmem:[#allocation3 + $0x71] sm:$0xff]  ;;  %v7942_v51 = vpop.permute.xlu1 %3912 }
 0x2f1   : > { %v2096_v38 = vpop.f32.mrf.mxu1  ;;  %v2289_v29 = vpop.f32.mrf.mxu0  ;;  %6154 = vmatpush3.msra.mxu1 %v7883_v34  ;;  %6182 = vmatpush3.msra.mxu0 %v7694_v15 }
 0x2f2   : > { %v7922_v43 = vadd.f32 %v5905_v40, %v2102_v28  ;;  %v2097_v24 = vadd.f32 %v2096_v38, %v7738_v37  ;;  %6207 = vmatprep.subr.mxu1 %v7617_v0  ;;  %6235 = vmatprep.subr.mxu0 %v7728_v62  ;;  %v7936_v40 = vld [vmem:[#allocation3 + $0x81] sm:$0xff] }
 0x2f3   : > { %6106 = vmatmul.mubr.msk.f32.gmra.mxu1 %vm1241_vm8, %v7927_v11  ;;  %6134 = vmatmul.mubr.msk.f32.gmra.mxu0 %vm1241_vm8, %v7770_v10  ;;  %v5880_v27 = vpop.f32.mrf.mxu1  ;;  %v5908_v15 = vpop.f32.mrf.mxu0 }
 0x2f4   : > { %v7933_v46 = vadd.f32 %v2289_v29, %v2097_v24  ;;  %v2112_v28 = vadd.f32 %v5880_v27, %v7750_v41  ;;  %6108 = vmatprep.mubr.msk.f32.mxu1 %vm1241_vm8, %v7936_v40  ;;  %6136 = vmatprep.mubr.msk.f32.mxu0 %vm1241_vm8, %v7790_v45  ;;  %v7947_v29 = vld [vmem:[#allocation3 + $0x91] sm:$0xff]  ;;  %v7953_v27 = vpop.permute.xlu0 %4091 }
 0x2f5   : > { %v2106_v38 = vpop.f32.mrf.mxu1  ;;  %v2299_v37 = vpop.f32.mrf.mxu0 }
 0x2f6   : > { %v7944_v63 = vadd.f32 %v5908_v15, %v2112_v28  ;;  %v2107_v10 = vadd.f32 %v2106_v38, %v7758_v60  ;;  %v7958_v15 = vld [vmem:[#allocation3 + $0xa1] sm:$0xff] }
 0x2f7   : > { %6109 = vmatmul.mubr.msk.f32.gmra.mxu1 %vm1241_vm8, %v7947_v29  ;;  %6137 = vmatmul.mubr.msk.f32.gmra.mxu0 %vm1241_vm8, %v7804_v8  ;;  %v5883_v41 = vpop.f32.mrf.mxu1  ;;  %v5911_v24 = vpop.f32.mrf.mxu0 }
 0x2f8   : > { %v7955_v45 = vadd.f32 %v2299_v37, %v2107_v10  ;;  %v2122_v36 = vadd.f32 %v5883_v41, %v7768_v25  ;;  %6111 = vmatprep.mubr.msk.f32.mxu1 %vm1241_vm8, %v7958_v15  ;;  %6139 = vmatprep.mubr.msk.f32.mxu0 %vm1241_vm8, %v7822_v33  ;;  %v4094_v10 = vpop.permute.xlu1 %4093 }
 0x2f9   : > { %v2116_v60 = vpop.f32.mrf.mxu1  ;;  %v2309_v28 = vpop.f32.mrf.mxu0 }
 0x2fa   : > { %v7964_v38 = vadd.f32 %v5911_v24, %v2122_v36  ;;  %v2117_v8 = vadd.f32 %v2116_v60, %v7780_v18  ;;  %v4096_v24 = vpop.permute.xlu0 %4095 }
 0x2fb   : > { %6112 = vmatmul.mubr.msk.f32.gmra.mxu1 %vm1241_vm8, %v7967_v54  ;;  %6140 = vmatmul.mubr.msk.f32.gmra.mxu0 %vm1241_vm8, %v7832_v7  ;;  %v5886_v25 = vpop.f32.mrf.mxu1  ;;  %v5914_v37 = vpop.f32.mrf.mxu0 }
 0x2fc   : > { %v7973_v41 = vadd.f32 %v2309_v28, %v2117_v8  ;;  %v2132_v33 = vadd.f32 %v5886_v25, %v7788_v44  ;;  %6114 = vmatprep.mubr.msk.f32.mxu1 %vm1241_vm8, %v7976_v30  ;;  %6142 = vmatprep.mubr.msk.f32.mxu0 %vm1241_vm8, %v7854_v58  ;;  %v7994_v25 = vld [vmem:[#allocation3 + $0xe1] sm:$0xff] }
 0x2fd   : > { %v2126_v36 = vpop.f32.mrf.mxu1  ;;  %v2319_v18 = vpop.f32.mrf.mxu0 }
 0x2fe   : > { %v7982_v60 = vadd.f32 %v5914_v37, %v2132_v33  ;;  %v2127_v7 = vadd.f32 %v2126_v36, %v7800_v57  ;;  %v4098_v33 = vpop.permute.xlu1 %4097 }
 0x2ff   : > { %6115 = vmatmul.mubr.msk.f32.gmra.mxu1 %vm1241_vm8, %v7985_v22  ;;  %6143 = vmatmul.mubr.msk.f32.gmra.mxu0 %vm1241_vm8, %v7870_v20  ;;  %v5889_v44 = vpop.f32.mrf.mxu1  ;;  %v5917_v28 = vpop.f32.mrf.mxu0 }
 0x300   : > { %v7991_v8 = vadd.f32 %v2319_v18, %v2127_v7  ;;  %v2142_v58 = vadd.f32 %v5889_v44, %v7810_v26  ;;  %6117 = vmatprep.mubr.msk.f32.mxu1 %vm1241_vm8, %v7994_v25  ;;  %6145 = vmatprep.mubr.msk.f32.mxu0 %vm1241_vm8, %v7899_v21  ;;  %v4100_v7 = vpop.permute.xlu0 %4099 }
 0x301   : > { %v2136_v57 = vpop.f32.mrf.mxu1  ;;  %v2329_v37 = vpop.f32.mrf.mxu0 }
 0x302   : > { %v8000_v36 = vadd.f32 %v5917_v28, %v2142_v58  ;;  %v2137_v20 = vadd.f32 %v2136_v57, %v7820_v42 }
 0x303   : > { %6118 = vmatmul.mubr.msk.f32.gmra.mxu1 %vm1241_vm8, %v8003_v39  ;;  %6146 = vmatmul.mubr.msk.f32.gmra.mxu0 %vm1241_vm8, %v7909_v53  ;;  %v5892_v26 = vpop.f32.mrf.mxu1  ;;  %v5920_v18 = vpop.f32.mrf.mxu0 }
 0x304   : > { %v8009_v44 = vadd.f32 %v2329_v37, %v2137_v20  ;;  %v2152_v21 = vadd.f32 %v5892_v26, %v7830_v52  ;;  %6120 = vmatprep.mubr.msk.f32.mxu1 %vm1241_vm8, %v7481_v2  ;;  %6148 = vmatprep.mubr.msk.f32.mxu0 %vm1241_vm8, %v7920_v12  ;;  %v4102_v37 = vpop.permute.xlu1 %4101 }
 0x305   : > { %v2146_v42 = vpop.f32.mrf.mxu1  ;;  %v2339_v28 = vpop.f32.mrf.mxu0 }
 0x306   : > { %v8016_v58 = vadd.f32 %v5920_v18, %v2152_v21  ;;  %v2147_v57 = vadd.f32 %v2146_v42, %v7842_v14  ;;  %v4104_v18 = vpop.permute.xlu0 %4103 }
 0x307   : > { %6121 = vmatmul.mubr.msk.f32.gmra.mxu1 %vm1241_vm8, %v7565_v1  ;;  %6149 = vmatmul.mubr.msk.f32.gmra.mxu0 %vm1241_vm8, %v7942_v51  ;;  %v5895_v53 = vpop.f32.mrf.mxu1  ;;  %v5923_v52 = vpop.f32.mrf.mxu0 }
 0x308   : > { %v8023_v20 = vadd.f32 %v2339_v28, %v2147_v57  ;;  %v2162_v26 = vadd.f32 %v5895_v53, %v7852_v56  ;;  %6155 = vmatprep.mubr.msk.f32.mxu1 %vm1241_vm8, %v7953_v27  ;;  %6183 = vmatprep.mubr.msk.f32.mxu0 %vm1241_vm8, %v7953_v27  ;;  %v4106_v53 = vpop.permute.xlu1 %4105 }
 0x309   : > { %v2156_v14 = vpop.f32.mrf.mxu1  ;;  %v2349_v12 = vpop.f32.mrf.mxu0 }
 0x30a   : > { %v8030_v21 = vadd.f32 %v5923_v52, %v2162_v26  ;;  %v2157_v51 = vadd.f32 %v2156_v14, %v7866_v5 }
 0x30b   : > { %6156 = vmatmul.mubr.msk.f32.vlgmr.msra.gmra.mxu1 %vm1241_vm8, %v4094_v10  ;;  %6184 = vmatmul.mubr.msk.f32.vlgmr.msra.gmra.mxu0 %vm1241_vm8, %v4094_v10  ;;  %v5898_v42 = vpop.f32.mrf.mxu1  ;;  %v5926_v28 = vpop.f32.mrf.mxu0 }
 0x30c   : > { %v8035_v56 = vadd.f32 %v2349_v12, %v2157_v51  ;;  %6208 = vmatpush3.msra.mxu1 %v7617_v0  ;;  %v2172_v57 = vadd.f32 %v5898_v42, %v7878_v48  ;;  %6158 = vmatprep.mubr.msk.f32.mxu1 %vm1241_vm8, %v4096_v24  ;;  %v4110_v42 = vpop.permute.xlu1 %4109 }
 0x30d   : > { %6186 = vmatprep.mubr.msk.f32.mxu0 %vm1241_vm8, %v4096_v24  ;;  %6236 = vmatpush3.msra.mxu0 %v7728_v62  ;;  %v2166_v27 = vpop.f32.mrf.mxu1  ;;  %v2359_v5 = vpop.f32.mrf.mxu0 }
 0x30e   : > { %v8042_v52 = vadd.f32 %v5926_v28, %v2172_v57  ;;  %v2167_v10 = vadd.f32 %v2166_v27, %v7897_v31  ;;  %6209 = vmatprep.subr.mxu1 %v7699_v19  ;;  %6237 = vmatprep.subr.mxu0 %v7883_v34  ;;  %v4108_v24 = vpop.permute.xlu0 %4107 }
 0x30f   : > { %6159 = vmatmul.mubr.msk.f32.gmra.mxu1 %vm1241_vm8, %v4098_v33  ;;  %6187 = vmatmul.mubr.msk.f32.gmra.mxu0 %vm1241_vm8, %v4098_v33  ;;  %v5933_v0 = vpop.f32.mrf.mxu1  ;;  %v5961_v48 = vpop.f32.mrf.mxu0 }
 0x310   : > { %v8049_v26 = vadd.f32 %v2359_v5, %v2167_v10  ;;  %v8051_v62 = vadd.f32 %v5961_v48, %v5933_v0  ;;  %6161 = vmatprep.mubr.msk.f32.mxu1 %vm1241_vm8, %v4100_v7  ;;  %6189 = vmatprep.mubr.msk.f32.mxu0 %vm1241_vm8, %v4100_v7 }
 0x311   : > { %v2555_v31 = vpop.f32.mrf.mxu1  ;;  %v2780_v14 = vpop.f32.mrf.mxu0  ;;  %6210 = vmatpush3.msra.mxu1 %v7699_v19  ;;  %6238 = vmatpush3.msra.mxu0 %v7883_v34 }
 0x312   : > { %v8057_v12 = vadd.f32 %v2780_v14, %v2555_v31  ;;  %v4112_v19 = vpop.permute.xlu0 %4111 }
 0x313   : > { %6162 = vmatmul.mubr.msk.f32.gmra.mxu1 %vm1241_vm8, %v4102_v37  ;;  %6190 = vmatmul.mubr.msk.f32.gmra.mxu0 %vm1241_vm8, %v4102_v37  ;;  %v5936_v33 = vpop.f32.mrf.mxu1  ;;  %v5964_v51 = vpop.f32.mrf.mxu0 }
 0x314   : > { %v8061_v28 = vadd.f32 %v5964_v51, %v5936_v33  ;;  %6164 = vmatprep.mubr.msk.f32.mxu1 %vm1241_vm8, %v4104_v18  ;;  %6192 = vmatprep.mubr.msk.f32.mxu0 %vm1241_vm8, %v4104_v18  ;;  %v4114_v18 = vpop.permute.xlu1 %4113 }
 0x315   : > { %v2565_v7 = vpop.f32.mrf.mxu1  ;;  %v2790_v57 = vpop.f32.mrf.mxu0 }
 0x316   : > { %v8065_v27 = vadd.f32 %v2790_v57, %v2565_v7 }
 0x317   : > { %6165 = vmatmul.mubr.msk.f32.gmra.mxu1 %vm1241_vm8, %v4106_v53  ;;  %6193 = vmatmul.mubr.msk.f32.gmra.mxu0 %vm1241_vm8, %v4106_v53  ;;  %v5939_v34 = vpop.f32.mrf.mxu1  ;;  %v5967_v37 = vpop.f32.mrf.mxu0 }
 0x318   : > { %v8069_v5 = vadd.f32 %v5967_v37, %v5939_v34  ;;  %6167 = vmatprep.mubr.msk.f32.mxu1 %vm1241_vm8, %v4108_v24  ;;  %6195 = vmatprep.mubr.msk.f32.mxu0 %vm1241_vm8, %v4108_v24  ;;  %v4116_v53 = vpop.permute.xlu0 %4115 }
 0x319   : > { %v2575_v10 = vpop.f32.mrf.mxu1  ;;  %v2800_v0 = vpop.f32.mrf.mxu0 }
 0x31a   : > { %v8073_v48 = vadd.f32 %v2800_v0, %v2575_v10 }
 0x31b   : > { %6168 = vmatmul.mubr.msk.f32.gmra.mxu1 %vm1241_vm8, %v4110_v42  ;;  %6196 = vmatmul.mubr.msk.f32.gmra.mxu0 %vm1241_vm8, %v4110_v42  ;;  %v5942_v31 = vpop.f32.mrf.mxu1  ;;  %v5970_v14 = vpop.f32.mrf.mxu0 }
 0x31c   : > { %v8077_v33 = vadd.f32 %v5970_v14, %v5942_v31  ;;  %6170 = vmatprep.mubr.msk.f32.mxu1 %vm1241_vm8, %v4112_v19  ;;  %6198 = vmatprep.mubr.msk.f32.mxu0 %vm1241_vm8, %v4112_v19  ;;  %v4118_v42 = vpop.permute.xlu1 %4117  ;;  %v4120_v19 = vpop.permute.xlu0 %4119 }
 0x31d   : > { %v2585_v51 = vpop.f32.mrf.mxu1  ;;  %v2810_v24 = vpop.f32.mrf.mxu0 }
 0x31e   : > { %v8081_v7 = vadd.f32 %v2810_v24, %v2585_v51 }
 0x31f   : > { %6171 = vmatmul.mubr.msk.f32.gmra.mxu1 %vm1241_vm8, %v4114_v18  ;;  %6199 = vmatmul.mubr.msk.f32.gmra.mxu0 %vm1241_vm8, %v4114_v18  ;;  %v5945_v57 = vpop.f32.mrf.mxu1  ;;  %v5973_v34 = vpop.f32.mrf.mxu0 }
 0x320   : > { %v8085_v37 = vadd.f32 %v5973_v34, %v5945_v57  ;;  %6173 = vmatprep.mubr.msk.f32.mxu1 %vm1241_vm8, %v4116_v53  ;;  %6201 = vmatprep.mubr.msk.f32.mxu0 %vm1241_vm8, %v4116_v53  ;;  %v4122_v24 = vpop.permute.xlu1 %4121 }
 0x321   : > { %v2595_v10 = vpop.f32.mrf.mxu1  ;;  %v2820_v0 = vpop.f32.mrf.mxu0 }
 0x322   : > { %v8089_v31 = vadd.f32 %v2820_v0, %v2595_v10 }
 0x323   : > { %6174 = vmatmul.mubr.msk.f32.gmra.mxu1 %vm1241_vm8, %v4118_v42  ;;  %6202 = vmatmul.mubr.msk.f32.gmra.mxu0 %vm1241_vm8, %v4118_v42  ;;  %v5948_v14 = vpop.f32.mrf.mxu1  ;;  %v5976_v18 = vpop.f32.mrf.mxu0  ;;  %v3648_v42 = vld [vmem:[#allocation3 + $0x22] sm:$0xff] }
 0x324   : > { %v8093_v51 = vadd.f32 %v5976_v18, %v5948_v14  ;;  %6176 = vmatprep.mubr.msk.f32.mxu1 %vm1241_vm8, %v4120_v19  ;;  %6204 = vmatprep.mubr.msk.f32.mxu0 %vm1241_vm8, %v4120_v19 }
 0x325   : > { %v2605_v57 = vpop.f32.mrf.mxu1  ;;  %v2830_v53 = vpop.f32.mrf.mxu0 }
 0x326   : > { %v8097_v34 = vadd.f32 %v2830_v53, %v2605_v57  ;;  %v3649_v57 = vld [vmem:[#allocation3 + $0x32] sm:$0xff] }
 0x327   : > { %6177 = vmatmul.mubr.msk.f32.gmra.mxu1 %vm1241_vm8, %v4122_v24  ;;  %6205 = vmatmul.mubr.msk.f32.gmra.mxu0 %vm1241_vm8, %v4122_v24  ;;  %v5951_v10 = vpop.f32.mrf.mxu1  ;;  %v5979_v0 = vpop.f32.mrf.mxu0  ;;  %v3650_v24 = vld [vmem:[#allocation3 + $0x42] sm:$0xff]  ;;  %v3651_v53 = vld [vmem:[#allocation3 + $0x52] sm:$0xff] }
 0x328   : > { %v8101_v55 = vadd.f32 %v5979_v0, %v5951_v10  ;;  %6211 = vmatprep.mubr.msk.f32.mxu1 %vm1241_vm8, %v7858_v4  ;;  %6239 = vmatprep.mubr.msk.f32.mxu0 %vm1241_vm8, %v3648_v42  ;;  %v3652_v4 = vld [vmem:[#allocation3 + $0x62] sm:$0xff] }
 0x329   : > { %v2615_v19 = vpop.f32.mrf.mxu1  ;;  %v2840_v14 = vpop.f32.mrf.mxu0 }
 0x32a   : > { %v8106_v18 = vadd.f32 %v2840_v14, %v2615_v19 }
 0x32b   : > { %6212 = vmatmul.mubr.msk.f32.vlgmr.msra.gmra.mxu1 %vm1241_vm8, %v7872_v13  ;;  %6240 = vmatmul.mubr.msk.f32.vlgmr.msra.gmra.mxu0 %vm1241_vm8, %v3649_v57  ;;  %v3653_v13 = vld [vmem:[#allocation3 + $0x72] sm:$0xff] }
 0x32c   : > { %6214 = vmatprep.mubr.msk.f32.mxu1 %vm1241_vm8, %v7888_v3  ;;  %6242 = vmatprep.mubr.msk.f32.mxu0 %vm1241_vm8, %v3650_v24  ;;  %v3654_v3 = vld [vmem:[#allocation3 + $0x82] sm:$0xff] }
 0x32f   : > { %6215 = vmatmul.mubr.msk.f32.gmra.mxu1 %vm1241_vm8, %v7903_v35  ;;  %6243 = vmatmul.mubr.msk.f32.gmra.mxu0 %vm1241_vm8, %v3651_v53  ;;  %v3655_v35 = vld [vmem:[#allocation3 + $0x92] sm:$0xff] }
 0x330   : > { %6217 = vmatprep.mubr.msk.f32.mxu1 %vm1241_vm8, %v7912_v49  ;;  %6245 = vmatprep.mubr.msk.f32.mxu0 %vm1241_vm8, %v3652_v4  ;;  %v3656_v49 = vld [vmem:[#allocation3 + $0xa2] sm:$0xff] }
 0x333   : > { %6218 = vmatmul.mubr.msk.f32.gmra.mxu1 %vm1241_vm8, %v7927_v11  ;;  %6246 = vmatmul.mubr.msk.f32.gmra.mxu0 %vm1241_vm8, %v3653_v13  ;;  %v3657_v11 = vld [vmem:[#allocation3 + $0xb2] sm:$0xff] }
 0x334   : > { %6220 = vmatprep.mubr.msk.f32.mxu1 %vm1241_vm8, %v7936_v40  ;;  %6248 = vmatprep.mubr.msk.f32.mxu0 %vm1241_vm8, %v3654_v3  ;;  %v3658_v40 = vld [vmem:[#allocation3 + $0xc2] sm:$0xff] }
 0x337   : > { %6221 = vmatmul.mubr.msk.f32.gmra.mxu1 %vm1241_vm8, %v7947_v29  ;;  %6249 = vmatmul.mubr.msk.f32.gmra.mxu0 %vm1241_vm8, %v3655_v35  ;;  %v3659_v29 = vld [vmem:[#allocation3 + $0xd2] sm:$0xff] }
 0x338   : > { %6223 = vmatprep.mubr.msk.f32.mxu1 %vm1241_vm8, %v7958_v15  ;;  %6251 = vmatprep.mubr.msk.f32.mxu0 %vm1241_vm8, %v3656_v49  ;;  %v3660_v15 = vld [vmem:[#allocation3 + $0xe2] sm:$0xff] }
 0x33b   : > { %6224 = vmatmul.mubr.msk.f32.gmra.mxu1 %vm1241_vm8, %v7967_v54  ;;  %6252 = vmatmul.mubr.msk.f32.gmra.mxu0 %vm1241_vm8, %v3657_v11  ;;  %v3661_v54 = vld [vmem:[#allocation3 + $0xf2] sm:$0xff] }
 0x33c   : > { %6226 = vmatprep.mubr.msk.f32.mxu1 %vm1241_vm8, %v7976_v30  ;;  %6254 = vmatprep.mubr.msk.f32.mxu0 %vm1241_vm8, %v3658_v40  ;;  %v5954_v30 = vpop.f32.mrf.mxu1 }
 0x33e   : > { %v2625_v0 = vpop.f32.mrf.mxu1 }
 0x33f   : > { %6227 = vmatmul.mubr.msk.f32.gmra.mxu1 %vm1241_vm8, %v7985_v22  ;;  %6255 = vmatmul.mubr.msk.f32.gmra.mxu0 %vm1241_vm8, %v3659_v29  ;;  %v3663_v22 = vld [vmem:[#allocation3 + $0x112] sm:$0xff] }
 0x340   : > { %6229 = vmatprep.mubr.msk.f32.mxu1 %vm1241_vm8, %v7994_v25  ;;  %6257 = vmatprep.mubr.msk.f32.mxu0 %vm1241_vm8, %v3660_v15 }
 0x343   : > { %6230 = vmatmul.mubr.msk.f32.gmra.mxu1 %vm1241_vm8, %v8003_v39  ;;  %6258 = vmatmul.mubr.msk.f32.gmra.mxu0 %vm1241_vm8, %v3661_v54 }
 0x344   : > { %6232 = vmatprep.mubr.msk.f32.mxu1 %vm1241_vm8, %v7481_v2  ;;  %6260 = vmatprep.mubr.msk.f32.mxu0 %vm1241_vm8, %v7846_v61 }
 0x347   : > { %6233 = vmatmul.mubr.msk.f32.gmra.mxu1 %vm1241_vm8, %v7565_v1  ;;  %6261 = vmatmul.mubr.msk.f32.gmra.mxu0 %vm1241_vm8, %v3663_v22 }
 0x367   : > { %v5982_v25 = vpop.f32.mrf.mxu0 }
 0x368   : > { %v2856_v10 = vadd.f32 %v5982_v25, %v5954_v30 }
 0x369   : > { %v2850_v42 = vpop.f32.mrf.mxu0 }
 0x36a   : > { %v2851_v39 = vadd.f32 %v2850_v42, %v2625_v0 }
 0x36b   : > { %v5989_v19 = vpop.f32.mrf.mxu1  ;;  %v6017_v14 = vpop.f32.mrf.mxu0 }
 0x36c   : > { %v3069_v57 = vadd.f32 %v5989_v19, %v8051_v62 }
 0x36d   : > { %v2989_v2 = vpop.f32.mrf.mxu1  ;;  %v3150_v24 = vpop.f32.mrf.mxu0 }
 0x36e   : > { %v8156_v61 = vadd.f32 %v3069_v57, %v7704_v32  ;;  %v8159_v53 = vadd.f32 %v2989_v2, %v8057_v12 }
 0x36f   : > { %v5992_v1 = vpop.f32.mrf.mxu1  ;;  %v6020_v4 = vpop.f32.mrf.mxu0 }
 0x370   : > { %v3071_v13 = vadd.f32 %v5992_v1, %v8061_v28 }
 0x371   : > { %v2999_v3 = vpop.f32.mrf.mxu1  ;;  %v3160_v35 = vpop.f32.mrf.mxu0 }
 0x372   : > { %v8163_v49 = vadd.f32 %v3071_v13, %v7732_v47  ;;  %v8166_v11 = vadd.f32 %v2999_v3, %v8065_v27 }
 0x373   : > { %v5995_v62 = vpop.f32.mrf.mxu1  ;;  %v6023_v40 = vpop.f32.mrf.mxu0 }
 0x374   : > { %v3073_v32 = vadd.f32 %v5995_v62, %v8069_v5 }
 0x375   : > { %v3009_v29 = vpop.f32.mrf.mxu1  ;;  %v8169_v15 = vpop.f32.mrf.mxu0 }
 0x376   : > { %v8172_v12 = vadd.f32 %v3073_v32, %v7772_v23  ;;  %v8175_v28 = vadd.f32 %v3009_v29, %v8073_v48 }
 0x377   : > { %v5998_v54 = vpop.f32.mrf.mxu1  ;;  %v8177_v22 = vpop.f32.mrf.mxu0 }
 0x378   : > { %v3075_v47 = vadd.f32 %v5998_v54, %v8077_v33 }
 0x379   : > { %v3019_v27 = vpop.f32.mrf.mxu1  ;;  %v8180_v30 = vpop.f32.mrf.mxu0 }
 0x37a   : > { %v8183_v25 = vadd.f32 %v3075_v47, %v7792_v59  ;;  %v8186_v5 = vadd.f32 %v3019_v27, %v8081_v7 }
 0x37b   : > { %v6001_v0 = vpop.f32.mrf.mxu1  ;;  %v8188_v23 = vpop.f32.mrf.mxu0 }
 0x37c   : > { %v3077_v48 = vadd.f32 %v6001_v0, %v8085_v37 }
 0x37d   : > { %v3029_v42 = vpop.f32.mrf.mxu1  ;;  %v8191_v19 = vpop.f32.mrf.mxu0 }
 0x37e   : > { %v8194_v57 = vadd.f32 %v3077_v48, %v7812_v6  ;;  %v8197_v33 = vadd.f32 %v3029_v42, %v8089_v31 }
 0x37f   : > { %v6004_v2 = vpop.f32.mrf.mxu1  ;;  %v8199_v59 = vpop.f32.mrf.mxu0 }
 0x380   : > { %v3079_v7 = vadd.f32 %v6004_v2, %v8093_v51 }
 0x381   : > { %v3039_v1 = vpop.f32.mrf.mxu1  ;;  %v8202_v13 = vpop.f32.mrf.mxu0 }
 0x382   : > { %v8205_v3 = vadd.f32 %v3079_v7, %v7834_v9  ;;  %v8208_v37 = vadd.f32 %v3039_v1, %v8097_v34 }
 0x383   : > { %v6007_v62 = vpop.f32.mrf.mxu1  ;;  %v8210_v6 = vpop.f32.mrf.mxu0 }
 0x384   : > { %8608 = vst [vmem:[#allocation27_spill] sm:$0xff] %v8205_v3  ;;  %v3081_v31 = vadd.f32 %v6007_v62, %v8101_v55 }
 0x385   : > { %v3049_v32 = vpop.f32.mrf.mxu1  ;;  %v8213_v29 = vpop.f32.mrf.mxu0 }
 0x386   : > { %v8216_v54 = vadd.f32 %v3081_v31, %v7856_v50  ;;  %v8219_v51 = vadd.f32 %v3049_v32, %v8106_v18 }
 0x387   : > { %v6010_v47 = vpop.f32.mrf.mxu1  ;;  %v8221_v9 = vpop.f32.mrf.mxu0 }
 0x388   : > { %8609 = vst [vmem:[#allocation28_spill] sm:$0xff] %v8216_v54  ;;  %8610 = vst [vmem:[#allocation29_spill] sm:$0xff] %v8219_v51  ;;  %v3083_v27 = vadd.f32 %v6010_v47, %v2856_v10 }
 0x389   : > { %v3059_v34 = vpop.f32.mrf.mxu1  ;;  %v8223_v0 = vpop.f32.mrf.mxu0 }
 0x38a   : > { %v8226_v48 = vadd.f32 %v3083_v27, %v7886_v17  ;;  %v8228_v55 = vadd.f32 %v3059_v34, %v2851_v39 }
 0x38b   : > { %v6045_v42 = vpop.f32.mrf.mxu1  ;;  %v6073_v2 = vpop.f32.mrf.mxu0 }
 0x38c   : > { %v3301_v7 = vadd.f32 %v6045_v42, %v6017_v14 }
 0x38d   : > { %v3295_v50 = vpop.f32.mrf.mxu1  ;;  %v3488_v1 = vpop.f32.mrf.mxu0 }
 0x38e   : > { %v3568_v62 = vadd.f32 %v6073_v2, %v3301_v7  ;;  %v3296_v18 = vadd.f32 %v3295_v50, %v3150_v24 }
 0x38f   : > { %v6048_v31 = vpop.f32.mrf.mxu1  ;;  %v6076_v32 = vpop.f32.mrf.mxu0 }
 0x390   : > { %v8231_v54 = vadd.f32 %v3568_v62, %v7922_v43  ;;  %v3567_v10 = vadd.f32 %v3488_v1, %v3296_v18  ;;  %v3311_v47 = vadd.f32 %v6048_v31, %v6020_v4 }
 0x391   : > { %v3305_v51 = vpop.f32.mrf.mxu1  ;;  %v3498_v3 = vpop.f32.mrf.mxu0 }
 0x392   : > { %v8234_v17 = vadd.f32 %v3567_v10, %v7933_v46  ;;  %v3570_v39 = vadd.f32 %v6076_v32, %v3311_v47  ;;  %v3306_v27 = vadd.f32 %v3305_v51, %v3160_v35 }
 0x393   : > { %v6051_v34 = vpop.f32.mrf.mxu1  ;;  %v6079_v14 = vpop.f32.mrf.mxu0 }
 0x394   : > { %v8237_v42 = vadd.f32 %v3570_v39, %v7944_v63  ;;  %v3569_v24 = vadd.f32 %v3498_v3, %v3306_v27  ;;  %v3321_v2 = vadd.f32 %v6051_v34, %v6023_v40 }
 0x395   : > { %v3315_v7 = vpop.f32.mrf.mxu1  ;;  %v3508_v50 = vpop.f32.mrf.mxu0 }
 0x396   : > { %v8240_v43 = vadd.f32 %v3569_v24, %v7955_v45  ;;  %v3572_v4 = vadd.f32 %v6079_v14, %v3321_v2  ;;  %v3316_v1 = vadd.f32 %v3315_v7, %v8169_v15 }
 0x397   : > { %v6054_v62 = vpop.f32.mrf.mxu1  ;;  %v6082_v46 = vpop.f32.mrf.mxu0 }
 0x398   : > { %8611 = vst [vmem:[#allocation30_spill] sm:$0xff] %v8240_v43  ;;  %v8244_v18 = vadd.f32 %v3572_v4, %v7964_v38  ;;  %v3571_v35 = vadd.f32 %v3508_v50, %v3316_v1  ;;  %v3331_v51 = vadd.f32 %v6054_v62, %v8177_v22 }
 0x399   : > { %v3325_v63 = vpop.f32.mrf.mxu1  ;;  %v3518_v31 = vpop.f32.mrf.mxu0 }
 0x39a   : > { %8612 = vst [vmem:[#allocation31_spill] sm:$0xff] %v8244_v18  ;;  %v8248_v40 = vadd.f32 %v3571_v35, %v7973_v41  ;;  %v3574_v3 = vadd.f32 %v6082_v46, %v3331_v51  ;;  %v3326_v45 = vadd.f32 %v3325_v63, %v8180_v30 }
 0x39b   : > { %v6057_v32 = vpop.f32.mrf.mxu1  ;;  %v6085_v10 = vpop.f32.mrf.mxu0 }
 0x39c   : > { %8613 = vst [vmem:[#allocation32_spill] sm:$0xff] %v8248_v40  ;;  %v8252_v15 = vadd.f32 %v3574_v3, %v7982_v60  ;;  %v3573_v47 = vadd.f32 %v3518_v31, %v3326_v45  ;;  %v3341_v38 = vadd.f32 %v6057_v32, %v8188_v23  ;;  %v8337_v40 = vld [vmem:[%s8583_s6] ss:$0 sm:$0xff] }
 0x39d   : > { %v3335_v39 = vpop.f32.mrf.mxu1  ;;  %v3528_v27 = vpop.f32.mrf.mxu0 }
 0x39e   : > { %8614 = vst [vmem:[#allocation33_spill] sm:$0xff] %v8252_v15  ;;  %v8256_v22 = vadd.f32 %v3573_v47, %v7991_v8  ;;  %v3576_v34 = vadd.f32 %v6085_v10, %v3341_v38  ;;  %v3336_v41 = vadd.f32 %v3335_v39, %v8191_v19 }
 0x39f   : > { %v6060_v14 = vpop.f32.mrf.mxu1  ;;  %v6088_v24 = vpop.f32.mrf.mxu0 }
 0x3a0   : > { %8615 = vst [vmem:[#allocation34_spill] sm:$0xff] %v8256_v22  ;;  %v8260_v30 = vadd.f32 %v3576_v34, %v8000_v36  ;;  %v3575_v2 = vadd.f32 %v3528_v27, %v3336_v41  ;;  %v3351_v60 = vadd.f32 %v6060_v14, %v8199_v59  ;;  %v8627_v22 = vld [vmem:[#allocation8_spill] sm:$0xff] }
 0x3a1   : > { %v3345_v7 = vpop.f32.mrf.mxu1  ;;  %v3538_v50 = vpop.f32.mrf.mxu0 }
 0x3a2   : > { %8616 = vst [vmem:[#allocation35_spill] sm:$0xff] %v8260_v30  ;;  %v8264_v23 = vadd.f32 %v3575_v2, %v8009_v44  ;;  %v3578_v4 = vadd.f32 %v6088_v24, %v3351_v60  ;;  %v3346_v8 = vadd.f32 %v3345_v7, %v8202_v13  ;;  %v8626_v30 = vld [vmem:[#allocation4_spill] sm:$0xff] }
 0x3a3   : > { %v6063_v1 = vpop.f32.mrf.mxu1  ;;  %v6091_v62 = vpop.f32.mrf.mxu0  ;;  %v1592_v15 = vadd.f32 %v8627_v22, %v8626_v30 }
 0x3a4   : > { %8617 = vst [vmem:[#allocation36_spill] sm:$0xff] %v8264_v23  ;;  %v8268_v19 = vadd.f32 %v3578_v4, %v8016_v58  ;;  %v3577_v46 = vadd.f32 %v3538_v50, %v3346_v8  ;;  %v3361_v36 = vadd.f32 %v6063_v1, %v8210_v6 }
 0x3a5   : > { %v3355_v35 = vpop.f32.mrf.mxu1  ;;  %v3548_v51 = vpop.f32.mrf.mxu0 }
 0x3a6   : > { %8618 = vst [vmem:[#allocation37_spill] sm:$0xff] %v8268_v19  ;;  %v8272_v59 = vadd.f32 %v3577_v46, %v8023_v20  ;;  %v3580_v63 = vadd.f32 %v6091_v62, %v3361_v36  ;;  %v3356_v44 = vadd.f32 %v3355_v35, %v8213_v29 }
 0x3a7   : > { %v6066_v31 = vpop.f32.mrf.mxu1  ;;  %v6094_v3 = vpop.f32.mrf.mxu0 }
 0x3a8   : > { %8619 = vst [vmem:[#allocation38_spill] sm:$0xff] %v8272_v59  ;;  %v8276_v13 = vadd.f32 %v3580_v63, %v8030_v21  ;;  %v3579_v45 = vadd.f32 %v3548_v51, %v3356_v44  ;;  %v3371_v58 = vadd.f32 %v6066_v31, %v8221_v9 }
 0x3a9   : > { %v3365_v32 = vpop.f32.mrf.mxu1  ;;  %v3558_v10 = vpop.f32.mrf.mxu0 }
 0x3aa   : > { %8620 = vst [vmem:[#allocation39_spill] sm:$0xff] %v8276_v13  ;;  %v8280_v6 = vadd.f32 %v3579_v45, %v8035_v56  ;;  %v3582_v47 = vadd.f32 %v6094_v3, %v3371_v58  ;;  %v3366_v20 = vadd.f32 %v3365_v32, %v8223_v0  ;;  %v8625_v13 = vld [vmem:[#allocation19_spill] sm:$0xff] }
 0x3ab   : > { %v6101_v38 = vpop.f32.mrf.mxu1  ;;  %v6129_v39 = vpop.f32.mrf.mxu0 }
 0x3ac   : > { %8621 = vst [vmem:[#allocation40_spill] sm:$0xff] %v8280_v6  ;;  %v8284_v29 = vadd.f32 %v3582_v47, %v8042_v52  ;;  %v3581_v27 = vadd.f32 %v3558_v10, %v3366_v20  ;;  %v8624_v20 = vld [vmem:[#allocation6_spill] sm:$0xff] }
 0x3ad   : > { %v3787_v34 = vpop.f32.mrf.mxu1  ;;  %v4012_v21 = vpop.f32.mrf.mxu0 }
 0x3ae   : > { %8622 = vst [vmem:[#allocation41_spill] sm:$0xff] %v8284_v29  ;;  %v8287_v41 = vadd.f32 %v3581_v27, %v8049_v26  ;;  %v1582_v27 = vadd.f32 %v8624_v20, %v7567_v16  ;;  %v4013_v19 = vadd.f32 %v4012_v21, %v3787_v34  ;;  %v8628_v34 = vld [vmem:[#allocation20_spill] sm:$0xff] }
 0x3af   : > { %v6104_v9 = vpop.f32.mrf.mxu1  ;;  %v6132_v14 = vpop.f32.mrf.mxu0 }
 0x3b0   : > { %8623 = vst [vmem:[#allocation42_spill] sm:$0xff] %v8287_v41  ;;  %v4018_v41 = vadd.f32 %v6129_v39, %v6101_v38  ;;  %v1869_v59 = vadd.f32 %v8625_v13, %v1582_v27  ;;  %v4028_v38 = vadd.f32 %v6132_v14, %v6104_v9 }
 0x3b1   : > { %v3797_v24 = vpop.f32.mrf.mxu1  ;;  %v4022_v2 = vpop.f32.mrf.mxu0 }
 0x3b2   : > { %v3583_v16 = vadd.f32 %v8159_v53, %v1869_v59  ;;  %v4023_v22 = vadd.f32 %v4022_v2, %v3797_v24  ;;  %v8629_v53 = vld [vmem:[#allocation5_spill] sm:$0xff] }
 0x3b3   : > { %v6107_v56 = vpop.f32.mrf.mxu1  ;;  %v6135_v60 = vpop.f32.mrf.mxu0  ;;  %v8630_v59 = vld [vmem:[#allocation9_spill] sm:$0xff] }
 0x3b5   : > { %v3807_v7 = vpop.f32.mrf.mxu1  ;;  %v4032_v50 = vpop.f32.mrf.mxu0 }
 0x3b7   : > { %v8289_v0 = vpop.f32.mrf.mxu1  ;;  %v6138_v4 = vpop.f32.mrf.mxu0 }
 0x3b9   : > { %v8291_v8 = vpop.f32.mrf.mxu1  ;;  %v8293_v52 = vpop.f32.mrf.mxu0 }
 0x3bb   : > { %v8295_v1 = vpop.f32.mrf.mxu1  ;;  %v8297_v62 = vpop.f32.mrf.mxu0 }
 0x3bd   : > { %v8299_v26 = vpop.f32.mrf.mxu1  ;;  %v8301_v46 = vpop.f32.mrf.mxu0 }
 0x3bf   : > { %v8303_v36 = vpop.f32.mrf.mxu1  ;;  %v8305_v35 = vpop.f32.mrf.mxu0 }
 0x3c1   : > { %v8307_v51 = vpop.f32.mrf.mxu1  ;;  %v8309_v63 = vpop.f32.mrf.mxu0 }
 0x3c3   : > { %v8311_v44 = vpop.f32.mrf.mxu1  ;;  %v8313_v31 = vpop.f32.mrf.mxu0 }
 0x3c5   : > { %v8315_v3 = vpop.f32.mrf.mxu1  ;;  %v8317_v45 = vpop.f32.mrf.mxu0 }
 0x3c7   : > { %v8319_v58 = vpop.f32.mrf.mxu1  ;;  %v8321_v32 = vpop.f32.mrf.mxu0 }
 0x3c9   : > { %v8323_v10 = vpop.f32.mrf.mxu1  ;;  %v8325_v47 = vpop.f32.mrf.mxu0 }
 0x3cb   : > { %v6157_v29 = vpop.f32.mrf.mxu1  ;;  %v8329_v6 = vpop.f32.mrf.mxu0 }
 0x3cc   : > { %v4301_v23 = vadd.f32 %v6157_v29, %v4018_v41  ;;  %v1871_v29 = vadd.f32 %v8628_v34, %v1592_v15  ;;  %v4038_v15 = vadd.f32 %v6135_v60, %v6107_v56 }
 0x3cd   : > { %v4221_v18 = vpop.f32.mrf.mxu1  ;;  %v8339_v43 = vpop.f32.mrf.mxu0 }
 0x3ce   : > { %v4816_v39 = vadd.f32 %v4301_v23, %v8156_v61  ;;  %v4300_v13 = vadd.f32 %v4221_v18, %v4013_v19  ;;  %v1602_v61 = vadd.f32 %v8630_v59, %v8629_v53  ;;  %v3585_v18 = vadd.f32 %v8166_v11, %v1871_v29 }
 0x3cf   : > { %v6160_v21 = vpop.f32.mrf.mxu1  ;;  %v8344_v41 = vpop.f32.mrf.mxu0 }
 0x3d0   : > { %v4855_v30 = vadd.f32 %v8337_v40, %v4816_v39  ;;  %v4815_v20 = vadd.f32 %v4300_v13, %v3583_v16  ;;  %v4303_v27 = vadd.f32 %v6160_v21, %v4028_v38  ;;  %v8631_v16 = vld [vmem:[#allocation21_spill] sm:$0xff]  ;;  %v4033_v39 = vadd.f32 %v4032_v50, %v3807_v7  ;;  %v8632_v21 = vld [vmem:[#allocation7_spill] sm:$0xff] }
 0x3d1   : > { %v4231_v23 = vpop.f32.mrf.mxu1  ;;  %v8357_v19 = vpop.f32.mrf.mxu0  ;;  %v1873_v38 = vadd.f32 %v8631_v16, %v1602_v61 }
 0x3d2   : > { %v4871_v9 = vmax.f32 %v4855_v30, 0.0  ;;  %v4854_v14 = vadd.f32 %v8337_v40, %v4815_v20  ;;  %v4818_v24 = vadd.f32 %v4303_v27, %v8163_v49  ;;  %v4302_v2 = vadd.f32 %v4231_v23, %v4023_v22  ;;  %v8633_v30 = vld [vmem:[#allocation11_spill] sm:$0xff] }
 0x3d3   : > { %v6163_v13 = vpop.f32.mrf.mxu1  ;;  %v8362_v34 = vpop.f32.mrf.mxu0  ;;  %v1612_v20 = vadd.f32 %v8633_v30, %v8632_v21  ;;  %v3587_v49 = vadd.f32 %v8175_v28, %v1873_v38  ;;  %v4048_v22 = vadd.f32 %v6138_v4, %v8289_v0  ;;  %v4043_v23 = vadd.f32 %v8293_v52, %v8291_v8 }
 0x3d4   : > { %4887 = vst.msk [vmem:[%s8352_s26 + $0x8] sm:$0xff] %vm457_vm2, %v4871_v9  ;;  %v4870_v11 = vmax.f32 %v4854_v14, 0.0  ;;  %v4857_v56 = vadd.f32 %v8337_v40, %v4818_v24  ;;  %v4817_v60 = vadd.f32 %v4302_v2, %v3585_v18  ;;  %v4305_v29 = vadd.f32 %v6163_v13, %v4038_v15  ;;  %v8634_v18 = vld [vmem:[#allocation22_spill] sm:$0xff] }
 0x3d5   : > { %v4241_v27 = vpop.f32.mrf.mxu1  ;;  %v8371_v7 = vpop.f32.mrf.mxu0  ;;  %v1875_v15 = vadd.f32 %v8634_v18, %v1612_v20  ;;  %v8635_v2 = vld [vmem:[#allocation10_spill] sm:$0xff] }
 0x3d6   : > { %4886 = vst.msk [vmem:[%s8352_s26] sm:$0xff] %vm457_vm2, %v4870_v11  ;;  %v4873_v50 = vmax.f32 %v4857_v56, 0.0  ;;  %v4856_v53 = vadd.f32 %v8337_v40, %v4817_v60  ;;  %v4820_v59 = vadd.f32 %v4305_v29, %v8172_v12  ;;  %v4304_v61 = vadd.f32 %v4241_v27, %v4033_v39  ;;  %v8636_v12 = vld [vmem:[#allocation13_spill] sm:$0xff]  ;;  %v8637_v29 = vld [vmem:[#allocation23_spill] sm:$0xff]  ;;  %v8638_v27 = vld [vmem:[#allocation12_spill] sm:$0xff] }
 0x3d7   : > { %v6166_v28 = vpop.f32.mrf.mxu1  ;;  %v8380_v9 = vpop.f32.mrf.mxu0  ;;  %v1622_v16 = vadd.f32 %v8636_v12, %v8635_v2  ;;  %v3589_v38 = vadd.f32 %v8186_v5, %v1875_v15  ;;  %v4058_v39 = vadd.f32 %v8297_v62, %v8295_v1  ;;  %v4053_v5 = vadd.f32 %v8301_v46, %v8299_v26  ;;  %v8641_v12 = vld [vmem:[#allocation14_spill] sm:$0xff] }
 0x3d8   : > { %4889 = vst.msk [vmem:[%s8352_s26 + $0x18] sm:$0xff] %vm457_vm2, %v4873_v50  ;;  %v4872_v0 = vmax.f32 %v4856_v53, 0.0  ;;  %v4859_v4 = vadd.f32 %v8337_v40, %v4820_v59  ;;  %v4819_v14 = vadd.f32 %v4304_v61, %v3587_v49  ;;  %v4307_v24 = vadd.f32 %v6166_v28, %v4048_v22  ;;  %v8640_v28 = vld [vmem:[#allocation24_spill] sm:$0xff] }
 0x3d9   : > { %v4251_v8 = vpop.f32.mrf.mxu1  ;;  %v8390_v52 = vpop.f32.mrf.mxu0  ;;  %v1877_v21 = vadd.f32 %v8637_v29, %v1622_v16  ;;  %v4068_v59 = vadd.f32 %v8305_v35, %v8303_v36  ;;  %v8644_v29 = vld [vmem:[#allocation25_spill] sm:$0xff] }
 0x3da   : > { %4888 = vst.msk [vmem:[%s8352_s26 + $0x10] sm:$0xff] %vm457_vm2, %v4872_v0  ;;  %v4875_v13 = vmax.f32 %v4859_v4, 0.0  ;;  %v4858_v11 = vadd.f32 %v8337_v40, %v4819_v14  ;;  %v4822_v56 = vadd.f32 %v4307_v24, %v8183_v25  ;;  %v4306_v60 = vadd.f32 %v4251_v8, %v4043_v23  ;;  %v8639_v25 = vld [vmem:[#allocation15_spill] sm:$0xff] }
 0x3db   : > { %v6169_v30 = vpop.f32.mrf.mxu1  ;;  %v8399_v20 = vpop.f32.mrf.mxu0  ;;  %v1632_v50 = vadd.f32 %v8639_v25, %v8638_v27  ;;  %v3591_v53 = vadd.f32 %v8197_v33, %v1877_v21  ;;  %v4063_v33 = vadd.f32 %v8309_v63, %v8307_v51  ;;  %v8647_v25 = vld [vmem:[#allocation29_spill] sm:$0xff] }
 0x3dc   : > { %4891 = vst.msk [vmem:[%s8352_s26 + $0x28] sm:$0xff] %vm457_vm2, %v4875_v13  ;;  %v4874_v1 = vmax.f32 %v4858_v11, 0.0  ;;  %v4861_v62 = vadd.f32 %v8337_v40, %v4822_v56  ;;  %v4821_v49 = vadd.f32 %v4306_v60, %v3589_v38  ;;  %v4309_v22 = vadd.f32 %v6169_v30, %v4058_v39  ;;  %v8643_v11 = vld [vmem:[#allocation27_spill] sm:$0xff] }
 0x3dd   : > { %v4261_v26 = vpop.f32.mrf.mxu1  ;;  %v8409_v46 = vpop.f32.mrf.mxu0  ;;  %v1879_v0 = vadd.f32 %v8640_v28, %v1632_v50  ;;  %v4078_v39 = vadd.f32 %v8313_v31, %v8311_v44 }
 0x3de   : > { %4890 = vst.msk [vmem:[%s8352_s26 + $0x20] sm:$0xff] %vm457_vm2, %v4874_v1  ;;  %v4877_v61 = vmax.f32 %v4861_v62, 0.0  ;;  %v4860_v18 = vadd.f32 %v8337_v40, %v4821_v49  ;;  %v4824_v15 = vadd.f32 %v4309_v22, %v8194_v57  ;;  %v4308_v23 = vadd.f32 %v4261_v26, %v4053_v5  ;;  %v8642_v57 = vld [vmem:[#allocation17_spill] sm:$0xff]  ;;  %v8645_v49 = vld [vmem:[#allocation16_spill] sm:$0xff]  ;;  %v8646_v22 = vld [vmem:[#allocation18_spill] sm:$0xff] }
 0x3df   : > { %v6172_v4 = vpop.f32.mrf.mxu1  ;;  %v8418_v14 = vpop.f32.mrf.mxu0  ;;  %v1642_v16 = vadd.f32 %v8642_v57, %v8641_v12  ;;  %v3593_v38 = vadd.f32 %v8208_v37, %v1879_v0  ;;  %v4073_v37 = vadd.f32 %v8317_v45, %v8315_v3  ;;  %v1652_v27 = vadd.f32 %v8646_v22, %v8645_v49 }
 0x3e0   : > { %4893 = vst.msk [vmem:[%s8352_s26 + $0x38] sm:$0xff] %vm457_vm2, %v4877_v61  ;;  %v4876_v36 = vmax.f32 %v4860_v18, 0.0  ;;  %v4863_v35 = vadd.f32 %v8337_v40, %v4824_v15  ;;  %v4823_v24 = vadd.f32 %v4308_v23, %v3591_v53  ;;  %v4311_v2 = vadd.f32 %v6172_v4, %v4068_v59  ;;  %v8648_v61 = vld [vmem:[#allocation28_spill] sm:$0xff]  ;;  %v8649_v23 = vld [vmem:[#allocation26_spill] sm:$0xff] }
 0x3e1   : > { %v4271_v51 = vpop.f32.mrf.mxu1  ;;  %v8428_v63 = vpop.f32.mrf.mxu0  ;;  %v1881_v21 = vadd.f32 %v8644_v29, %v1642_v16  ;;  %v4088_v53 = vadd.f32 %v8321_v32, %v8319_v58  ;;  %v1883_v28 = vadd.f32 %v8649_v23, %v1652_v27  ;;  %v4083_v0 = vadd.f32 %v8325_v47, %v8323_v10 }
 0x3e2   : > { %4892 = vst.msk [vmem:[%s8352_s26 + $0x30] sm:$0xff] %vm457_vm2, %v4876_v36  ;;  %v4879_v8 = vmax.f32 %v4863_v35, 0.0  ;;  %v4862_v13 = vadd.f32 %v8337_v40, %v4823_v24  ;;  %v4826_v56 = vadd.f32 %v4311_v2, %v8643_v11  ;;  %v4310_v60 = vadd.f32 %v4271_v51, %v4063_v33 }
 0x3e3   : > { %v6175_v5 = vpop.f32.mrf.mxu1  ;;  %v8437_v30 = vpop.f32.mrf.mxu0  ;;  %v3595_v50 = vadd.f32 %v8647_v25, %v1881_v21  ;;  %v3597_v24 = vadd.f32 %v8228_v55, %v1883_v28  ;;  %v8650_v28 = vld [vmem:[#allocation30_spill] sm:$0xff] }
 0x3e4   : > { %4895 = vst.msk [vmem:[%s8352_s26 + $0x48] sm:$0xff] %vm457_vm2, %v4879_v8  ;;  %v4878_v44 = vmax.f32 %v4862_v13, 0.0  ;;  %v4865_v31 = vadd.f32 %v8337_v40, %v4826_v56  ;;  %v4825_v1 = vadd.f32 %v4310_v60, %v3593_v38  ;;  %v4313_v62 = vadd.f32 %v6175_v5, %v4078_v39 }
 0x3e5   : > { %v4281_v3 = vpop.f32.mrf.mxu1  ;;  %v8447_v45 = vpop.f32.mrf.mxu0 }
 0x3e6   : > { %4894 = vst.msk [vmem:[%s8352_s26 + $0x40] sm:$0xff] %vm457_vm2, %v4878_v44  ;;  %v4881_v59 = vmax.f32 %v4865_v31, 0.0  ;;  %v4864_v26 = vadd.f32 %v8337_v40, %v4825_v1  ;;  %v4828_v18 = vadd.f32 %v4313_v62, %v8648_v61  ;;  %v4312_v15 = vadd.f32 %v4281_v3, %v4073_v37 }
 0x3e7   : > { %v6178_v33 = vpop.f32.mrf.mxu1  ;;  %v8456_v4 = vpop.f32.mrf.mxu0 }
 0x3e8   : > { %4897 = vst.msk [vmem:[%s8352_s26 + $0x58] sm:$0xff] %vm457_vm2, %v4881_v59  ;;  %v4880_v58 = vmax.f32 %v4864_v26, 0.0  ;;  %v4867_v32 = vadd.f32 %v8337_v40, %v4828_v18  ;;  %v4827_v36 = vadd.f32 %v4312_v15, %v3595_v50  ;;  %v4315_v35 = vadd.f32 %v6178_v33, %v4088_v53 }
 0x3e9   : > { %v4291_v2 = vpop.f32.mrf.mxu1  ;;  %v8462_v12 = vpop.f32.mrf.mxu0 }
 0x3ea   : > { %4896 = vst.msk [vmem:[%s8352_s26 + $0x50] sm:$0xff] %vm457_vm2, %v4880_v58  ;;  %v4883_v10 = vmax.f32 %v4867_v32, 0.0  ;;  %v4866_v47 = vadd.f32 %v8337_v40, %v4827_v36  ;;  %v4830_v57 = vadd.f32 %v4315_v35, %v8226_v48  ;;  %v4314_v16 = vadd.f32 %v4291_v2, %v4083_v0  ;;  %v8651_v35 = vld [vmem:[#allocation31_spill] sm:$0xff] }
 0x3eb   : > { %v6213_v38 = vpop.f32.mrf.mxu1  ;;  %v6241_v39 = vpop.f32.mrf.mxu0 }
 0x3ec   : > { %4899 = vst.msk [vmem:[%s8352_s26 + $0x68] sm:$0xff] %vm457_vm2, %v4883_v10  ;;  %v4882_v51 = vmax.f32 %v4866_v47, 0.0  ;;  %v4869_v55 = vadd.f32 %v8337_v40, %v4830_v57  ;;  %v4829_v8 = vadd.f32 %v4314_v16, %v3597_v24  ;;  %v4533_v13 = vadd.f32 %v6213_v38, %v8329_v6  ;;  %v8652_v57 = vld [vmem:[#allocation32_spill] sm:$0xff] }
 0x3ed   : > { %v4527_v11 = vpop.f32.mrf.mxu1  ;;  %v4720_v56 = vpop.f32.mrf.mxu0 }
 0x3ee   : > { %4898 = vst.msk [vmem:[%s8352_s26 + $0x60] sm:$0xff] %vm457_vm2, %v4882_v51  ;;  %v4885_v60 = vmax.f32 %v4869_v55, 0.0  ;;  %v4868_v48 = vadd.f32 %v8337_v40, %v4829_v8  ;;  %v4800_v29 = vadd.f32 %v6241_v39, %v4533_v13  ;;  %v4528_v21 = vadd.f32 %v4527_v11, %v8339_v43  ;;  %v8653_v8 = vld [vmem:[#allocation33_spill] sm:$0xff] }
 0x3ef   : > { %v6216_v37 = vpop.f32.mrf.mxu1  ;;  %v6244_v5 = vpop.f32.mrf.mxu0 }
 0x3f0   : > { %4901 = vst.msk [vmem:[%s8352_s26 + $0x78] sm:$0xff] %vm457_vm2, %v4885_v60  ;;  %v4884_v44 = vmax.f32 %v4868_v48, 0.0  ;;  %v4832_v31 = vadd.f32 %v4800_v29, %v8231_v54  ;;  %v4799_v1 = vadd.f32 %v4720_v56, %v4528_v21  ;;  %v4543_v6 = vadd.f32 %v6216_v37, %v8344_v41  ;;  %v8654_v37 = vld [vmem:[#allocation34_spill] sm:$0xff] }
 0x3f1   : > { %v4537_v62 = vpop.f32.mrf.mxu1  ;;  %v4730_v49 = vpop.f32.mrf.mxu0 }
 0x3f2   : > { %4900 = vst.msk [vmem:[%s8352_s26 + $0x70] sm:$0xff] %vm457_vm2, %v4884_v44  ;;  %v4903_v22 = vadd.f32 %v8337_v40, %v4832_v31  ;;  %v4831_v27 = vadd.f32 %v4799_v1, %v8234_v17  ;;  %v4802_v25 = vadd.f32 %v6244_v5, %v4543_v6  ;;  %v4538_v43 = vadd.f32 %v4537_v62, %v8357_v19 }
 0x3f3   : > { %v6219_v50 = vpop.f32.mrf.mxu1  ;;  %v6247_v53 = vpop.f32.mrf.mxu0 }
 0x3f4   : > { %v4919_v3 = vmax.f32 %v4903_v22, 0.0  ;;  %v4902_v59 = vadd.f32 %v8337_v40, %v4831_v27  ;;  %v4834_v54 = vadd.f32 %v4802_v25, %v8237_v42  ;;  %v4801_v26 = vadd.f32 %v4730_v49, %v4538_v43  ;;  %v8655_v49 = vld [vmem:[#allocation35_spill] sm:$0xff] }
 0x3f5   : > { %v4553_v41 = vadd.f32 %v6219_v50, %v8362_v34  ;;  %v4547_v61 = vpop.f32.mrf.mxu1  ;;  %v4740_v18 = vpop.f32.mrf.mxu0 }
 0x3f6   : > { %v4918_v15 = vmax.f32 %v4902_v59, 0.0  ;;  %v4905_v23 = vadd.f32 %v8337_v40, %v4834_v54  ;;  %v4833_v17 = vadd.f32 %v4801_v26, %v8650_v28  ;;  %v4548_v0 = vadd.f32 %v4547_v61, %v8371_v7  ;;  %4952 = vrot.lane.b32.xlu1 %v4919_v3, %s6299_s13  ;;  %v8656_v54 = vld [vmem:[#allocation36_spill] sm:$0xff] }
 0x3f7   : > { %v4804_v19 = vadd.f32 %v6247_v53, %v4553_v41  ;;  %v6222_v33 = vpop.f32.mrf.mxu1  ;;  %v6250_v58 = vpop.f32.mrf.mxu0 }
 0x3f8   : > { %v4921_v32 = vmax.f32 %v4905_v23, 0.0  ;;  %v4904_v42 = vadd.f32 %v8337_v40, %v4833_v17  ;;  %v4803_v36 = vadd.f32 %v4740_v18, %v4548_v0  ;;  %v4563_v34 = vadd.f32 %v6222_v33, %v8380_v9  ;;  %4950 = vrot.lane.b32.xlu0 %v4918_v15, %s6299_s13  ;;  %v8657_v15 = vld [vmem:[#allocation37_spill] sm:$0xff]  ;;  %v8658_v33 = vld [vmem:[#allocation38_spill] sm:$0xff] }
 0x3f9   : > { %v4836_v24 = vadd.f32 %v4804_v19, %v8651_v35  ;;  %v4557_v2 = vpop.f32.mrf.mxu1  ;;  %v4750_v10 = vpop.f32.mrf.mxu0 }
 0x3fa   : > { %v4920_v47 = vmax.f32 %v4904_v42, 0.0  ;;  %v4835_v7 = vadd.f32 %v4803_v36, %v8652_v57  ;;  %v4806_v16 = vadd.f32 %v6250_v58, %v4563_v34  ;;  %v4558_v38 = vadd.f32 %v4557_v2, %v8390_v52  ;;  %4956 = vrot.lane.b32.xlu1 %v4921_v32, %s6299_s13  ;;  %v8659_v2 = vld [vmem:[#allocation39_spill] sm:$0xff] }
 0x3fb   : > { %v4907_v39 = vadd.f32 %v8337_v40, %v4836_v24  ;;  %v6225_v51 = vpop.f32.mrf.mxu1  ;;  %v6253_v55 = vpop.f32.mrf.mxu0 }
 0x3fc   : > { %v4906_v9 = vadd.f32 %v8337_v40, %v4835_v7  ;;  %v4838_v13 = vadd.f32 %v4806_v16, %v8653_v8  ;;  %v4805_v11 = vadd.f32 %v4750_v10, %v4558_v38  ;;  %v4573_v56 = vadd.f32 %v6225_v51, %v8399_v20  ;;  %4954 = vrot.lane.b32.xlu0 %v4920_v47, %s6299_s13 }
 0x3fd   : > { %v4923_v60 = vmax.f32 %v4907_v39, 0.0  ;;  %v4567_v48 = vpop.f32.mrf.mxu1  ;;  %v4760_v29 = vpop.f32.mrf.mxu0 }
 0x3fe   : > { %v4922_v21 = vmax.f32 %v4906_v9, 0.0  ;;  %v4909_v52 = vadd.f32 %v8337_v40, %v4838_v13  ;;  %v4837_v5 = vadd.f32 %v4805_v11, %v8654_v37  ;;  %v4808_v44 = vadd.f32 %v6253_v55, %v4573_v56 }
 0x3ff   : > { %v4568_v31 = vadd.f32 %v4567_v48, %v8409_v46  ;;  %4960 = vrot.lane.b32.xlu1 %v4923_v60, %s6299_s13  ;;  %v6228_v1 = vpop.f32.mrf.mxu1  ;;  %v6256_v6 = vpop.f32.mrf.mxu0  ;;  %v8662_v48 = vld [vmem:[#allocation42_spill] sm:$0xff] }
 0x400   : > { %v4925_v62 = vmax.f32 %v4909_v52, 0.0  ;;  %v4908_v20 = vadd.f32 %v8337_v40, %v4837_v5  ;;  %v4840_v22 = vadd.f32 %v4808_v44, %v8655_v49  ;;  %v4583_v27 = vadd.f32 %v6228_v1, %v8418_v14  ;;  %4958 = vrot.lane.b32.xlu0 %v4922_v21, %s6299_s13 }
 0x401   : > { %v4807_v25 = vadd.f32 %v4760_v29, %v4568_v31  ;;  %v4577_v43 = vpop.f32.mrf.mxu1  ;;  %v4770_v50 = vpop.f32.mrf.mxu0 }
 0x402   : > { %v4924_v53 = vmax.f32 %v4908_v20, 0.0  ;;  %v4911_v3 = vadd.f32 %v8337_v40, %v4840_v22  ;;  %v4810_v46 = vadd.f32 %v6256_v6, %v4583_v27  ;;  %v4578_v59 = vadd.f32 %v4577_v43, %v8428_v63 }
 0x403   : > { %v4839_v26 = vadd.f32 %v4807_v25, %v8656_v54  ;;  %4964 = vrot.lane.b32.xlu1 %v4925_v62, %s6299_s13  ;;  %v6231_v41 = vpop.f32.mrf.mxu1  ;;  %v6259_v61 = vpop.f32.mrf.mxu0 }
 0x404   : > { %v4927_v18 = vmax.f32 %v4911_v3, 0.0  ;;  %v4842_v14 = vadd.f32 %v4810_v46, %v8657_v15  ;;  %v4809_v23 = vadd.f32 %v4770_v50, %v4578_v59  ;;  %v4593_v28 = vadd.f32 %v6231_v41, %v8437_v30  ;;  %4962 = vrot.lane.b32.xlu0 %v4924_v53, %s6299_s13 }
 0x405   : > { %v4910_v17 = vadd.f32 %v8337_v40, %v4839_v26  ;;  %v4587_v0 = vpop.f32.mrf.mxu1  ;;  %v4780_v19 = vpop.f32.mrf.mxu0 }
 0x406   : > { %v4913_v63 = vadd.f32 %v8337_v40, %v4842_v14  ;;  %v4841_v58 = vadd.f32 %v4809_v23, %v8658_v33  ;;  %v4812_v32 = vadd.f32 %v6259_v61, %v4593_v28  ;;  %v4588_v42 = vadd.f32 %v4587_v0, %v8447_v45  ;;  %v8660_v45 = vld [vmem:[#allocation40_spill] sm:$0xff] }
 0x407   : > { %v4926_v36 = vmax.f32 %v4910_v17, 0.0  ;;  %4968 = vrot.lane.b32.xlu1 %v4927_v18, %s6299_s13  ;;  %v6234_v34 = vpop.f32.mrf.mxu1  ;;  %v6262_v35 = vpop.f32.mrf.mxu0 }
 0x408   : > { %v4929_v24 = vmax.f32 %v4913_v63, 0.0  ;;  %v4912_v30 = vadd.f32 %v8337_v40, %v4841_v58  ;;  %v4844_v10 = vadd.f32 %v4812_v32, %v8659_v2  ;;  %v4811_v47 = vadd.f32 %v4780_v19, %v4588_v42 }
 0x409   : > { %v4603_v57 = vadd.f32 %v6234_v34, %v8456_v4  ;;  %4966 = vrot.lane.b32.xlu0 %v4926_v36, %s6299_s13  ;;  %v4597_v7 = vpop.f32.mrf.mxu1  ;;  %v4790_v9 = vpop.f32.mrf.mxu0  ;;  %v8661_v4 = vld [vmem:[#allocation41_spill] sm:$0xff] }
 0x40a   : > { %v4928_v16 = vmax.f32 %v4912_v30, 0.0  ;;  %v4915_v38 = vadd.f32 %v8337_v40, %v4844_v10  ;;  %v4843_v39 = vadd.f32 %v4811_v47, %v8660_v45  ;;  %v4598_v51 = vadd.f32 %v4597_v7, %v8462_v12 }
 0x40b   : > { %v4814_v55 = vadd.f32 %v6262_v35, %v4603_v57  ;;  %4972 = vrot.lane.b32.xlu1 %v4929_v24, %s6299_s13 }
 0x40c   : > { %v4931_v8 = vmax.f32 %v4915_v38, 0.0  ;;  %v4914_v13 = vadd.f32 %v8337_v40, %v4843_v39  ;;  %v4813_v11 = vadd.f32 %v4790_v9, %v4598_v51 }
 0x40d   : > { %v4846_v56 = vadd.f32 %v4814_v55, %v8661_v4  ;;  %4970 = vrot.lane.b32.xlu0 %v4928_v16, %s6299_s13 }
 0x40e   : > { %v4930_v60 = vmax.f32 %v4914_v13, 0.0  ;;  %v4845_v29 = vadd.f32 %v4813_v11, %v8662_v48 }
 0x40f   : > { %v4917_v12 = vadd.f32 %v8337_v40, %v4846_v56  ;;  %4976 = vrot.lane.b32.xlu1 %v4931_v8, %s6299_s13 }
 0x410   : > { %v4916_v21 = vadd.f32 %v8337_v40, %v4845_v29 }
 0x411   : > { %v4933_v52 = vmax.f32 %v4917_v12, 0.0  ;;  %4974 = vrot.lane.b32.xlu0 %v4930_v60, %s6299_s13 }
 0x412   : > { %v4932_v37 = vmax.f32 %v4916_v21, 0.0 }
 0x413   : > { %4980 = vrot.lane.b32.xlu1 %v4933_v52, %s6299_s13 }
 0x415   : > { %4978 = vrot.lane.b32.xlu0 %v4932_v37, %s6299_s13 }
 0x468   : > { %v4953_v5 = vpop.permute.xlu1 %4952 }
 0x469   : > { %4999 = vst.msk [vmem:[%s8352_s26 + $0x8] sm:$0xff] %vm1103_vm10, %v4953_v5 }
 0x46a   : > { %v4951_v44 = vpop.permute.xlu0 %4950 }
 0x46b   : > { %4998 = vst.msk [vmem:[%s8352_s26] sm:$0xff] %vm1103_vm10, %v4951_v44 }
 0x46c   : > { %v4957_v40 = vpop.permute.xlu1 %4956 }
 0x46d   : > { %5001 = vst.msk [vmem:[%s8352_s26 + $0x18] sm:$0xff] %vm1103_vm10, %v4957_v40 }
 0x46e   : > { %v4955_v31 = vpop.permute.xlu0 %4954 }
 0x46f   : > { %5000 = vst.msk [vmem:[%s8352_s26 + $0x10] sm:$0xff] %vm1103_vm10, %v4955_v31 }
 0x471   : > { %v4961_v1 = vpop.permute.xlu1 %4960 }
 0x472   : > { %5003 = vst.msk [vmem:[%s8352_s26 + $0x28] sm:$0xff] %vm1103_vm10, %v4961_v1  ;;  %v4959_v6 = vpop.permute.xlu0 %4958 }
 0x473   : > { %5002 = vst.msk [vmem:[%s8352_s26 + $0x20] sm:$0xff] %vm1103_vm10, %v4959_v6 }
 0x475   : > { %v4965_v62 = vpop.permute.xlu1 %4964 }
 0x476   : > { %5005 = vst.msk [vmem:[%s8352_s26 + $0x38] sm:$0xff] %vm1103_vm10, %v4965_v62  ;;  %v4963_v20 = vpop.permute.xlu0 %4962 }
 0x477   : > { %5004 = vst.msk [vmem:[%s8352_s26 + $0x30] sm:$0xff] %vm1103_vm10, %v4963_v20 }
 0x479   : > { %v4969_v49 = vpop.permute.xlu1 %4968 }
 0x47a   : > { %5007 = vst.msk [vmem:[%s8352_s26 + $0x48] sm:$0xff] %vm1103_vm10, %v4969_v49 }
 0x47b   : > { %v4967_v22 = vpop.permute.xlu0 %4966 }
 0x47c   : > { %5006 = vst.msk [vmem:[%s8352_s26 + $0x40] sm:$0xff] %vm1103_vm10, %v4967_v22 }
 0x47d   : > { %v4973_v27 = vpop.permute.xlu1 %4972 }
 0x47e   : > { %5009 = vst.msk [vmem:[%s8352_s26 + $0x58] sm:$0xff] %vm1103_vm10, %v4973_v27 }
 0x47f   : > { %v4971_v25 = vpop.permute.xlu0 %4970 }
 0x480   : > { %5008 = vst.msk [vmem:[%s8352_s26 + $0x50] sm:$0xff] %vm1103_vm10, %v4971_v25 }
 0x481   : > { %v4977_v43 = vpop.permute.xlu1 %4976 }
 0x482   : > { %5011 = vst.msk [vmem:[%s8352_s26 + $0x68] sm:$0xff] %vm1103_vm10, %v4977_v43 }
 0x483   : > { %v4975_v50 = vpop.permute.xlu0 %4974 }
 0x484   : > { %5010 = vst.msk [vmem:[%s8352_s26 + $0x60] sm:$0xff] %vm1103_vm10, %v4975_v50 }
 0x485   : > { %v4981_v53 = vpop.permute.xlu1 %4980 }
 0x486   : > { %5013 = vst.msk [vmem:[%s8352_s26 + $0x78] sm:$0xff] %vm1103_vm10, %v4981_v53 }
 0x487   : > { %v4979_v3 = vpop.permute.xlu0 %4978 }
 0x488   : > { %5012 = vst.msk [vmem:[%s8352_s26 + $0x70] sm:$0xff] %vm1103_vm10, %v4979_v3 }
 0x489 PF: > { %s17_s24 = sadd.s32 1, %s6297_s24  }
 0x48a   : > { %p14_p4 = scmp.ge.s32.totalorder %s17_s24, 4  }
 0x48c   :  { %16 = sbr.rel (!%p14_p4) target bundleno = 1 (0x1), region = 95 }

</bundles_post_ra>
